<compile_context>
chip_gen: v6e
topology: v6e:2x2x1
jax: 0.10.0
libtpu: 0.0.40
codegen_flags: <defaults>
</compile_context>

<pallas_src>
import numpy as np
import jax
import jax.numpy as jnp
from jax.experimental import pallas as pl
from jax.experimental.pallas import tpu as pltpu

_SQRT_2_OVER_PI = 0.7978845608028654
_KSIZE = 3
_DIL = 2
_PAD = 2            # dilation * (ksize - 1) // 2  -> "same" spatial size
_NTAP = _KSIZE * _KSIZE


def _gelu_tanh(x):
    # TODO(synk): PyTorch F.gelu defaults to the exact erf form; the tanh
    # approximation is used for guaranteed Pallas/EUP lowering (|diff| ~1e-3).
    return 0.5 * x * (1.0 + jnp.tanh(_SQRT_2_OVER_PI * (x + 0.044715 * x * x * x)))


def _round_up(v, m):
    return (v + m - 1) // m * m


def _largest_divisor_leq(n, cap):
    for d in range(min(cap, n), 0, -1):
        if n % d == 0:
            return d
    return 1


def _padded_vmem_bytes(shape, dtype):
    """Bytes a block/scratch occupies in VMEM after (sublane, lane) tiling."""
    itemsize = np.dtype(dtype).itemsize
    shape = tuple(shape)
    if len(shape) == 1:
        shape = (1,) + shape
    lead = int(np.prod(shape[:-2])) if len(shape) > 2 else 1
    sub, lane = shape[-2], shape[-1]
    pack = max(1, 4 // itemsize)
    sub_p = _round_up(max(sub, 1), 8 * pack)
    lane_p = _round_up(max(lane, 1), 128)
    return lead * sub_p * lane_p * itemsize


def _make_ffn_kernel(offs, n1, n2, c_in, c_hid, c_out):
    """conv1(+bias,GELU) and conv2(+bias) fused; one K=9*C MXU dot per conv."""
    col_off = _DIL * (_KSIZE - 1) // 2     # column component of a tap offset (=2)

    def kernel(x_ref, w1_ref, b1_ref, w2_ref, b2_ref, mask_ref, o_ref,
               xcat_ref, hcat_ref):
        # ---- conv1: assemble im2col LHS (n1, 9*Cin) in VMEM, single MXU dot --
        for t, off in enumerate(offs):
            xcat_ref[:, t * c_in:(t + 1) * c_in] = x_ref[pl.ds(off, n1), :]
        acc1 = jnp.dot(xcat_ref[...], w1_ref[...],
                       preferred_element_type=jnp.float32)
        # Bias + GELU in f32; mask zeroes the wrap/alignment columns and the
        # halo rows outside the image (they double as conv2's zero padding).
        hid = _gelu_tanh(acc1 + b1_ref[...]) * mask_ref[...]
        hid_bf = hid.astype(jnp.bfloat16)

        # ---- conv2: scatter shifted hidden slices straight into the im2col
        # scratch; only the genuinely-padding row ranges are zero-filled -------
        for t, off in enumerate(offs):
            d = off - col_off                    # flat hidden shift of tap t
            lo, hi = t * c_hid, (t + 1) * c_hid
            a = max(0, -d)                       # valid destination rows [a, b)
            b = min(n2, n1 - d)
            if a > 0:
                hcat_ref[0:a, lo:hi] = jnp.zeros((a, c_hid), jnp.bfloat16)
            if b < n2:
                hcat_ref[b:n2, lo:hi] = jnp.zeros((n2 - b, c_hid), jnp.bfloat16)
            hcat_ref[a:b, lo:hi] = hid_bf[a + d:b + d, :]

        acc2 = jnp.dot(hcat_ref[...], w2_ref[...],
                       preferred_element_type=jnp.float32)
        o_ref[...] = (acc2 + b2_ref[...]).astype(o_ref.dtype)

    return kernel


def feed_forward_pallas(x, w1, b1, w2, b2, strip_h=None):
    """x: (B, Cin, H, W) float32 NCHW; w1/w2 in PyTorch OIHW layout; returns NCHW."""
    B, c_in, H, W = x.shape
    c_hid, c_out = w1.shape[0], w2.shape[0]

    # --- tiling parameters ----------------------------------------------------
    if strip_h is None or H % strip_h != 0:
        strip_h = _largest_divisor_leq(H, strip_h if strip_h else 64)
    S = H // strip_h                          # number of row strips
    w_p = _round_up(W + 2 * _PAD, 8)          # padded row width (sublane aligned)
    n1 = (strip_h + 2 * _PAD) * w_p           # hidden rows computed (incl. 2-row halo)
    n2 = strip_h * w_p                        # output rows stored per strip
    rows_in = strip_h + 4 * _PAD + 1          # input rows per strip (+1 guard row)
    flat_in = rows_in * w_p
    offs = [(kh * _DIL) * w_p + kw * _DIL
            for kh in range(_KSIZE) for kw in range(_KSIZE)]
    assert max(offs) + n1 <= flat_in          # largest tap read stays in bounds

    # --- wrapper-side layout (XLA): NCHW->NHWC, pad, overlapping row strips ---
    x_nhwc = jnp.transpose(x, (0, 2, 3, 1))
    x_pad = jnp.pad(x_nhwc, ((0, 0),
                             (2 * _PAD, 2 * _PAD + 1),    # conv1+conv2 halo + guard
                             (_PAD, w_p - W - _PAD),      # left pad + right pad/align
                             (0, 0)))
    x_strips = jnp.stack(
        [x_pad[:, s * strip_h: s * strip_h + rows_in] for s in range(S)], axis=1)
    x_strips = x_strips.reshape(B, S, flat_in, c_in).astype(jnp.bfloat16)

    # (O, I, 3, 3) -> (9*I, O): each conv becomes ONE dot with contraction 9*C.
    w1_cat = jnp.transpose(w1.reshape(c_hid, c_in, _NTAP), (2, 1, 0)) \
                .reshape(_NTAP * c_in, c_hid).astype(jnp.bfloat16)
    w2_cat = jnp.transpose(w2.reshape(c_out, c_hid, _NTAP), (2, 1, 0)) \
                .reshape(_NTAP * c_hid, c_out).astype(jnp.bfloat16)
    b1_r = b1.reshape(1, c_hid).astype(jnp.float32)
    b2_r = b2.reshape(1, c_out).astype(jnp.float32)

    # Per-strip hidden-validity mask (col < W and global row in [0, H)),
    # precomputed host-side so the kernel needs no integer div/mod.
    col = np.arange(n1, dtype=np.int64) % w_p
    row = np.arange(n1, dtype=np.int64) // w_p
    mask_np = np.empty((S, n1, 1), np.float32)
    for s in range(S):
        g = s * strip_h + row - _PAD
        mask_np[s, :, 0] = ((col < W) & (g >= 0) & (g < H)).astype(np.float32)
    mask = jnp.asarray(mask_np)

    kernel = _make_ffn_kernel(offs, n1, n2, c_in, c_hid, c_out)

    # --- explicit VMEM budget (padded sizes, double-buffered blocks, headroom) -
    blocks = (
        2 * _padded_vmem_bytes((flat_in, c_in), jnp.bfloat16) +
        2 * _padded_vmem_bytes((n1, 1), jnp.float32) +
        2 * _padded_vmem_bytes((n2, c_out), jnp.float32) +
        2 * (_padded_vmem_bytes((_NTAP * c_in, c_hid), jnp.bfloat16) +
             _padded_vmem_bytes((_NTAP * c_hid, c_out), jnp.bfloat16) +
             _padded_vmem_bytes((1, c_hid), jnp.float32) +
             _padded_vmem_bytes((1, c_out), jnp.float32)))
    scratch = (_padded_vmem_bytes((n1, _NTAP * c_in), jnp.bfloat16) +
               _padded_vmem_bytes((n2, _NTAP * c_hid), jnp.bfloat16))
    vmem_limit = int(min(max(2 * (blocks + scratch), 32 << 20), 64 << 20))

    out = pl.pallas_call(
        kernel,
        out_shape=jax.ShapeDtypeStruct((B, S, n2, c_out), jnp.float32),
        grid_spec=pltpu.PrefetchScalarGridSpec(
            num_scalar_prefetch=0,
            grid=(B, S),
            in_specs=[
                pl.BlockSpec((None, None, flat_in, c_in), lambda b, s: (b, s, 0, 0)),
                pl.BlockSpec((_NTAP * c_in, c_hid), lambda b, s: (0, 0)),
                pl.BlockSpec((1, c_hid), lambda b, s: (0, 0)),
                pl.BlockSpec((_NTAP * c_hid, c_out), lambda b, s: (0, 0)),
                pl.BlockSpec((1, c_out), lambda b, s: (0, 0)),
                pl.BlockSpec((None, n1, 1), lambda b, s: (s, 0, 0)),
            ],
            out_specs=pl.BlockSpec((None, None, n2, c_out),
                                   lambda b, s: (b, s, 0, 0)),
            scratch_shapes=[
                pltpu.VMEM((n1, _NTAP * c_in), jnp.bfloat16),   # conv1 im2col LHS
                pltpu.VMEM((n2, _NTAP * c_hid), jnp.bfloat16),  # conv2 im2col LHS
            ],
        ),
        compiler_params=pltpu.CompilerParams(
            dimension_semantics=("parallel", "parallel"),
            vmem_limit_bytes=vmem_limit),
    )(x_strips, w1_cat, b1_r, w2_cat, b2_r, mask)

    # Drop wrap/alignment columns; back to NCHW.
    out = out.reshape(B, S, strip_h, w_p, c_out)[:, :, :, :W, :]
    out = out.reshape(B, H, W, c_out)
    # TODO(synk): output last dim is c_out (<128 for typical dims) -> masked
    # stores; a channels-major (lane-dense) layout would be a further win.
    return jnp.transpose(out, (0, 3, 1, 2))


# ----------------------------- reference (numpy, f64) ------------------------
def _np_gelu_tanh(x):
    return 0.5 * x * (1.0 + np.tanh(_SQRT_2_OVER_PI * (x + 0.044715 * x ** 3)))


def _np_dilated_conv(x, w, b):
    B, ci, H, W = x.shape
    co = w.shape[0]
    xp = np.pad(x, ((0, 0), (0, 0), (_PAD, _PAD), (_PAD, _PAD)))
    y = np.zeros((B, co, H, W), np.float64)
    for kh in range(_KSIZE):
        for kw in range(_KSIZE):
            patch = xp[:, :, kh * _DIL:kh * _DIL + H, kw * _DIL:kw * _DIL + W]
            y += np.einsum('bchw,oc->bohw', patch, w[:, :, kh, kw])
    return y + b.reshape(1, co, 1, 1)


def reference_feed_forward(x, w1, b1, w2, b2):
    x, w1, b1, w2, b2 = (np.asarray(a, np.float64) for a in (x, w1, b1, w2, b2))
    h = _np_gelu_tanh(_np_dilated_conv(x, w1, b1))
    return _np_dilated_conv(h, w2, b2)


if __name__ == "__main__":
    # FeedForward(dim=4, ffn_expansion_factor=2.0, bias=True) on a (2,4,16,16) input.
    B, dim, H, W = 2, 4, 16, 16
    hidden = int(dim * 2.0)

    key = jax.random.PRNGKey(0)
    kx, k1, k2, k3, k4 = jax.random.split(key, 5)
    x = jax.random.normal(kx, (B, dim, H, W), jnp.float32)
    w1 = 0.1 * jax.random.normal(k1, (hidden, dim, 3, 3), jnp.float32)
    b1 = 0.1 * jax.random.normal(k2, (hidden,), jnp.float32)
    w2 = 0.1 * jax.random.normal(k3, (dim, hidden, 3, 3), jnp.float32)
    b2 = 0.1 * jax.random.normal(k4, (dim,), jnp.float32)

    # strip_h=8 -> 2 row strips per image: exercises the halo-recompute tiling
    # and gives the (B, S) = (2, 2) grid parallel steps for the v7x megacore.
    out = feed_forward_pallas(x, w1, b1, w2, b2, strip_h=8)
    out = jax.block_until_ready(out)

    ref = reference_feed_forward(x, w1, b1, w2, b2)
    assert out.shape == (B, dim, H, W)
    # Tolerance dominated by bf16 MXU operands (tanh-GELU form matched in ref).
    np.testing.assert_allclose(np.asarray(out, np.float64), ref,
                               rtol=2e-2, atol=2e-2)
    print("KERNEL_OK")
</pallas_src>

<mosaic_0001>
module attributes {stable_mosaic.version = 11 : i64} {
  func.func @kernel(%arg0: i32, %arg1: i32, %arg2: memref<1x1x408x4xbf16, #tpu.memory_space<vmem>>, %arg3: memref<36x8xbf16, #tpu.memory_space<vmem>>, %arg4: memref<1x8xf32, #tpu.memory_space<vmem>>, %arg5: memref<72x4xbf16, #tpu.memory_space<vmem>>, %arg6: memref<1x4xf32, #tpu.memory_space<vmem>>, %arg7: memref<1x288x1xf32, #tpu.memory_space<vmem>>, %arg8: memref<1x1x192x4xf32, #tpu.memory_space<vmem>>, %arg9: memref<288x36xbf16, #tpu.memory_space<vmem>>, %arg10: memref<192x72xbf16, #tpu.memory_space<vmem>>) attributes {dimension_semantics = [#tpu.dimension_semantics<parallel>, #tpu.dimension_semantics<parallel>], iteration_bounds = array<i64: 2, 2>, scalar_prefetch = 0 : i64, scratch_operands = 2 : i64, tpu.core_type = #tpu.core_type<tc>, window_params = [{transform_indices = @transform_0, window_bounds = array<i64: 1, 1, 408, 4>}, {pipeline_mode = #tpu.pipeline_mode<synchronous>, transform_indices = @transform_1, window_bounds = array<i64: 36, 8>}, {pipeline_mode = #tpu.pipeline_mode<synchronous>, transform_indices = @transform_2, window_bounds = array<i64: 1, 8>}, {pipeline_mode = #tpu.pipeline_mode<synchronous>, transform_indices = @transform_3, window_bounds = array<i64: 72, 4>}, {pipeline_mode = #tpu.pipeline_mode<synchronous>, transform_indices = @transform_4, window_bounds = array<i64: 1, 4>}, {transform_indices = @transform_5, window_bounds = array<i64: 1, 288, 1>}, {transform_indices = @transform_6, window_bounds = array<i64: 1, 1, 192, 4>}]} {
    %c0 = arith.constant 0 : index
    %c0_0 = arith.constant 0 : index
    %c0_1 = arith.constant 0 : index
    %c0_2 = arith.constant 0 : index
    %0 = vector.load %arg2[%c0, %c0_0, %c0_1, %c0_2] : memref<1x1x408x4xbf16, #tpu.memory_space<vmem>>, vector<1x1x288x4xbf16>
    %1 = vector.shape_cast %0 : vector<1x1x288x4xbf16> to vector<288x4xbf16>
    %c0_3 = arith.constant 0 : index
    %c0_4 = arith.constant 0 : index
    %2 = vector.load %arg9[%c0_3, %c0_4] : memref<288x36xbf16, #tpu.memory_space<vmem>>, vector<288x4xbf16>
    tpu.vector_store %arg9[%c0_3, %c0_4], %1 {strides = array<i32>} : memref<288x36xbf16, #tpu.memory_space<vmem>>, vector<288x4xbf16>,
    %c0_5 = arith.constant 0 : index
    %c0_6 = arith.constant 0 : index
    %c2 = arith.constant 2 : index
    %c0_7 = arith.constant 0 : index
    %3 = vector.load %arg2[%c0_5, %c0_6, %c2, %c0_7] : memref<1x1x408x4xbf16, #tpu.memory_space<vmem>>, vector<1x1x288x4xbf16>
    %4 = vector.shape_cast %3 : vector<1x1x288x4xbf16> to vector<288x4xbf16>
    %c0_8 = arith.constant 0 : index
    %c4 = arith.constant 4 : index
    %5 = vector.load %arg9[%c0_8, %c4] : memref<288x36xbf16, #tpu.memory_space<vmem>>, vector<288x4xbf16>
    tpu.vector_store %arg9[%c0_8, %c4], %4 {strides = array<i32>} : memref<288x36xbf16, #tpu.memory_space<vmem>>, vector<288x4xbf16>,
    %c0_9 = arith.constant 0 : index
    %c0_10 = arith.constant 0 : index
    %c4_11 = arith.constant 4 : index
    %c0_12 = arith.constant 0 : index
    %6 = vector.load %arg2[%c0_9, %c0_10, %c4_11, %c0_12] : memref<1x1x408x4xbf16, #tpu.memory_space<vmem>>, vector<1x1x288x4xbf16>
    %7 = vector.shape_cast %6 : vector<1x1x288x4xbf16> to vector<288x4xbf16>
    %c0_13 = arith.constant 0 : index
    %c8 = arith.constant 8 : index
    %8 = vector.load %arg9[%c0_13, %c8] : memref<288x36xbf16, #tpu.memory_space<vmem>>, vector<288x4xbf16>
    tpu.vector_store %arg9[%c0_13, %c8], %7 {strides = array<i32>} : memref<288x36xbf16, #tpu.memory_space<vmem>>, vector<288x4xbf16>,
    %c0_14 = arith.constant 0 : index
    %c0_15 = arith.constant 0 : index
    %c48 = arith.constant 48 : index
    %c0_16 = arith.constant 0 : index
    %9 = vector.load %arg2[%c0_14, %c0_15, %c48, %c0_16] : memref<1x1x408x4xbf16, #tpu.memory_space<vmem>>, vector<1x1x288x4xbf16>
    %10 = vector.shape_cast %9 : vector<1x1x288x4xbf16> to vector<288x4xbf16>
    %c0_17 = arith.constant 0 : index
    %c12 = arith.constant 12 : index
    %11 = vector.load %arg9[%c0_17, %c12] : memref<288x36xbf16, #tpu.memory_space<vmem>>, vector<288x4xbf16>
    tpu.vector_store %arg9[%c0_17, %c12], %10 {strides = array<i32>} : memref<288x36xbf16, #tpu.memory_space<vmem>>, vector<288x4xbf16>,
    %c0_18 = arith.constant 0 : index
    %c0_19 = arith.constant 0 : index
    %c50 = arith.constant 50 : index
    %c0_20 = arith.constant 0 : index
    %12 = vector.load %arg2[%c0_18, %c0_19, %c50, %c0_20] : memref<1x1x408x4xbf16, #tpu.memory_space<vmem>>, vector<1x1x288x4xbf16>
    %13 = vector.shape_cast %12 : vector<1x1x288x4xbf16> to vector<288x4xbf16>
    %c0_21 = arith.constant 0 : index
    %c16 = arith.constant 16 : index
    %14 = vector.load %arg9[%c0_21, %c16] : memref<288x36xbf16, #tpu.memory_space<vmem>>, vector<288x4xbf16>
    tpu.vector_store %arg9[%c0_21, %c16], %13 {strides = array<i32>} : memref<288x36xbf16, #tpu.memory_space<vmem>>, vector<288x4xbf16>,
    %c0_22 = arith.constant 0 : index
    %c0_23 = arith.constant 0 : index
    %c52 = arith.constant 52 : index
    %c0_24 = arith.constant 0 : index
    %15 = vector.load %arg2[%c0_22, %c0_23, %c52, %c0_24] : memref<1x1x408x4xbf16, #tpu.memory_space<vmem>>, vector<1x1x288x4xbf16>
    %16 = vector.shape_cast %15 : vector<1x1x288x4xbf16> to vector<288x4xbf16>
    %c0_25 = arith.constant 0 : index
    %c20 = arith.constant 20 : index
    %17 = vector.load %arg9[%c0_25, %c20] : memref<288x36xbf16, #tpu.memory_space<vmem>>, vector<288x4xbf16>
    tpu.vector_store %arg9[%c0_25, %c20], %16 {strides = array<i32>} : memref<288x36xbf16, #tpu.memory_space<vmem>>, vector<288x4xbf16>,
    %c0_26 = arith.constant 0 : index
    %c0_27 = arith.constant 0 : index
    %c96 = arith.constant 96 : index
    %c0_28 = arith.constant 0 : index
    %18 = vector.load %arg2[%c0_26, %c0_27, %c96, %c0_28] : memref<1x1x408x4xbf16, #tpu.memory_space<vmem>>, vector<1x1x288x4xbf16>
    %19 = vector.shape_cast %18 : vector<1x1x288x4xbf16> to vector<288x4xbf16>
    %c0_29 = arith.constant 0 : index
    %c24 = arith.constant 24 : index
    %20 = vector.load %arg9[%c0_29, %c24] : memref<288x36xbf16, #tpu.memory_space<vmem>>, vector<288x4xbf16>
    tpu.vector_store %arg9[%c0_29, %c24], %19 {strides = array<i32>} : memref<288x36xbf16, #tpu.memory_space<vmem>>, vector<288x4xbf16>,
    %c0_30 = arith.constant 0 : index
    %c0_31 = arith.constant 0 : index
    %c98 = arith.constant 98 : index
    %c0_32 = arith.constant 0 : index
    %21 = vector.load %arg2[%c0_30, %c0_31, %c98, %c0_32] : memref<1x1x408x4xbf16, #tpu.memory_space<vmem>>, vector<1x1x288x4xbf16>
    %22 = vector.shape_cast %21 : vector<1x1x288x4xbf16> to vector<288x4xbf16>
    %c0_33 = arith.constant 0 : index
    %c28 = arith.constant 28 : index
    %23 = vector.load %arg9[%c0_33, %c28] : memref<288x36xbf16, #tpu.memory_space<vmem>>, vector<288x4xbf16>
    tpu.vector_store %arg9[%c0_33, %c28], %22 {strides = array<i32>} : memref<288x36xbf16, #tpu.memory_space<vmem>>, vector<288x4xbf16>,
    %c0_34 = arith.constant 0 : index
    %c0_35 = arith.constant 0 : index
    %c100 = arith.constant 100 : index
    %c0_36 = arith.constant 0 : index
    %24 = vector.load %arg2[%c0_34, %c0_35, %c100, %c0_36] : memref<1x1x408x4xbf16, #tpu.memory_space<vmem>>, vector<1x1x288x4xbf16>
    %25 = vector.shape_cast %24 : vector<1x1x288x4xbf16> to vector<288x4xbf16>
    %c0_37 = arith.constant 0 : index
    %c32 = arith.constant 32 : index
    %26 = vector.load %arg9[%c0_37, %c32] : memref<288x36xbf16, #tpu.memory_space<vmem>>, vector<288x4xbf16>
    tpu.vector_store %arg9[%c0_37, %c32], %25 {strides = array<i32>} : memref<288x36xbf16, #tpu.memory_space<vmem>>, vector<288x4xbf16>,
    %c0_38 = arith.constant 0 : index
    %c0_39 = arith.constant 0 : index
    %27 = vector.load %arg9[%c0_38, %c0_39] : memref<288x36xbf16, #tpu.memory_space<vmem>>, vector<288x36xbf16>
    %c0_40 = arith.constant 0 : index
    %c0_41 = arith.constant 0 : index
    %28 = vector.load %arg3[%c0_40, %c0_41] : memref<36x8xbf16, #tpu.memory_space<vmem>>, vector<36x8xbf16>
    %cst = arith.constant dense<0.000000e+00> : vector<288x8xf32>
    %29 = tpu.matmul %27, %28, %cst {dimension_numbers = #tpu.dot_dimension_numbers<[1], [0], [0], [1], [0, 0, 1, 1], [], []>} : vector<288x36xbf16>, vector<36x8xbf16>, vector<288x8xf32> -> vector<288x8xf32>
    %c0_42 = arith.constant 0 : index
    %c0_43 = arith.constant 0 : index
    %30 = vector.load %arg4[%c0_42, %c0_43] : memref<1x8xf32, #tpu.memory_space<vmem>>, vector<1x8xf32>
    %31 = vector.broadcast %30 : vector<1x8xf32> to vector<288x8xf32>
    %32 = arith.addf %29, %31 : vector<288x8xf32>
    %cst_44 = arith.constant 5.000000e-01 : f32
    %33 = vector.broadcast %cst_44 : f32 to vector<288x8xf32>
    %34 = arith.mulf %33, %32 : vector<288x8xf32>
    %cst_45 = arith.constant 4.471500e-02 : f32
    %35 = vector.broadcast %cst_45 : f32 to vector<288x8xf32>
    %36 = arith.mulf %35, %32 : vector<288x8xf32>
    %37 = arith.mulf %36, %32 : vector<288x8xf32>
    %38 = arith.mulf %37, %32 : vector<288x8xf32>
    %39 = arith.addf %32, %38 : vector<288x8xf32>
    %cst_46 = arith.constant 0.797884583 : f32
    %40 = vector.broadcast %cst_46 : f32 to vector<288x8xf32>
    %41 = arith.mulf %40, %39 : vector<288x8xf32>
    %42 = math.tanh %41 : vector<288x8xf32>
    %cst_47 = arith.constant 1.000000e+00 : f32
    %43 = vector.broadcast %cst_47 : f32 to vector<288x8xf32>
    %44 = arith.addf %43, %42 : vector<288x8xf32>
    %45 = arith.mulf %34, %44 : vector<288x8xf32>
    %c0_48 = arith.constant 0 : index
    %c0_49 = arith.constant 0 : index
    %c0_50 = arith.constant 0 : index
    %46 = vector.load %arg7[%c0_48, %c0_49, %c0_50] : memref<1x288x1xf32, #tpu.memory_space<vmem>>, vector<1x288x1xf32>
    %47 = vector.shape_cast %46 : vector<1x288x1xf32> to vector<288x1xf32>
    %48 = vector.broadcast %47 : vector<288x1xf32> to vector<288x8xf32>
    %49 = arith.mulf %45, %48 : vector<288x8xf32>
    %50 = arith.truncf %49 : vector<288x8xf32> to vector<288x8xbf16>
    %cst_51 = arith.constant 0.000000e+00 : bf16
    %51 = vector.broadcast %cst_51 : bf16 to vector<2x8xbf16>
    %c0_52 = arith.constant 0 : index
    %c0_53 = arith.constant 0 : index
    %52 = vector.load %arg10[%c0_52, %c0_53] : memref<192x72xbf16, #tpu.memory_space<vmem>>, vector<2x8xbf16>
    tpu.vector_store %arg10[%c0_52, %c0_53], %51 {strides = array<i32>} : memref<192x72xbf16, #tpu.memory_space<vmem>>, vector<2x8xbf16>,
    %53 = vector.extract_strided_slice %50 {offsets = [0, 0], sizes = [190, 8], strides = [1, 1]} : vector<288x8xbf16> to vector<190x8xbf16>
    %c2_54 = arith.constant 2 : index
    %c0_55 = arith.constant 0 : index
    %54 = vector.load %arg10[%c2_54, %c0_55] : memref<192x72xbf16, #tpu.memory_space<vmem>>, vector<190x8xbf16>
    tpu.vector_store %arg10[%c2_54, %c0_55], %53 {strides = array<i32>} : memref<192x72xbf16, #tpu.memory_space<vmem>>, vector<190x8xbf16>,
    %55 = vector.extract_strided_slice %50 {offsets = [0, 0], sizes = [192, 8], strides = [1, 1]} : vector<288x8xbf16> to vector<192x8xbf16>
    %c0_56 = arith.constant 0 : index
    %c8_57 = arith.constant 8 : index
    %56 = vector.load %arg10[%c0_56, %c8_57] : memref<192x72xbf16, #tpu.memory_space<vmem>>, vector<192x8xbf16>
    tpu.vector_store %arg10[%c0_56, %c8_57], %55 {strides = array<i32>} : memref<192x72xbf16, #tpu.memory_space<vmem>>, vector<192x8xbf16>,
    %57 = vector.extract_strided_slice %50 {offsets = [2, 0], sizes = [192, 8], strides = [1, 1]} : vector<288x8xbf16> to vector<192x8xbf16>
    %c0_58 = arith.constant 0 : index
    %c16_59 = arith.constant 16 : index
    %58 = vector.load %arg10[%c0_58, %c16_59] : memref<192x72xbf16, #tpu.memory_space<vmem>>, vector<192x8xbf16>
    tpu.vector_store %arg10[%c0_58, %c16_59], %57 {strides = array<i32>} : memref<192x72xbf16, #tpu.memory_space<vmem>>, vector<192x8xbf16>,
    %59 = vector.extract_strided_slice %50 {offsets = [46, 0], sizes = [192, 8], strides = [1, 1]} : vector<288x8xbf16> to vector<192x8xbf16>
    %c0_60 = arith.constant 0 : index
    %c24_61 = arith.constant 24 : index
    %60 = vector.load %arg10[%c0_60, %c24_61] : memref<192x72xbf16, #tpu.memory_space<vmem>>, vector<192x8xbf16>
    tpu.vector_store %arg10[%c0_60, %c24_61], %59 {strides = array<i32>} : memref<192x72xbf16, #tpu.memory_space<vmem>>, vector<192x8xbf16>,
    %61 = vector.extract_strided_slice %50 {offsets = [48, 0], sizes = [192, 8], strides = [1, 1]} : vector<288x8xbf16> to vector<192x8xbf16>
    %c0_62 = arith.constant 0 : index
    %c32_63 = arith.constant 32 : index
    %62 = vector.load %arg10[%c0_62, %c32_63] : memref<192x72xbf16, #tpu.memory_space<vmem>>, vector<192x8xbf16>
    tpu.vector_store %arg10[%c0_62, %c32_63], %61 {strides = array<i32>} : memref<192x72xbf16, #tpu.memory_space<vmem>>, vector<192x8xbf16>,
    %63 = vector.extract_strided_slice %50 {offsets = [50, 0], sizes = [192, 8], strides = [1, 1]} : vector<288x8xbf16> to vector<192x8xbf16>
    %c0_64 = arith.constant 0 : index
    %c40 = arith.constant 40 : index
    %64 = vector.load %arg10[%c0_64, %c40] : memref<192x72xbf16, #tpu.memory_space<vmem>>, vector<192x8xbf16>
    tpu.vector_store %arg10[%c0_64, %c40], %63 {strides = array<i32>} : memref<192x72xbf16, #tpu.memory_space<vmem>>, vector<192x8xbf16>,
    %65 = vector.extract_strided_slice %50 {offsets = [94, 0], sizes = [192, 8], strides = [1, 1]} : vector<288x8xbf16> to vector<192x8xbf16>
    %c0_65 = arith.constant 0 : index
    %c48_66 = arith.constant 48 : index
    %66 = vector.load %arg10[%c0_65, %c48_66] : memref<192x72xbf16, #tpu.memory_space<vmem>>, vector<192x8xbf16>
    tpu.vector_store %arg10[%c0_65, %c48_66], %65 {strides = array<i32>} : memref<192x72xbf16, #tpu.memory_space<vmem>>, vector<192x8xbf16>,
    %67 = vector.extract_strided_slice %50 {offsets = [96, 0], sizes = [192, 8], strides = [1, 1]} : vector<288x8xbf16> to vector<192x8xbf16>
    %c0_67 = arith.constant 0 : index
    %c56 = arith.constant 56 : index
    %68 = vector.load %arg10[%c0_67, %c56] : memref<192x72xbf16, #tpu.memory_space<vmem>>, vector<192x8xbf16>
    tpu.vector_store %arg10[%c0_67, %c56], %67 {strides = array<i32>} : memref<192x72xbf16, #tpu.memory_space<vmem>>, vector<192x8xbf16>,
    %cst_68 = arith.constant 0.000000e+00 : bf16
    %69 = vector.broadcast %cst_68 : bf16 to vector<2x8xbf16>
    %c190 = arith.constant 190 : index
    %c64 = arith.constant 64 : index
    %70 = vector.load %arg10[%c190, %c64] : memref<192x72xbf16, #tpu.memory_space<vmem>>, vector<2x8xbf16>
    tpu.vector_store %arg10[%c190, %c64], %69 {strides = array<i32>} : memref<192x72xbf16, #tpu.memory_space<vmem>>, vector<2x8xbf16>,
    %71 = vector.extract_strided_slice %50 {offsets = [98, 0], sizes = [190, 8], strides = [1, 1]} : vector<288x8xbf16> to vector<190x8xbf16>
    %c0_69 = arith.constant 0 : index
    %c64_70 = arith.constant 64 : index
    %72 = vector.load %arg10[%c0_69, %c64_70] : memref<192x72xbf16, #tpu.memory_space<vmem>>, vector<190x8xbf16>
    tpu.vector_store %arg10[%c0_69, %c64_70], %71 {strides = array<i32>} : memref<192x72xbf16, #tpu.memory_space<vmem>>, vector<190x8xbf16>,
    %c0_71 = arith.constant 0 : index
    %c0_72 = arith.constant 0 : index
    %73 = vector.load %arg10[%c0_71, %c0_72] : memref<192x72xbf16, #tpu.memory_space<vmem>>, vector<192x72xbf16>
    %c0_73 = arith.constant 0 : index
    %c0_74 = arith.constant 0 : index
    %74 = vector.load %arg5[%c0_73, %c0_74] : memref<72x4xbf16, #tpu.memory_space<vmem>>, vector<72x4xbf16>
    %cst_75 = arith.constant dense<0.000000e+00> : vector<192x4xf32>
    %75 = tpu.matmul %73, %74, %cst_75 {dimension_numbers = #tpu.dot_dimension_numbers<[1], [0], [0], [1], [0, 0, 1, 1], [], []>} : vector<192x72xbf16>, vector<72x4xbf16>, vector<192x4xf32> -> vector<192x4xf32>
    %c0_76 = arith.constant 0 : index
    %c0_77 = arith.constant 0 : index
    %76 = vector.load %arg6[%c0_76, %c0_77] : memref<1x4xf32, #tpu.memory_space<vmem>>, vector<1x4xf32>
    %77 = vector.broadcast %76 : vector<1x4xf32> to vector<192x4xf32>
    %78 = arith.addf %75, %77 : vector<192x4xf32>
    %c0_78 = arith.constant 0 : index
    %c0_79 = arith.constant 0 : index
    %c0_80 = arith.constant 0 : index
    %c0_81 = arith.constant 0 : index
    %79 = vector.load %arg8[%c0_78, %c0_79, %c0_80, %c0_81] : memref<1x1x192x4xf32, #tpu.memory_space<vmem>>, vector<1x1x192x4xf32>
    %80 = vector.shape_cast %79 : vector<1x1x192x4xf32> to vector<192x4xf32>
    %81 = vector.shape_cast %78 : vector<192x4xf32> to vector<1x1x192x4xf32>
    tpu.vector_store %arg8[%c0_78, %c0_79, %c0_80, %c0_81], %81 {strides = array<i32>} : memref<1x1x192x4xf32, #tpu.memory_space<vmem>>, vector<1x1x192x4xf32>,
    return
  }
  func.func @transform_0(%arg0: i32, %arg1: i32) -> (i32, i32, i32, i32) {
    %c0_i32 = arith.constant 0 : i32
    %c0_i32_0 = arith.constant 0 : i32
    %c0_i32_1 = arith.constant 0 : i32
    return %arg0, %arg1, %c0_i32, %c0_i32_0 : i32, i32, i32, i32
  }
  func.func @transform_1(%arg0: i32, %arg1: i32) -> (i32, i32) {
    %c0_i32 = arith.constant 0 : i32
    %c0_i32_0 = arith.constant 0 : i32
    %c0_i32_1 = arith.constant 0 : i32
    return %c0_i32, %c0_i32_0 : i32, i32
  }
  func.func @transform_2(%arg0: i32, %arg1: i32) -> (i32, i32) {
    %c0_i32 = arith.constant 0 : i32
    %c0_i32_0 = arith.constant 0 : i32
    %c0_i32_1 = arith.constant 0 : i32
    return %c0_i32, %c0_i32_0 : i32, i32
  }
  func.func @transform_3(%arg0: i32, %arg1: i32) -> (i32, i32) {
    %c0_i32 = arith.constant 0 : i32
    %c0_i32_0 = arith.constant 0 : i32
    %c0_i32_1 = arith.constant 0 : i32
    return %c0_i32, %c0_i32_0 : i32, i32
  }
  func.func @transform_4(%arg0: i32, %arg1: i32) -> (i32, i32) {
    %c0_i32 = arith.constant 0 : i32
    %c0_i32_0 = arith.constant 0 : i32
    %c0_i32_1 = arith.constant 0 : i32
    return %c0_i32, %c0_i32_0 : i32, i32
  }
  func.func @transform_5(%arg0: i32, %arg1: i32) -> (i32, i32, i32) {
    %c0_i32 = arith.constant 0 : i32
    %c0_i32_0 = arith.constant 0 : i32
    %c0_i32_1 = arith.constant 0 : i32
    return %arg1, %c0_i32, %c0_i32_0 : i32, i32, i32
  }
  func.func @transform_6(%arg0: i32, %arg1: i32) -> (i32, i32, i32, i32) {
    %c0_i32 = arith.constant 0 : i32
    %c0_i32_0 = arith.constant 0 : i32
    %c0_i32_1 = arith.constant 0 : i32
    return %arg0, %arg1, %c0_i32, %c0_i32_0 : i32, i32, i32, i32
  }
}

</mosaic_0001>

<bundles_post_ra>
// kernel: tpu_custom_call.1
= control target key start
LH: loop header
LB: loop body
LE: loop exit
PB: predicated region body
PF: predicated region fallthrough
CT: control target
= control target key end

     0   :  { %s5873_s21 = smov 0   ;;  %s5875_s22 = smov 0   ;;  %s8839_s0 = inlined_call_operand.vmem [shape: bf16[2,2,408,4], index: 0, kind: input, shape index: {}]   ;;  %s8840_s1 = inlined_call_operand.vmem [shape: bf16[36,8], index: 1, kind: input, shape index: {}]   ;;  %s8841_s2 = inlined_call_operand.vmem [shape: f32[1,8], index: 2, kind: input, shape index: {}]   ;;  %s8842_s3 = inlined_call_operand.vmem [shape: bf16[72,4], index: 3, kind: input, shape index: {}]   ;;  %s8843_s4 = inlined_call_operand.vmem [shape: f32[1,4], index: 4, kind: input, shape index: {}]   ;;  %s8844_s5 = inlined_call_operand.vmem [shape: f32[2,288,1], index: 5, kind: input, shape index: {}]   ;;  %s8845_s6 = inlined_call_operand.vmem [shape: f32[2,2,192,4], index: 6, kind: output, shape index: {}]  }
   0x1   :  { %s5877_s23 = smov 0   ;;  %s5879_s24 = smov 0  }
   0x2   :  { %s5881_s25 = smov 0  }
   0x3 LB: > { %s25_s26 = sadd.s32 1, %s5815_s23  ;;  %s28_s27 = sadd.s32 1, %s5819_s24  ;;  %s5823_s25 = sphi %s5881_s25, %s16_s25   ;;  %s5819_s24 = sphi %s5879_s24, %s8855_s24   ;;  %s5815_s23 = sphi %s5877_s23, %s8854_s23   ;;  %s5811_s22 = sphi %s5875_s22, %s8853_s22   ;;  %s5807_s21 = sphi %s5873_s21, %s8852_s21  }
   0x4   : > { %p26_p0 = scmp.ge.s32.totalorder %s25_s26, 2  ;;  %p5343_p1 = scmp.ge.s32.totalorder %s5823_s25, 1 }
   0x5   : > { %p242_p2 = scmp.lt.s32.totalorder %s5823_s25, 5 }
   0x6   : > { %s8857_s26 = smov (%p26_p0, %s25_s26), 0  ;;  %s8859_s27 = smov (!%p26_p0, %s28_s27), %s5819_s24 }
   0x7   : > { %p243_p3 = pnand %p5343_p1, %p242_p2  ;;  %p30_p4 = scmp.ge.s32.totalorder %s8859_s27, 2 }
   0x8   : > { %p285_p5 = scmp.lt.s32.totalorder (!%p243_p3), %s5811_s22, 1  ;;  %p287_p6 = scmp.lt.s32.totalorder (!%p243_p3), %s5807_s21, 1 }
   0x9   : > { %s8861_s27 = smov (%p30_p4, %s8859_s27), 0  ;;  %246 = sbr.rel (%p243_p3) target bundleno = 1573 (0x625), region = 44 }
   0xa   : > { %s5825_s11 = smov (!%p243_p3), 4   ;;  %s5826_s12 = smov (!%p243_p3), 8  }
   0xb   : > { %s5827_s13 = smov (!%p243_p3), 12   ;;  %s5828_s14 = smov (!%p243_p3), 16  }
   0xc   : > { %s5829_s15 = smov (!%p243_p3), 20   ;;  %s5830_s16 = smov (!%p243_p3), 24  }
   0xd   : > { %s5831_s17 = smov (!%p243_p3), 28   ;;  %s5835_s19 = smov (!%p243_p3), 48  }
   0xe   : > { %s8863_s22 = smov (!%p285_p5, %s5811_s22), 1  ;;  %s8865_s21 = smov (!%p287_p6, %s5807_s21), 1  ;;  %vm456_vm0 = vcmask 1042432   ;;  %vm457_vm1 = vcmask 1046532   ;;  %vm345_vm3 = vcmask 27648   ;;  %vm787_vm4 = vcmask 1041408  }
   0xf   : > { %s5615_s28 = smul.u32 102, %s8863_s22  ;;  %vm5914_vm2 = vmor %vm456_vm0, %vm457_vm1  ;;  %vm788_vm5 = vcmask 1045508   ;;  %vm676_vm7 = vcmask 60448   ;;  %vm1007_vm8 = vcmask 93248   ;;  %vm1224_vm9 = vcmask 126048  }
  0x10   : > { %s5614_s29 = smul.u32 51, %s8865_s21  ;;  %vm6122_vm6 = vmor %vm787_vm4, %vm788_vm5  ;;  %vm1552_vm10 = vcmask 158848   ;;  %vm1880_vm11 = vcmask 191648   ;;  %vm2097_vm12 = vcmask 224448   ;;  %vm2425_vm13 = vcmask 257248  }
  0x11   : > { %s5616_s8 = smul.u32 288, %s8865_s21  ;;  %vm2753_vm14 = vcmask 290048   ;;  %vm2943_vm15 = vcmask 293888   ;;  %vm3773_vm0 = vcmask 57344   ;;  %vm3835_vm1 = vcmask 1040384  }
  0x12   : > { %s291_s30 = sadd.s32 %s5615_s28, %s5614_s29  ;;  %vm3934_vm5 = vcmask 60416  }
  0x13   : > { %s5344_s7 = sshll.u32 %s291_s30, 2 }
  0x14   : > { %s5912_s10 = scalar_lea.vmem %s8839_s0, %s5344_s7  ;;  %s5832_s7 = smov 32  }
  0x15   : > { %v382_v1 = vld [vmem:[%s5912_s10] sm:$0xe]  ;;  %v383_v2 = vld [vmem:[%s5912_s10 + $0x4] sm:$0xf]  ;;  %v384_v3 = vld [vmem:[%s5912_s10 + $0x8] sm:$0xf] }
  0x16   : > { %v5347_v4 = vrot.slane %v382_v1, 9  ;;  %v461_v5 = vrot.slane %v383_v2, 5  ;;  %v385_v6 = vld [vmem:[%s5912_s10 + $0xc] sm:$0xf]  ;;  %v464_v7 = vrot.slane %v384_v3, 5 }
  0x17   : > { %v467_v8 = vrot.slane %v385_v6, 5  ;;  %v386_v9 = vld [vmem:[%s5912_s10 + $0x10] sm:$0xf]  ;;  %v387_v10 = vld [vmem:[%s5912_s10 + $0x14] sm:$0xf] }
  0x18   : > { %v462_v11 = vsel %vm5914_vm2, %v5347_v4, %v461_v5  ;;  %v466_v12 = vrot.slane %v464_v7, 4  ;;  %v463_v13 = vrot.slane %v461_v5, 4  ;;  %v470_v14 = vrot.slane %v386_v9, 5  ;;  %v388_v15 = vld [vmem:[%s5912_s10 + $0x18] sm:$0xf] }
  0x19   : > { %568 = vrot.lane.b32.xlu0 %v462_v11, %s5825_s11  ;;  %v469_v16 = vrot.slane %v467_v8, 4  ;;  %v473_v17 = vrot.slane %v387_v10, 5  ;;  %v389_v18 = vld [vmem:[%s5912_s10 + $0x1c] sm:$0xf]  ;;  %v476_v22 = vrot.slane %v388_v15, 5 }
  0x1a   : > { %v468_v19 = vsel %vm5914_vm2, %v466_v12, %v467_v8  ;;  %v465_v20 = vsel %vm5914_vm2, %v463_v13, %v464_v7  ;;  %v472_v21 = vrot.slane %v470_v14, 4  ;;  %v390_v23 = vld [vmem:[%s5912_s10 + $0x20] sm:$0xf]  ;;  %v479_v26 = vrot.slane %v389_v18, 5  ;;  %v391_v27 = vld [vmem:[%s5912_s10 + $0x24] sm:$0xf] }
  0x1b   : > { %572 = vrot.lane.b32.xlu1 %v468_v19, %s5825_s11  ;;  %v471_v24 = vsel %vm5914_vm2, %v469_v16, %v470_v14  ;;  %v475_v25 = vrot.slane %v473_v17, 4  ;;  %v478_v29 = vrot.slane %v476_v22, 4  ;;  %v482_v30 = vrot.slane %v390_v23, 5  ;;  %v392_v31 = vld [vmem:[%s5912_s10 + $0x28] sm:$0xf] }
  0x1c   : > { %v474_v28 = vsel %vm5914_vm2, %v472_v21, %v473_v17  ;;  %v481_v33 = vrot.slane %v479_v26, 4  ;;  %v485_v34 = vrot.slane %v391_v27, 5  ;;  %v393_v35 = vld [vmem:[%s5912_s10 + $0x2c] sm:$0xf]  ;;  %v488_v38 = vrot.slane %v392_v31, 5 }
  0x1d   : > { %570 = vrot.lane.b32.xlu0 %v465_v20, %s5825_s11  ;;  %v477_v32 = vsel %vm5914_vm2, %v475_v25, %v476_v22  ;;  %v480_v36 = vsel %vm5914_vm2, %v478_v29, %v479_v26  ;;  %v484_v37 = vrot.slane %v482_v30, 4  ;;  %v394_v39 = vld [vmem:[%s5912_s10 + $0x30] sm:$0xf]  ;;  %v491_v42 = vrot.slane %v393_v35, 5  ;;  %v395_v43 = vld [vmem:[%s5912_s10 + $0x34] sm:$0xf] }
  0x1e   : > { %v483_v40 = vsel %vm5914_vm2, %v481_v33, %v482_v30  ;;  %v487_v41 = vrot.slane %v485_v34, 4  ;;  %v490_v45 = vrot.slane %v488_v38, 4  ;;  %v494_v46 = vrot.slane %v394_v39, 5  ;;  %v396_v47 = vld [vmem:[%s5912_s10 + $0x38] sm:$0xf] }
  0x1f   : > { %574 = vrot.lane.b32.xlu1 %v471_v24, %s5825_s11  ;;  %v486_v44 = vsel %vm5914_vm2, %v484_v37, %v485_v34  ;;  %v493_v49 = vrot.slane %v491_v42, 4  ;;  %v497_v50 = vrot.slane %v395_v43, 5  ;;  %v397_v51 = vld [vmem:[%s5912_s10 + $0x3c] sm:$0xf]  ;;  %v500_v54 = vrot.slane %v396_v47, 5 }
  0x20   : > { %v489_v48 = vsel %vm5914_vm2, %v487_v41, %v488_v38  ;;  %v492_v52 = vsel %vm5914_vm2, %v490_v45, %v491_v42  ;;  %v496_v53 = vrot.slane %v494_v46, 4  ;;  %v398_v55 = vld [vmem:[%s5912_s10 + $0x40] sm:$0xf]  ;;  %v503_v58 = vrot.slane %v397_v51, 5  ;;  %v399_v59 = vld [vmem:[%s5912_s10 + $0x44] sm:$0xf] }
  0x21   : > { %576 = vrot.lane.b32.xlu0 %v474_v28, %s5825_s11  ;;  %v495_v56 = vsel %vm5914_vm2, %v493_v49, %v494_v46  ;;  %v499_v57 = vrot.slane %v497_v50, 4  ;;  %v502_v61 = vrot.slane %v500_v54, 4  ;;  %v506_v62 = vrot.slane %v398_v55, 5  ;;  %v400_v63 = vld [vmem:[%s5912_s10 + $0x48] sm:$0xf] }
  0x22   : > { %v498_v60 = vsel %vm5914_vm2, %v496_v53, %v497_v50  ;;  %v505_v2 = vrot.slane %v503_v58, 4  ;;  %v509_v3 = vrot.slane %v399_v59, 5  ;;  %v401_v4 = vld [vmem:[%s5912_s10 + $0x4c] sm:$0xf]  ;;  %v512_v7 = vrot.slane %v400_v63, 5 }
  0x23   : > { %578 = vrot.lane.b32.xlu1 %v477_v32, %s5825_s11  ;;  %v501_v1 = vsel %vm5914_vm2, %v499_v57, %v500_v54  ;;  %v504_v5 = vsel %vm5914_vm2, %v502_v61, %v503_v58  ;;  %v508_v6 = vrot.slane %v506_v62, 4  ;;  %v402_v8 = vld [vmem:[%s5912_s10 + $0x50] sm:$0xf]  ;;  %v515_v11 = vrot.slane %v401_v4, 5  ;;  %v403_v12 = vld [vmem:[%s5912_s10 + $0x54] sm:$0xf] }
  0x24   : > { %v507_v9 = vsel %vm5914_vm2, %v505_v2, %v506_v62  ;;  %v511_v10 = vrot.slane %v509_v3, 4  ;;  %v514_v14 = vrot.slane %v512_v7, 4  ;;  %v518_v15 = vrot.slane %v402_v8, 5  ;;  %v404_v16 = vld [vmem:[%s5912_s10 + $0x58] sm:$0xf] }
  0x25   : > { %580 = vrot.lane.b32.xlu0 %v480_v36, %s5825_s11  ;;  %v510_v13 = vsel %vm5914_vm2, %v508_v6, %v509_v3  ;;  %v517_v18 = vrot.slane %v515_v11, 4  ;;  %v521_v19 = vrot.slane %v403_v12, 5  ;;  %v405_v20 = vld [vmem:[%s5912_s10 + $0x5c] sm:$0xf]  ;;  %v524_v23 = vrot.slane %v404_v16, 5 }
  0x26   : > { %v513_v17 = vsel %vm5914_vm2, %v511_v10, %v512_v7  ;;  %v516_v21 = vsel %vm5914_vm2, %v514_v14, %v515_v11  ;;  %v520_v22 = vrot.slane %v518_v15, 4  ;;  %v406_v24 = vld [vmem:[%s5912_s10 + $0x60] sm:$0xf]  ;;  %v527_v27 = vrot.slane %v405_v20, 5  ;;  %v407_v28 = vld [vmem:[%s5912_s10 + $0x64] sm:$0xf] }
  0x27   : > { %582 = vrot.lane.b32.xlu1 %v483_v40, %s5825_s11  ;;  %v519_v25 = vsel %vm5914_vm2, %v517_v18, %v518_v15  ;;  %v523_v26 = vrot.slane %v521_v19, 4  ;;  %v526_v30 = vrot.slane %v524_v23, 4  ;;  %v530_v31 = vrot.slane %v406_v24, 5  ;;  %v408_v32 = vld [vmem:[%s5912_s10 + $0x68] sm:$0xf] }
  0x28   : > { %v522_v29 = vsel %vm5914_vm2, %v520_v22, %v521_v19  ;;  %v529_v34 = vrot.slane %v527_v27, 4  ;;  %v533_v35 = vrot.slane %v407_v28, 5  ;;  %v309_v36 = vld [vmem:[%s5912_s10] sm:$0xf]  ;;  %v409_v37 = vld [vmem:[%s5912_s10 + $0x6c] sm:$0xf] }
  0x29   : > { %584 = vrot.lane.b32.xlu0 %v486_v44, %s5825_s11  ;;  %v525_v33 = vsel %vm5914_vm2, %v523_v26, %v524_v23  ;;  %346 = vst.msk [vmem:[#allocation2] sm:$0xf] %vm345_vm3, %v309_v36  ;;  %v311_v38 = vld [vmem:[%s5912_s10 + $0x8] sm:$0xf]  ;;  %v528_v39 = vsel %vm5914_vm2, %v526_v30, %v527_v27  ;;  %v532_v40 = vrot.slane %v530_v31, 4  ;;  %v536_v41 = vrot.slane %v408_v32, 5 }
  0x2a   : > { %348 = vst.msk [vmem:[#allocation2 + $0x8] sm:$0xf] %vm345_vm3, %v311_v38  ;;  %v410_v42 = vld [vmem:[%s5912_s10 + $0x70] sm:$0xf]  ;;  %v310_v43 = vld [vmem:[%s5912_s10 + $0x4] sm:$0xf]  ;;  %v531_v45 = vsel %vm5914_vm2, %v529_v34, %v530_v31 }
  0x2b   : > { %586 = vrot.lane.b32.xlu1 %v489_v48, %s5825_s11  ;;  %v312_v44 = vld [vmem:[%s5912_s10 + $0xc] sm:$0xf]  ;;  %v535_v46 = vrot.slane %v533_v35, 4  ;;  %v539_v47 = vrot.slane %v409_v37, 5  ;;  %347 = vst.msk [vmem:[#allocation2 + $0x4] sm:$0xf] %vm345_vm3, %v310_v43  ;;  %v534_v51 = vsel %vm5914_vm2, %v532_v40, %v533_v35 }
  0x2c   : > { %349 = vst.msk [vmem:[#allocation2 + $0xc] sm:$0xf] %vm345_vm3, %v312_v44  ;;  %v313_v48 = vld [vmem:[%s5912_s10 + $0x10] sm:$0xf]  ;;  %v411_v49 = vld [vmem:[%s5912_s10 + $0x74] sm:$0xf] }
  0x2d   : > { %588 = vrot.lane.b32.xlu0 %v492_v52, %s5825_s11  ;;  %350 = vst.msk [vmem:[#allocation2 + $0x10] sm:$0xf] %vm345_vm3, %v313_v48  ;;  %v314_v50 = vld [vmem:[%s5912_s10 + $0x14] sm:$0xf]  ;;  %v538_v52 = vrot.slane %v536_v41, 4  ;;  %v542_v53 = vrot.slane %v410_v42, 5  ;;  %v537_v57 = vsel %vm5914_vm2, %v535_v46, %v536_v41 }
  0x2e   : > { %351 = vst.msk [vmem:[#allocation2 + $0x14] sm:$0xf] %vm345_vm3, %v314_v50  ;;  %v412_v54 = vld [vmem:[%s5912_s10 + $0x78] sm:$0xf]  ;;  %v541_v58 = vrot.slane %v539_v47, 4  ;;  %v545_v59 = vrot.slane %v411_v49, 5 }
  0x2f   : > { %590 = vrot.lane.b32.xlu1 %v495_v56, %s5825_s11  ;;  %v315_v55 = vld [vmem:[%s5912_s10 + $0x18] sm:$0xf]  ;;  %v316_v56 = vld [vmem:[%s5912_s10 + $0x1c] sm:$0xf]  ;;  %v317_v61 = vld [vmem:[%s5912_s10 + $0x20] sm:$0xf]  ;;  %v540_v62 = vsel %vm5914_vm2, %v538_v52, %v539_v47 }
  0x30   : > { %352 = vst.msk [vmem:[#allocation2 + $0x18] sm:$0xf] %vm345_vm3, %v315_v55  ;;  %353 = vst.msk [vmem:[#allocation2 + $0x1c] sm:$0xf] %vm345_vm3, %v316_v56  ;;  %v544_v63 = vrot.slane %v542_v53, 4  ;;  %v543_v4 = vsel %vm5914_vm2, %v541_v58, %v542_v53 }
  0x31   : > { %592 = vrot.lane.b32.xlu0 %v498_v60, %s5825_s11  ;;  %v413_v60 = vld [vmem:[%s5912_s10 + $0x7c] sm:$0xf]  ;;  %354 = vst.msk [vmem:[#allocation2 + $0x20] sm:$0xf] %vm345_vm3, %v317_v61  ;;  %v318_v2 = vld [vmem:[%s5912_s10 + $0x24] sm:$0xf] }
  0x32   : > { %v414_v3 = vld [vmem:[%s5912_s10 + $0x80] sm:$0xf]  ;;  %355 = vst.msk [vmem:[#allocation2 + $0x24] sm:$0xf] %vm345_vm3, %v318_v2  ;;  %v551_v6 = vrot.slane %v413_v60, 5  ;;  %v546_v10 = vsel %vm5914_vm2, %v544_v63, %v545_v59 }
  0x33   : > { %594 = vrot.lane.b32.xlu1 %v501_v1, %s5825_s11  ;;  %v548_v1 = vrot.slane %v412_v54, 5  ;;  %v319_v7 = vld [vmem:[%s5912_s10 + $0x28] sm:$0xf]  ;;  %v320_v8 = vld [vmem:[%s5912_s10 + $0x2c] sm:$0xf]  ;;  %v554_v12 = vrot.slane %v414_v3, 5 }
  0x34   : > { %356 = vst.msk [vmem:[#allocation2 + $0x28] sm:$0xf] %vm345_vm3, %v319_v7  ;;  %357 = vst.msk [vmem:[#allocation2 + $0x2c] sm:$0xf] %vm345_vm3, %v320_v8  ;;  %v416_v14 = vld [vmem:[%s5912_s10 + $0x88] sm:$0xf] }
  0x35   : > { %596 = vrot.lane.b32.xlu0 %v504_v5, %s5825_s11  ;;  %v547_v5 = vrot.slane %v545_v59, 4  ;;  %v550_v11 = vrot.slane %v548_v1, 4  ;;  %v322_v15 = vld [vmem:[%s5912_s10 + $0x34] sm:$0xf]  ;;  %v323_v19 = vld [vmem:[%s5912_s10 + $0x38] sm:$0xf] }
  0x36   : > { %359 = vst.msk [vmem:[#allocation2 + $0x34] sm:$0xf] %vm345_vm3, %v322_v15  ;;  %v417_v20 = vld [vmem:[%s5912_s10 + $0x8c] sm:$0xf]  ;;  %360 = vst.msk [vmem:[#allocation2 + $0x38] sm:$0xf] %vm345_vm3, %v323_v19 }
  0x37   : > { %598 = vrot.lane.b32.xlu1 %v507_v9, %s5825_s11  ;;  %v415_v9 = vld [vmem:[%s5912_s10 + $0x84] sm:$0xf]  ;;  %v549_v16 = vsel %vm5914_vm2, %v547_v5, %v548_v1  ;;  %v552_v22 = vsel %vm5914_vm2, %v550_v11, %v551_v6  ;;  %v556_v23 = vrot.slane %v554_v12, 4  ;;  %v560_v24 = vrot.slane %v416_v14, 5  ;;  %v418_v26 = vld [vmem:[%s5912_s10 + $0x90] sm:$0x1] }
  0x38   : > { %v557_v18 = vrot.slane %v415_v9, 5  ;;  %v326_v27 = vld [vmem:[%s5912_s10 + $0x44] sm:$0xf]  ;;  %v563_v30 = vrot.slane %v417_v20, 5  ;;  %v327_v31 = vld [vmem:[%s5912_s10 + $0x48] sm:$0xf] }
  0x39   : > { %600 = vrot.lane.b32.xlu0 %v510_v13, %s5825_s11  ;;  %v321_v13 = vld [vmem:[%s5912_s10 + $0x30] sm:$0xf]  ;;  %363 = vst.msk [vmem:[#allocation2 + $0x44] sm:$0xf] %vm345_vm3, %v326_v27  ;;  %v328_v32 = vld [vmem:[%s5912_s10 + $0x4c] sm:$0xf] }
  0x3a   : > { %358 = vst.msk [vmem:[#allocation2 + $0x30] sm:$0xf] %vm345_vm3, %v321_v13  ;;  %364 = vst.msk [vmem:[#allocation2 + $0x48] sm:$0xf] %vm345_vm3, %v327_v31  ;;  %v329_v34 = vld [vmem:[%s5912_s10 + $0x50] sm:$0xf]  ;;  %v558_v36 = vsel %vm5914_vm2, %v556_v23, %v557_v18 }
  0x3b   : > { %602 = vrot.lane.b32.xlu1 %v513_v17, %s5825_s11  ;;  %v553_v17 = vrot.slane %v551_v6, 4  ;;  %365 = vst.msk [vmem:[#allocation2 + $0x4c] sm:$0xf] %vm345_vm3, %v328_v32  ;;  %v330_v35 = vld [vmem:[%s5912_s10 + $0x54] sm:$0xf]  ;;  %v562_v37 = vrot.slane %v560_v24, 4 }
  0x3c   : > { %v713_v38 = vld [vmem:[%s5912_s10] sm:$0xc]  ;;  %366 = vst.msk [vmem:[#allocation2 + $0x50] sm:$0xf] %vm345_vm3, %v329_v34  ;;  %367 = vst.msk [vmem:[#allocation2 + $0x54] sm:$0xf] %vm345_vm3, %v330_v35 }
  0x3d   : > { %604 = vrot.lane.b32.xlu0 %v516_v21, %s5825_s11  ;;  %v324_v21 = vld [vmem:[%s5912_s10 + $0x3c] sm:$0xf]  ;;  %v555_v28 = vsel %vm5914_vm2, %v553_v17, %v554_v12  ;;  %v566_v40 = vrot.slane %v418_v26, 5  ;;  %v715_v41 = vld [vmem:[%s5912_s10 + $0x8] sm:$0xf]  ;;  %v565_v44 = vrot.slane %v563_v30, 4 }
  0x3e   : > { %361 = vst.msk [vmem:[#allocation2 + $0x3c] sm:$0xf] %vm345_vm3, %v324_v21  ;;  %v332_v42 = vld [vmem:[%s5912_s10 + $0x5c] sm:$0xf]  ;;  %v333_v46 = vld [vmem:[%s5912_s10 + $0x60] sm:$0xf] }
  0x3f   : > { %606 = vrot.lane.b32.xlu1 %v519_v25, %s5825_s11  ;;  %v325_v25 = vld [vmem:[%s5912_s10 + $0x40] sm:$0xf]  ;;  %369 = vst.msk [vmem:[#allocation2 + $0x5c] sm:$0xf] %vm345_vm3, %v332_v42  ;;  %v334_v47 = vld [vmem:[%s5912_s10 + $0x64] sm:$0xf]  ;;  %v567_v58 = vsel %vm5914_vm2, %v565_v44, %v566_v40 }
  0x40   : > { %362 = vst.msk [vmem:[#allocation2 + $0x40] sm:$0xf] %vm345_vm3, %v325_v25  ;;  %v716_v48 = vld [vmem:[%s5912_s10 + $0xc] sm:$0xf]  ;;  %370 = vst.msk [vmem:[#allocation2 + $0x60] sm:$0xf] %vm345_vm3, %v333_v46 }
  0x41   : > { %608 = vrot.lane.b32.xlu0 %v522_v29, %s5825_s11  ;;  %v559_v29 = vrot.slane %v557_v18, 4  ;;  %371 = vst.msk [vmem:[#allocation2 + $0x64] sm:$0xf] %vm345_vm3, %v334_v47  ;;  %v335_v49 = vld [vmem:[%s5912_s10 + $0x68] sm:$0xf]  ;;  %v5348_v52 = vrot.slane %v713_v38, 10 }
  0x42   : > { %v336_v50 = vld [vmem:[%s5912_s10 + $0x6c] sm:$0xf]  ;;  %v795_v53 = vrot.slane %v715_v41, 6  ;;  %372 = vst.msk [vmem:[#allocation2 + $0x68] sm:$0xf] %vm345_vm3, %v335_v49  ;;  %v798_v60 = vrot.slane %v716_v48, 6 }
  0x43   : > { %610 = vrot.lane.b32.xlu1 %v525_v33, %s5825_s11  ;;  %v714_v33 = vld [vmem:[%s5912_s10 + $0x4] sm:$0xf]  ;;  %v561_v43 = vsel %vm5914_vm2, %v559_v29, %v560_v24  ;;  %373 = vst.msk [vmem:[#allocation2 + $0x6c] sm:$0xf] %vm345_vm3, %v336_v50  ;;  %v337_v54 = vld [vmem:[%s5912_s10 + $0x70] sm:$0xf] }
  0x44   : > { %v717_v56 = vld [vmem:[%s5912_s10 + $0x10] sm:$0xf]  ;;  %374 = vst.msk [vmem:[#allocation2 + $0x70] sm:$0xf] %vm345_vm3, %v337_v54  ;;  %v339_v61 = vld [vmem:[%s5912_s10 + $0x78] sm:$0xf] }
  0x45   : > { %612 = vrot.lane.b32.xlu0 %v528_v39, %s5825_s11  ;;  %v331_v39 = vld [vmem:[%s5912_s10 + $0x58] sm:$0xf]  ;;  %v718_v63 = vld [vmem:[%s5912_s10 + $0x14] sm:$0xf]  ;;  %376 = vst.msk [vmem:[#allocation2 + $0x78] sm:$0xf] %vm345_vm3, %v339_v61 }
  0x46   : > { %368 = vst.msk [vmem:[#allocation2 + $0x58] sm:$0xf] %vm345_vm3, %v331_v39  ;;  %v341_v1 = vld [vmem:[%s5912_s10 + $0x80] sm:$0xf]  ;;  %v342_v2 = vld [vmem:[%s5912_s10 + $0x84] sm:$0xf] }
  0x47   : > { %614 = vrot.lane.b32.xlu1 %v531_v45, %s5825_s11  ;;  %v792_v45 = vrot.slane %v714_v33, 6  ;;  %v801_v5 = vrot.slane %v717_v56, 6  ;;  %378 = vst.msk [vmem:[#allocation2 + $0x80] sm:$0xf] %vm345_vm3, %v341_v1  ;;  %379 = vst.msk [vmem:[#allocation2 + $0x84] sm:$0xf] %vm345_vm3, %v342_v2 }
  0x48   : > { %v343_v6 = vld [vmem:[%s5912_s10 + $0x88] sm:$0xf]  ;;  %v719_v7 = vld [vmem:[%s5912_s10 + $0x18] sm:$0xf]  ;;  %v344_v8 = vld [vmem:[%s5912_s10 + $0x8c] sm:$0xf] }
  0x49   : > { %616 = vrot.lane.b32.xlu0 %v534_v51, %s5825_s11  ;;  %v564_v51 = vsel %vm5914_vm2, %v562_v37, %v563_v30  ;;  %v794_v59 = vrot.slane %v792_v45, 4  ;;  %v793_v3 = vsel %vm6122_vm6, %v5348_v52, %v792_v45  ;;  %380 = vst.msk [vmem:[#allocation2 + $0x88] sm:$0xf] %vm345_vm3, %v343_v6  ;;  %v804_v11 = vrot.slane %v718_v63, 6  ;;  %381 = vst.msk [vmem:[#allocation2 + $0x8c] sm:$0xf] %vm345_vm3, %v344_v8 }
  0x4a   : > { %v720_v12 = vld [vmem:[%s5912_s10 + $0x1c] sm:$0xf]  ;;  %v803_v14 = vrot.slane %v801_v5, 4  ;;  %v807_v15 = vrot.slane %v719_v7, 6  ;;  %v722_v20 = vld [vmem:[%s5912_s10 + $0x24] sm:$0xf] }
  0x4b   : > { %618 = vrot.lane.b32.xlu1 %v537_v57, %s5825_s11  ;;  %v338_v57 = vld [vmem:[%s5912_s10 + $0x74] sm:$0xf]  ;;  %v796_v9 = vsel %vm6122_vm6, %v794_v59, %v795_v53  ;;  %v806_v18 = vrot.slane %v804_v11, 4  ;;  %v810_v19 = vrot.slane %v720_v12, 6  ;;  %v723_v24 = vld [vmem:[%s5912_s10 + $0x28] sm:$0xf] }
  0x4c   : > { %375 = vst.msk [vmem:[#allocation2 + $0x74] sm:$0xf] %vm345_vm3, %v338_v57  ;;  %v805_v21 = vsel %vm6122_vm6, %v803_v14, %v804_v11  ;;  %v816_v27 = vrot.slane %v722_v20, 6  ;;  %v819_v31 = vrot.slane %v723_v24, 6  ;;  %v725_v32 = vld [vmem:[%s5912_s10 + $0x30] sm:$0xf] }
  0x4d   : > { %620 = vrot.lane.b32.xlu0 %v540_v62, %s5825_s11  ;;  %v340_v62 = vld [vmem:[%s5912_s10 + $0x7c] sm:$0xf]  ;;  %v808_v25 = vsel %vm6122_vm6, %v806_v18, %v807_v15  ;;  %v812_v26 = vrot.slane %v810_v19, 4  ;;  %v825_v39 = vrot.slane %v725_v32, 6  ;;  %v727_v40 = vld [vmem:[%s5912_s10 + $0x38] sm:$0xf] }
  0x4e   : > { %377 = vst.msk [vmem:[#allocation2 + $0x7c] sm:$0xf] %vm345_vm3, %v340_v62  ;;  %v818_v34 = vrot.slane %v816_v27, 4  ;;  %v821_v38 = vrot.slane %v819_v31, 4  ;;  %v728_v44 = vld [vmem:[%s5912_s10 + $0x3c] sm:$0xf] }
  0x4f   : > { %622 = vrot.lane.b32.xlu1 %v543_v4, %s5825_s11  ;;  %v797_v4 = vrot.slane %v795_v53, 4  ;;  %v827_v46 = vrot.slane %v825_v39, 4  ;;  %v831_v47 = vrot.slane %v727_v40, 6  ;;  %v729_v48 = vld [vmem:[%s5912_s10 + $0x40] sm:$0xf]  ;;  %vm3836_vm3 = vcmask 1044484  }
  0x50   : > { %v820_v41 = vsel %vm6122_vm6, %v818_v34, %v819_v31  ;;  %v730_v52 = vld [vmem:[%s5912_s10 + $0x44] sm:$0xf]  ;;  %v837_v56 = vrot.slane %v729_v48, 6  ;;  %v731_v57 = vld [vmem:[%s5912_s10 + $0x48] sm:$0xf] }
  0x51   : > { %624 = vrot.lane.b32.xlu0 %v546_v10, %s5825_s11  ;;  %v800_v10 = vrot.slane %v798_v60, 4  ;;  %v799_v13 = vsel %vm6122_vm6, %v797_v4, %v798_v60  ;;  %v833_v54 = vrot.slane %v831_v47, 4  ;;  %v840_v60 = vrot.slane %v730_v52, 6  ;;  %v732_v61 = vld [vmem:[%s5912_s10 + $0x4c] sm:$0xf] }
  0x52   : > { %v839_v63 = vrot.slane %v837_v56, 4  ;;  %v843_v1 = vrot.slane %v731_v57, 6  ;;  %v733_v2 = vld [vmem:[%s5912_s10 + $0x50] sm:$0xf]  ;;  %v734_v6 = vld [vmem:[%s5912_s10 + $0x54] sm:$0xf] }
  0x53   : > { %626 = vrot.lane.b32.xlu1 %v549_v16, %s5825_s11  ;;  %v721_v16 = vld [vmem:[%s5912_s10 + $0x20] sm:$0xf]  ;;  %v802_v17 = vsel %vm6122_vm6, %v800_v10, %v801_v5  ;;  %v842_v4 = vrot.slane %v840_v60, 4  ;;  %v846_v5 = vrot.slane %v732_v61, 6  ;;  %v735_v10 = vld [vmem:[%s5912_s10 + $0x58] sm:$0xf] }
  0x54   : > { %v813_v23 = vrot.slane %v721_v16, 6  ;;  %v841_v7 = vsel %vm6122_vm6, %v839_v63, %v840_v60  ;;  %v845_v8 = vrot.slane %v843_v1, 4  ;;  %v736_v14 = vld [vmem:[%s5912_s10 + $0x5c] sm:$0xf]  ;;  %v737_v18 = vld [vmem:[%s5912_s10 + $0x60] sm:$0xf] }
  0x55   : > { %628 = vrot.lane.b32.xlu0 %v552_v22, %s5825_s11  ;;  %v809_v22 = vrot.slane %v807_v15, 4  ;;  %v844_v11 = vsel %vm6122_vm6, %v842_v4, %v843_v1  ;;  %v848_v12 = vrot.slane %v846_v5, 4  ;;  %v742_v40 = vld [vmem:[%s5912_s10 + $0x74] sm:$0xf]  ;;  %v746_v61 = vld [vmem:[%s5912_s10 + $0x84] sm:$0xf] }
  0x56   : > { %v815_v30 = vrot.slane %v813_v23, 4  ;;  %v814_v33 = vsel %vm6122_vm6, %v812_v26, %v813_v23  ;;  %v847_v15 = vsel %vm6122_vm6, %v845_v8, %v846_v5  ;;  %v739_v26 = vld [vmem:[%s5912_s10 + $0x68] sm:$0xf]  ;;  %v876_v48 = vrot.slane %v742_v40, 6  ;;  %v748_v8 = vld [vmem:[%s5912_s10 + $0x8c] sm:$0xf] }
  0x57   : > { %630 = vrot.lane.b32.xlu1 %v555_v28, %s5825_s11  ;;  %v724_v28 = vld [vmem:[%s5912_s10 + $0x2c] sm:$0xf]  ;;  %v811_v29 = vsel %vm6122_vm6, %v809_v22, %v810_v19  ;;  %v738_v22 = vld [vmem:[%s5912_s10 + $0x64] sm:$0xf] }
  0x58   : > { %v822_v35 = vrot.slane %v724_v28, 6  ;;  %v817_v37 = vsel %vm6122_vm6, %v815_v30, %v816_v27  ;;  %v740_v30 = vld [vmem:[%s5912_s10 + $0x6c] sm:$0xf] }
  0x59   : > { %632 = vrot.lane.b32.xlu0 %v558_v36, %s5825_s11  ;;  %v726_v36 = vld [vmem:[%s5912_s10 + $0x34] sm:$0xf] }
  0x5a   : > { %v824_v42 = vrot.slane %v822_v35, 4  ;;  %v823_v45 = vsel %vm6122_vm6, %v821_v38, %v822_v35  ;;  %v741_v35 = vld [vmem:[%s5912_s10 + $0x70] sm:$0xf]  ;;  %v870_v38 = vrot.slane %v740_v30, 6 }
  0x5b   : > { %634 = vrot.lane.b32.xlu1 %v561_v43, %s5825_s11  ;;  %v828_v43 = vrot.slane %v726_v36, 6 }
  0x5c   : > { %v826_v49 = vsel %vm6122_vm6, %v824_v42, %v825_v39 }
  0x5d   : > { %636 = vrot.lane.b32.xlu0 %v564_v51, %s5825_s11  ;;  %v830_v50 = vrot.slane %v828_v43, 4  ;;  %v834_v51 = vrot.slane %v728_v44, 6  ;;  %v829_v53 = vsel %vm6122_vm6, %v827_v46, %v828_v43  ;;  %v873_v43 = vrot.slane %v741_v35, 6  ;;  %v1047_v35 = vld [vmem:[%s5912_s10 + $0x24] sm:$0xf] }
  0x5f   : > { %638 = vrot.lane.b32.xlu1 %v567_v58, %s5825_s11  ;;  %v832_v58 = vsel %vm6122_vm6, %v830_v50, %v831_v47  ;;  %v836_v59 = vrot.slane %v834_v51, 4  ;;  %v835_v62 = vsel %vm6122_vm6, %v833_v54, %v834_v51  ;;  %v872_v47 = vrot.slane %v870_v38, 4  ;;  %v744_v50 = vld [vmem:[%s5912_s10 + $0x7c] sm:$0xf]  ;;  %s7258_s11 = scalar_lea.vmem %s8844_s5, %s5616_s8  ;;  %s5836_s8 = smov 56  }
  0x60   : > { %v875_v52 = vrot.slane %v873_v43, 4  ;;  %v3506_v55 = vld [vmem:[%s7258_s11 + $0x18] sm:$0xff] }
  0x61   : > { %899 = vrot.lane.b32.xlu0 %v793_v3, %s5826_s12  ;;  %v838_v3 = vsel %vm6122_vm6, %v836_v59, %v837_v56  ;;  %v745_v56 = vld [vmem:[%s5912_s10 + $0x80] sm:$0xf]  ;;  %v874_v57 = vsel %vm6122_vm6, %v872_v47, %v873_v43  ;;  %v882_v59 = vrot.slane %v744_v50, 6  ;;  %v1051_v43 = vld [vmem:[%s5912_s10 + $0x34] sm:$0xf] }
  0x62   : > { %v885_v1 = vrot.slane %v745_v56, 6  ;;  %v1053_v47 = vld [vmem:[%s5912_s10 + $0x3c] sm:$0xf]  ;;  %v1057_v56 = vld [vmem:[%s5912_s10 + $0x4c] sm:$0xf] }
  0x63   : > { %901 = vrot.lane.b32.xlu1 %v796_v9, %s5826_s12  ;;  %v849_v9 = vrot.slane %v733_v2, 6  ;;  %v884_v5 = vrot.slane %v882_v59, 4 }
  0x65   : > { %903 = vrot.lane.b32.xlu0 %v799_v13, %s5826_s12  ;;  %v852_v13 = vrot.slane %v734_v6, 6  ;;  %v851_v16 = vrot.slane %v849_v9, 4  ;;  %v850_v19 = vsel %vm6122_vm6, %v848_v12, %v849_v9  ;;  %v888_v6 = vrot.slane %v746_v61, 6 }
  0x67   : > { %905 = vrot.lane.b32.xlu1 %v802_v17, %s5826_s12  ;;  %v855_v17 = vrot.slane %v735_v10, 6  ;;  %v854_v20 = vrot.slane %v852_v13, 4  ;;  %v853_v23 = vsel %vm6122_vm6, %v851_v16, %v852_v13  ;;  %v887_v10 = vrot.slane %v885_v1, 4 }
  0x68   : > { %v886_v13 = vsel %vm6122_vm6, %v884_v5, %v885_v1  ;;  %v1061_v1 = vld [vmem:[%s5912_s10 + $0x5c] sm:$0xf]  ;;  %v1063_v5 = vld [vmem:[%s5912_s10 + $0x64] sm:$0xf] }
  0x69   : > { %907 = vrot.lane.b32.xlu0 %v805_v21, %s5826_s12  ;;  %v858_v21 = vrot.slane %v736_v14, 6  ;;  %v857_v24 = vrot.slane %v855_v17, 4  ;;  %v856_v27 = vsel %vm6122_vm6, %v854_v20, %v855_v17  ;;  %v890_v14 = vrot.slane %v888_v6, 4  ;;  %v749_v17 = vld [vmem:[%s5912_s10 + $0x90] sm:$0x3] }
  0x6b   : > { %909 = vrot.lane.b32.xlu1 %v808_v25, %s5826_s12  ;;  %v861_v25 = vrot.slane %v737_v18, 6  ;;  %v860_v28 = vrot.slane %v858_v21, 4  ;;  %v859_v31 = vsel %vm6122_vm6, %v857_v24, %v858_v21  ;;  %v889_v18 = vsel %vm6122_vm6, %v887_v10, %v888_v6 }
  0x6d   : > { %911 = vrot.lane.b32.xlu0 %v811_v29, %s5826_s12  ;;  %v864_v29 = vrot.slane %v738_v22, 6  ;;  %v863_v32 = vrot.slane %v861_v25, 4  ;;  %v862_v36 = vsel %vm6122_vm6, %v860_v28, %v861_v25 }
  0x6f   : > { %913 = vrot.lane.b32.xlu1 %v814_v33, %s5826_s12  ;;  %v867_v33 = vrot.slane %v739_v26, 6 }
  0x71   : > { %915 = vrot.lane.b32.xlu0 %v817_v37, %s5826_s12  ;;  %v866_v37 = vrot.slane %v864_v29, 4  ;;  %v869_v42 = vrot.slane %v867_v33, 4 }
  0x73   : > { %917 = vrot.lane.b32.xlu1 %v820_v41, %s5826_s12  ;;  %v865_v41 = vsel %vm6122_vm6, %v863_v32, %v864_v29  ;;  %v868_v46 = vsel %vm6122_vm6, %v866_v37, %v867_v33  ;;  %v871_v51 = vsel %vm6122_vm6, %v869_v42, %v870_v38  ;;  %v1044_v29 = vld [vmem:[%s5912_s10 + $0x18] sm:$0xf]  ;;  %v1046_v33 = vld [vmem:[%s5912_s10 + $0x20] sm:$0xf]  ;;  %v1048_v37 = vld [vmem:[%s5912_s10 + $0x28] sm:$0xf] }
  0x75   : > { %919 = vrot.lane.b32.xlu0 %v823_v45, %s5826_s12  ;;  %v743_v45 = vld [vmem:[%s5912_s10 + $0x78] sm:$0xf] }
  0x77   : > { %921 = vrot.lane.b32.xlu1 %v826_v49, %s5826_s12 }
  0x79   : > { %923 = vrot.lane.b32.xlu0 %v829_v53, %s5826_s12  ;;  %v879_v53 = vrot.slane %v743_v45, 6  ;;  %v1052_v45 = vld [vmem:[%s5912_s10 + $0x38] sm:$0xf] }
  0x7b   : > { %925 = vrot.lane.b32.xlu1 %v832_v58, %s5826_s12  ;;  %v878_v58 = vrot.slane %v876_v48, 4  ;;  %v881_v63 = vrot.slane %v879_v53, 4 }
  0x7d   : > { %927 = vrot.lane.b32.xlu0 %v835_v62, %s5826_s12  ;;  %v877_v62 = vsel %vm6122_vm6, %v875_v52, %v876_v48  ;;  %v880_v4 = vsel %vm6122_vm6, %v878_v58, %v879_v53  ;;  %v883_v9 = vsel %vm6122_vm6, %v881_v63, %v882_v59  ;;  %v1056_v53 = vld [vmem:[%s5912_s10 + $0x48] sm:$0xf]  ;;  %v1058_v58 = vld [vmem:[%s5912_s10 + $0x50] sm:$0xf] }
  0x7f   : > { %929 = vrot.lane.b32.xlu1 %v838_v3, %s5826_s12  ;;  %v747_v3 = vld [vmem:[%s5912_s10 + $0x88] sm:$0xf] }
  0x81   : > { %931 = vrot.lane.b32.xlu0 %v841_v7, %s5826_s12 }
  0x83   : > { %933 = vrot.lane.b32.xlu1 %v844_v11, %s5826_s12  ;;  %v891_v11 = vrot.slane %v747_v3, 6  ;;  %v1062_v3 = vld [vmem:[%s5912_s10 + $0x60] sm:$0xf] }
  0x85   : > { %935 = vrot.lane.b32.xlu0 %v847_v15, %s5826_s12  ;;  %v894_v15 = vrot.slane %v748_v8, 6  ;;  %v892_v21 = vsel %vm6122_vm6, %v890_v14, %v891_v11 }
  0x87   : > { %937 = vrot.lane.b32.xlu1 %v850_v19, %s5826_s12  ;;  %v893_v19 = vrot.slane %v891_v11, 4  ;;  %v896_v22 = vrot.slane %v894_v15, 4  ;;  %v1066_v11 = vld [vmem:[%s5912_s10 + $0x70] sm:$0xf] }
  0x89   : > { %939 = vrot.lane.b32.xlu0 %v853_v23, %s5826_s12  ;;  %v897_v23 = vrot.slane %v749_v17, 6  ;;  %v895_v25 = vsel %vm6122_vm6, %v893_v19, %v894_v15  ;;  %v1068_v15 = vld [vmem:[%s5912_s10 + $0x78] sm:$0xf]  ;;  %v1069_v17 = vld [vmem:[%s5912_s10 + $0x7c] sm:$0xf] }
  0x8a   : > { %v1070_v19 = vld [vmem:[%s5912_s10 + $0x80] sm:$0xf] }
  0x8b   : > { %941 = vrot.lane.b32.xlu1 %v856_v27, %s5826_s12  ;;  %v569_v34 = vpop.permute.xlu0 %568  ;;  %v898_v27 = vsel %vm6122_vm6, %v896_v22, %v897_v23  ;;  %v1072_v23 = vld [vmem:[%s5912_s10 + $0x88] sm:$0xf] }
  0x8c   : > { %677 = vst.msk [vmem:[#allocation2] sm:$0xf] %vm676_vm7, %v569_v34 }
  0x8d   : > { %v573_v39 = vpop.permute.xlu1 %572  ;;  %943 = vrot.lane.b32.xlu0 %v859_v31, %s5826_s12  ;;  %v1045_v31 = vld [vmem:[%s5912_s10 + $0x1c] sm:$0xf] }
  0x8e   : > { %679 = vst.msk [vmem:[#allocation2 + $0x8] sm:$0xf] %vm676_vm7, %v573_v39  ;;  %v1049_v39 = vld [vmem:[%s5912_s10 + $0x2c] sm:$0xf] }
  0x8f   : > { %945 = vrot.lane.b32.xlu1 %v862_v36, %s5826_s12  ;;  %v571_v44 = vpop.permute.xlu0 %570 }
  0x90   : > { %678 = vst.msk [vmem:[#allocation2 + $0x4] sm:$0xf] %vm676_vm7, %v571_v44 }
  0x91   : > { %v575_v49 = vpop.permute.xlu1 %574  ;;  %947 = vrot.lane.b32.xlu0 %v865_v41, %s5826_s12  ;;  %v1050_v41 = vld [vmem:[%s5912_s10 + $0x30] sm:$0xf] }
  0x92   : > { %680 = vst.msk [vmem:[#allocation2 + $0xc] sm:$0xf] %vm676_vm7, %v575_v49  ;;  %v1054_v49 = vld [vmem:[%s5912_s10 + $0x40] sm:$0xf] }
  0x93   : > { %949 = vrot.lane.b32.xlu1 %v868_v46, %s5826_s12  ;;  %v577_v54 = vpop.permute.xlu0 %576 }
  0x94   : > { %681 = vst.msk [vmem:[#allocation2 + $0x10] sm:$0xf] %vm676_vm7, %v577_v54 }
  0x95   : > { %v579_v60 = vpop.permute.xlu1 %578  ;;  %951 = vrot.lane.b32.xlu0 %v871_v51, %s5826_s12  ;;  %v1055_v51 = vld [vmem:[%s5912_s10 + $0x44] sm:$0xf] }
  0x96   : > { %682 = vst.msk [vmem:[#allocation2 + $0x14] sm:$0xf] %vm676_vm7, %v579_v60  ;;  %v1059_v60 = vld [vmem:[%s5912_s10 + $0x54] sm:$0xf] }
  0x97   : > { %953 = vrot.lane.b32.xlu1 %v874_v57, %s5826_s12  ;;  %v581_v2 = vpop.permute.xlu0 %580 }
  0x98   : > { %683 = vst.msk [vmem:[#allocation2 + $0x18] sm:$0xf] %vm676_vm7, %v581_v2 }
  0x99   : > { %v583_v7 = vpop.permute.xlu1 %582  ;;  %955 = vrot.lane.b32.xlu0 %v877_v62, %s5826_s12  ;;  %v1060_v62 = vld [vmem:[%s5912_s10 + $0x58] sm:$0xf] }
  0x9a   : > { %684 = vst.msk [vmem:[#allocation2 + $0x1c] sm:$0xf] %vm676_vm7, %v583_v7  ;;  %v1064_v7 = vld [vmem:[%s5912_s10 + $0x68] sm:$0xf] }
  0x9b   : > { %957 = vrot.lane.b32.xlu1 %v880_v4, %s5826_s12  ;;  %v585_v12 = vpop.permute.xlu0 %584 }
  0x9c   : > { %685 = vst.msk [vmem:[#allocation2 + $0x20] sm:$0xf] %vm676_vm7, %v585_v12 }
  0x9d   : > { %v587_v16 = vpop.permute.xlu1 %586  ;;  %959 = vrot.lane.b32.xlu0 %v883_v9, %s5826_s12  ;;  %v1065_v9 = vld [vmem:[%s5912_s10 + $0x6c] sm:$0xf] }
  0x9e   : > { %686 = vst.msk [vmem:[#allocation2 + $0x24] sm:$0xf] %vm676_vm7, %v587_v16 }
  0x9f   : > { %961 = vrot.lane.b32.xlu1 %v886_v13, %s5826_s12  ;;  %v589_v20 = vpop.permute.xlu0 %588  ;;  %v1067_v13 = vld [vmem:[%s5912_s10 + $0x74] sm:$0xf] }
  0xa0   : > { %687 = vst.msk [vmem:[#allocation2 + $0x28] sm:$0xf] %vm676_vm7, %v589_v20 }
  0xa1   : > { %v591_v24 = vpop.permute.xlu1 %590  ;;  %963 = vrot.lane.b32.xlu0 %v889_v18, %s5826_s12 }
  0xa2   : > { %688 = vst.msk [vmem:[#allocation2 + $0x2c] sm:$0xf] %vm676_vm7, %v591_v24 }
  0xa3   : > { %965 = vrot.lane.b32.xlu1 %v892_v21, %s5826_s12  ;;  %v593_v26 = vpop.permute.xlu0 %592  ;;  %v1071_v21 = vld [vmem:[%s5912_s10 + $0x84] sm:$0xf] }
  0xa4   : > { %689 = vst.msk [vmem:[#allocation2 + $0x30] sm:$0xf] %vm676_vm7, %v593_v26 }
  0xa5   : > { %v595_v28 = vpop.permute.xlu1 %594  ;;  %967 = vrot.lane.b32.xlu0 %v895_v25, %s5826_s12  ;;  %v1073_v25 = vld [vmem:[%s5912_s10 + $0x8c] sm:$0xf] }
  0xa6   : > { %690 = vst.msk [vmem:[#allocation2 + $0x34] sm:$0xf] %vm676_vm7, %v595_v28 }
  0xa7   : > { %969 = vrot.lane.b32.xlu1 %v898_v27, %s5826_s12  ;;  %v597_v30 = vpop.permute.xlu0 %596  ;;  %v1074_v27 = vld [vmem:[%s5912_s10 + $0x90] sm:$0xf] }
  0xa8   : > { %691 = vst.msk [vmem:[#allocation2 + $0x38] sm:$0xf] %vm676_vm7, %v597_v30 }
  0xa9   : > { %v599_v32 = vpop.permute.xlu1 %598  ;;  %1116 = vrot.lane.b32.xlu0 %v1044_v29, %s5827_s13  ;;  %v1075_v29 = vld [vmem:[%s5912_s10 + $0x94] sm:$0xf] }
  0xaa   : > { %692 = vst.msk [vmem:[#allocation2 + $0x3c] sm:$0xf] %vm676_vm7, %v599_v32  ;;  %v1076_v32 = vld [vmem:[%s5912_s10 + $0x98] sm:$0xf] }
  0xab   : > { %1118 = vrot.lane.b32.xlu1 %v1045_v31, %s5827_s13  ;;  %v601_v34 = vpop.permute.xlu0 %600  ;;  %v1262_v31 = vld [vmem:[%s5912_s10 + $0x1c] sm:$0xf] }
  0xac   : > { %693 = vst.msk [vmem:[#allocation2 + $0x40] sm:$0xf] %vm676_vm7, %v601_v34  ;;  %v1261_v34 = vld [vmem:[%s5912_s10 + $0x18] sm:$0xe] }
  0xad   : > { %v603_v36 = vpop.permute.xlu1 %602  ;;  %1120 = vrot.lane.b32.xlu0 %v1046_v33, %s5827_s13 }
  0xae   : > { %694 = vst.msk [vmem:[#allocation2 + $0x44] sm:$0xf] %vm676_vm7, %v603_v36  ;;  %v1077_v36 = vld [vmem:[%s5912_s10 + $0x9c] sm:$0xf] }
  0xaf   : > { %1122 = vrot.lane.b32.xlu1 %v1047_v35, %s5827_s13  ;;  %v605_v38 = vpop.permute.xlu0 %604  ;;  %v1263_v35 = vld [vmem:[%s5912_s10 + $0x20] sm:$0xf] }
  0xb0   : > { %695 = vst.msk [vmem:[#allocation2 + $0x48] sm:$0xf] %vm676_vm7, %v605_v38 }
  0xb1   : > { %v607_v40 = vpop.permute.xlu1 %606  ;;  %1124 = vrot.lane.b32.xlu0 %v1048_v37, %s5827_s13  ;;  %v1337_v37 = vrot.slane %v1262_v31, 5 }
  0xb2   : > { %696 = vst.msk [vmem:[#allocation2 + $0x4c] sm:$0xf] %vm676_vm7, %v607_v40  ;;  %v1078_v40 = vld [vmem:[%s5912_s10 + $0xa0] sm:$0xf] }
  0xb3   : > { %1126 = vrot.lane.b32.xlu1 %v1049_v39, %s5827_s13  ;;  %v609_v42 = vpop.permute.xlu0 %608  ;;  %v1264_v39 = vld [vmem:[%s5912_s10 + $0x24] sm:$0xf] }
  0xb4   : > { %697 = vst.msk [vmem:[#allocation2 + $0x50] sm:$0xf] %vm676_vm7, %v609_v42  ;;  %v1340_v42 = vrot.slane %v1263_v35, 5 }
  0xb5   : > { %v611_v44 = vpop.permute.xlu1 %610  ;;  %1128 = vrot.lane.b32.xlu0 %v1050_v41, %s5827_s13  ;;  %v5349_v41 = vrot.slane %v1261_v34, 9 }
  0xb6   : > { %698 = vst.msk [vmem:[#allocation2 + $0x54] sm:$0xf] %vm676_vm7, %v611_v44  ;;  %v1265_v44 = vld [vmem:[%s5912_s10 + $0x28] sm:$0xf] }
  0xb7   : > { %1130 = vrot.lane.b32.xlu1 %v1051_v43, %s5827_s13  ;;  %v613_v46 = vpop.permute.xlu0 %612 }
  0xb8   : > { %699 = vst.msk [vmem:[#allocation2 + $0x58] sm:$0xf] %vm676_vm7, %v613_v46  ;;  %v1339_v46 = vrot.slane %v1337_v37, 4 }
  0xb9   : > { %v615_v48 = vpop.permute.xlu1 %614  ;;  %1132 = vrot.lane.b32.xlu0 %v1052_v45, %s5827_s13  ;;  %v1079_v45 = vld [vmem:[%s5912_s10 + $0xa4] sm:$0xf] }
  0xba   : > { %700 = vst.msk [vmem:[#allocation2 + $0x5c] sm:$0xf] %vm676_vm7, %v615_v48 }
  0xbb   : > { %1134 = vrot.lane.b32.xlu1 %v1053_v47, %s5827_s13  ;;  %v617_v50 = vpop.permute.xlu0 %616  ;;  %v1343_v47 = vrot.slane %v1264_v39, 5 }
  0xbc   : > { %701 = vst.msk [vmem:[#allocation2 + $0x60] sm:$0xf] %vm676_vm7, %v617_v50  ;;  %v1338_v50 = vsel %vm5914_vm2, %v5349_v41, %v1337_v37  ;;  %v1276_v37 = vld [vmem:[%s5912_s10 + $0x54] sm:$0xf] }
  0xbd   : > { %v619_v52 = vpop.permute.xlu1 %618  ;;  %1136 = vrot.lane.b32.xlu0 %v1054_v49, %s5827_s13  ;;  %v1266_v49 = vld [vmem:[%s5912_s10 + $0x2c] sm:$0xf] }
  0xbe   : > { %702 = vst.msk [vmem:[#allocation2 + $0x64] sm:$0xf] %vm676_vm7, %v619_v52  ;;  %v1346_v52 = vrot.slane %v1265_v44, 5 }
  0xbf   : > { %1138 = vrot.lane.b32.xlu1 %v1055_v51, %s5827_s13  ;;  %v621_v54 = vpop.permute.xlu0 %620  ;;  %v1342_v51 = vrot.slane %v1340_v42, 4 }
  0xc0   : > { %703 = vst.msk [vmem:[#allocation2 + $0x68] sm:$0xf] %vm676_vm7, %v621_v54  ;;  %v1267_v54 = vld [vmem:[%s5912_s10 + $0x30] sm:$0xf] }
  0xc1   : > { %v623_v57 = vpop.permute.xlu1 %622  ;;  %1140 = vrot.lane.b32.xlu0 %v1056_v53, %s5827_s13 }
  0xc2   : > { %704 = vst.msk [vmem:[#allocation2 + $0x6c] sm:$0xf] %vm676_vm7, %v623_v57  ;;  %v1345_v57 = vrot.slane %v1343_v47, 4 }
  0xc3   : > { %1142 = vrot.lane.b32.xlu1 %v1057_v56, %s5827_s13  ;;  %v625_v59 = vpop.permute.xlu0 %624  ;;  %v1341_v56 = vsel %vm5914_vm2, %v1339_v46, %v1340_v42  ;;  %v1277_v42 = vld [vmem:[%s5912_s10 + $0x58] sm:$0xf] }
  0xc4   : > { %705 = vst.msk [vmem:[#allocation2 + $0x70] sm:$0xf] %vm676_vm7, %v625_v59 }
  0xc5   : > { %v627_v61 = vpop.permute.xlu1 %626  ;;  %1144 = vrot.lane.b32.xlu0 %v1058_v58, %s5827_s13  ;;  %v1349_v58 = vrot.slane %v1266_v49, 5 }
  0xc6   : > { %706 = vst.msk [vmem:[#allocation2 + $0x74] sm:$0xf] %vm676_vm7, %v627_v61  ;;  %v1344_v61 = vsel %vm5914_vm2, %v1342_v51, %v1343_v47  ;;  %v1278_v47 = vld [vmem:[%s5912_s10 + $0x5c] sm:$0xf] }
  0xc7   : > { %1146 = vrot.lane.b32.xlu1 %v1059_v60, %s5827_s13  ;;  %v629_v63 = vpop.permute.xlu0 %628  ;;  %v1268_v60 = vld [vmem:[%s5912_s10 + $0x34] sm:$0xf] }
  0xc8   : > { %707 = vst.msk [vmem:[#allocation2 + $0x78] sm:$0xf] %vm676_vm7, %v629_v63  ;;  %v1352_v63 = vrot.slane %v1267_v54, 5 }
  0xc9   : > { %v631_v2 = vpop.permute.xlu1 %630  ;;  %1148 = vrot.lane.b32.xlu0 %v1060_v62, %s5827_s13  ;;  %v1348_v62 = vrot.slane %v1346_v52, 4 }
  0xca   : > { %708 = vst.msk [vmem:[#allocation2 + $0x7c] sm:$0xf] %vm676_vm7, %v631_v2  ;;  %v1269_v2 = vld [vmem:[%s5912_s10 + $0x38] sm:$0xf] }
  0xcb   : > { %1150 = vrot.lane.b32.xlu1 %v1061_v1, %s5827_s13  ;;  %v633_v4 = vpop.permute.xlu0 %632 }
  0xcc   : > { %709 = vst.msk [vmem:[#allocation2 + $0x80] sm:$0xf] %vm676_vm7, %v633_v4  ;;  %v1351_v4 = vrot.slane %v1349_v58, 4 }
  0xcd   : > { %v635_v6 = vpop.permute.xlu1 %634  ;;  %1152 = vrot.lane.b32.xlu0 %v1062_v3, %s5827_s13  ;;  %v1347_v3 = vsel %vm5914_vm2, %v1345_v57, %v1346_v52  ;;  %v1279_v52 = vld [vmem:[%s5912_s10 + $0x60] sm:$0xf] }
  0xce   : > { %710 = vst.msk [vmem:[#allocation2 + $0x84] sm:$0xf] %vm676_vm7, %v635_v6 }
  0xcf   : > { %1154 = vrot.lane.b32.xlu1 %v1063_v5, %s5827_s13  ;;  %v637_v8 = vpop.permute.xlu0 %636  ;;  %v1355_v5 = vrot.slane %v1268_v60, 5 }
  0xd0   : > { %711 = vst.msk [vmem:[#allocation2 + $0x88] sm:$0xf] %vm676_vm7, %v637_v8  ;;  %v1350_v8 = vsel %vm5914_vm2, %v1348_v62, %v1349_v58  ;;  %v1280_v58 = vld [vmem:[%s5912_s10 + $0x64] sm:$0xf] }
  0xd1   : > { %v639_v10 = vpop.permute.xlu1 %638  ;;  %1156 = vrot.lane.b32.xlu0 %v1064_v7, %s5827_s13  ;;  %v1270_v7 = vld [vmem:[%s5912_s10 + $0x3c] sm:$0xf] }
  0xd2   : > { %712 = vst.msk [vmem:[#allocation2 + $0x8c] sm:$0xf] %vm676_vm7, %v639_v10  ;;  %v1358_v10 = vrot.slane %v1269_v2, 5  ;;  %vm5074_vm7 = vcmask 1043456  }
  0xd3   : > { %1158 = vrot.lane.b32.xlu1 %v1065_v9, %s5827_s13  ;;  %v900_v12 = vpop.permute.xlu0 %899  ;;  %v1354_v9 = vrot.slane %v1352_v63, 4 }
  0xd4   : > { %1008 = vst.msk [vmem:[#allocation2] sm:$0xf] %vm1007_vm8, %v900_v12  ;;  %v1271_v12 = vld [vmem:[%s5912_s10 + $0x40] sm:$0xf] }
  0xd5   : > { %v902_v14 = vpop.permute.xlu1 %901  ;;  %1160 = vrot.lane.b32.xlu0 %v1066_v11, %s5827_s13 }
  0xd6   : > { %1009 = vst.msk [vmem:[#allocation2 + $0x4] sm:$0xf] %vm1007_vm8, %v902_v14  ;;  %v1357_v14 = vrot.slane %v1355_v5, 4 }
  0xd7   : > { %1162 = vrot.lane.b32.xlu1 %v1067_v13, %s5827_s13  ;;  %v904_v16 = vpop.permute.xlu0 %903  ;;  %v1353_v13 = vsel %vm5914_vm2, %v1351_v4, %v1352_v63  ;;  %v1281_v63 = vld [vmem:[%s5912_s10 + $0x68] sm:$0xf] }
  0xd8   : > { %1010 = vst.msk [vmem:[#allocation2 + $0x8] sm:$0xf] %vm1007_vm8, %v904_v16 }
  0xd9   : > { %v906_v18 = vpop.permute.xlu1 %905  ;;  %1164 = vrot.lane.b32.xlu0 %v1068_v15, %s5827_s13  ;;  %v1361_v15 = vrot.slane %v1270_v7, 5 }
  0xda   : > { %1011 = vst.msk [vmem:[#allocation2 + $0xc] sm:$0xf] %vm1007_vm8, %v906_v18  ;;  %v1356_v18 = vsel %vm5914_vm2, %v1354_v9, %v1355_v5  ;;  %v1282_v5 = vld [vmem:[%s5912_s10 + $0x6c] sm:$0xf] }
  0xdb   : > { %1166 = vrot.lane.b32.xlu1 %v1069_v17, %s5827_s13  ;;  %v908_v20 = vpop.permute.xlu0 %907  ;;  %v1272_v17 = vld [vmem:[%s5912_s10 + $0x44] sm:$0xf] }
  0xdc   : > { %1012 = vst.msk [vmem:[#allocation2 + $0x10] sm:$0xf] %vm1007_vm8, %v908_v20  ;;  %v1364_v20 = vrot.slane %v1271_v12, 5 }
  0xdd   : > { %v910_v22 = vpop.permute.xlu1 %909  ;;  %1168 = vrot.lane.b32.xlu0 %v1070_v19, %s5827_s13  ;;  %v1360_v19 = vrot.slane %v1358_v10, 4 }
  0xde   : > { %1013 = vst.msk [vmem:[#allocation2 + $0x14] sm:$0xf] %vm1007_vm8, %v910_v22  ;;  %v1273_v22 = vld [vmem:[%s5912_s10 + $0x48] sm:$0xf] }
  0xdf   : > { %1170 = vrot.lane.b32.xlu1 %v1071_v21, %s5827_s13  ;;  %v912_v24 = vpop.permute.xlu0 %911 }
  0xe0   : > { %1014 = vst.msk [vmem:[#allocation2 + $0x18] sm:$0xf] %vm1007_vm8, %v912_v24  ;;  %v1363_v24 = vrot.slane %v1361_v15, 4 }
  0xe1   : > { %v914_v26 = vpop.permute.xlu1 %913  ;;  %1172 = vrot.lane.b32.xlu0 %v1072_v23, %s5827_s13  ;;  %v1359_v23 = vsel %vm5914_vm2, %v1357_v14, %v1358_v10  ;;  %v1283_v10 = vld [vmem:[%s5912_s10 + $0x70] sm:$0xf] }
  0xe2   : > { %1015 = vst.msk [vmem:[#allocation2 + $0x1c] sm:$0xf] %vm1007_vm8, %v914_v26 }
  0xe3   : > { %1174 = vrot.lane.b32.xlu1 %v1073_v25, %s5827_s13  ;;  %v916_v28 = vpop.permute.xlu0 %915  ;;  %v1367_v25 = vrot.slane %v1272_v17, 5 }
  0xe4   : > { %1016 = vst.msk [vmem:[#allocation2 + $0x20] sm:$0xf] %vm1007_vm8, %v916_v28  ;;  %v1362_v28 = vsel %vm5914_vm2, %v1360_v19, %v1361_v15  ;;  %v1284_v15 = vld [vmem:[%s5912_s10 + $0x74] sm:$0xf] }
  0xe5   : > { %v918_v30 = vpop.permute.xlu1 %917  ;;  %1176 = vrot.lane.b32.xlu0 %v1074_v27, %s5827_s13  ;;  %v1274_v27 = vld [vmem:[%s5912_s10 + $0x4c] sm:$0xf]  ;;  %v1369_v34 = vrot.slane %v1367_v25, 4 }
  0xe6   : > { %1017 = vst.msk [vmem:[#allocation2 + $0x24] sm:$0xf] %vm1007_vm8, %v918_v30  ;;  %v1370_v30 = vrot.slane %v1273_v22, 5  ;;  %v1373_v35 = vrot.slane %v1274_v27, 5 }
  0xe7   : > { %1178 = vrot.lane.b32.xlu1 %v1075_v29, %s5827_s13  ;;  %v920_v33 = vpop.permute.xlu0 %919  ;;  %v1366_v29 = vrot.slane %v1364_v20, 4 }
  0xe8   : > { %1018 = vst.msk [vmem:[#allocation2 + $0x28] sm:$0xf] %vm1007_vm8, %v920_v33  ;;  %v1365_v33 = vsel %vm5914_vm2, %v1363_v24, %v1364_v20  ;;  %v1372_v39 = vrot.slane %v1370_v30, 4  ;;  %v1375_v44 = vrot.slane %v1373_v35, 4  ;;  %v1285_v20 = vld [vmem:[%s5912_s10 + $0x78] sm:$0xf] }
  0xe9   : > { %v922_v38 = vpop.permute.xlu1 %921  ;;  %1180 = vrot.lane.b32.xlu0 %v1076_v32, %s5827_s13  ;;  %v1275_v32 = vld [vmem:[%s5912_s10 + $0x50] sm:$0xf] }
  0xea   : > { %1019 = vst.msk [vmem:[#allocation2 + $0x2c] sm:$0xf] %vm1007_vm8, %v922_v38  ;;  %v1368_v38 = vsel %vm5914_vm2, %v1366_v29, %v1367_v25  ;;  %v1286_v25 = vld [vmem:[%s5912_s10 + $0x7c] sm:$0xf] }
  0xeb   : > { %1182 = vrot.lane.b32.xlu1 %v1077_v36, %s5827_s13  ;;  %v924_v43 = vpop.permute.xlu0 %923 }
  0xec   : > { %1020 = vst.msk [vmem:[#allocation2 + $0x30] sm:$0xf] %vm1007_vm8, %v924_v43  ;;  %v1371_v43 = vsel %vm5914_vm2, %v1369_v34, %v1370_v30  ;;  %v1287_v30 = vld [vmem:[%s5912_s10 + $0x80] sm:$0xf] }
  0xed   : > { %v926_v48 = vpop.permute.xlu1 %925  ;;  %1184 = vrot.lane.b32.xlu0 %v1078_v40, %s5827_s13  ;;  %v1376_v40 = vrot.slane %v1275_v32, 5 }
  0xee   : > { %1021 = vst.msk [vmem:[#allocation2 + $0x34] sm:$0xf] %vm1007_vm8, %v926_v48  ;;  %v1374_v48 = vsel %vm5914_vm2, %v1372_v39, %v1373_v35  ;;  %v1288_v35 = vld [vmem:[%s5912_s10 + $0x84] sm:$0xf] }
  0xef   : > { %1186 = vrot.lane.b32.xlu1 %v1079_v45, %s5827_s13  ;;  %v928_v53 = vpop.permute.xlu0 %927  ;;  %v1379_v45 = vrot.slane %v1276_v37, 5  ;;  %v1378_v49 = vrot.slane %v1376_v40, 4 }
  0xf0   : > { %1022 = vst.msk [vmem:[#allocation2 + $0x38] sm:$0xf] %vm1007_vm8, %v928_v53  ;;  %v1377_v53 = vsel %vm5914_vm2, %v1375_v44, %v1376_v40  ;;  %v1289_v40 = vld [vmem:[%s5912_s10 + $0x88] sm:$0xf] }
  0xf1   : > { %v930_v59 = vpop.permute.xlu1 %929  ;;  %1444 = vrot.lane.b32.xlu0 %v1338_v50, %s5828_s14  ;;  %v1382_v50 = vrot.slane %v1277_v42, 5  ;;  %v1381_v54 = vrot.slane %v1379_v45, 4 }
  0xf2   : > { %1023 = vst.msk [vmem:[#allocation2 + $0x3c] sm:$0xf] %vm1007_vm8, %v930_v59  ;;  %v1380_v59 = vsel %vm5914_vm2, %v1378_v49, %v1379_v45  ;;  %v1290_v45 = vld [vmem:[%s5912_s10 + $0x8c] sm:$0xf] }
  0xf3   : > { %1446 = vrot.lane.b32.xlu1 %v1341_v56, %s5828_s14  ;;  %v932_v1 = vpop.permute.xlu0 %931  ;;  %v1385_v56 = vrot.slane %v1278_v47, 5  ;;  %v1384_v60 = vrot.slane %v1382_v50, 4 }
  0xf4   : > { %1024 = vst.msk [vmem:[#allocation2 + $0x40] sm:$0xf] %vm1007_vm8, %v932_v1  ;;  %v1383_v1 = vsel %vm5914_vm2, %v1381_v54, %v1382_v50  ;;  %v1291_v50 = vld [vmem:[%s5912_s10 + $0x90] sm:$0xf] }
  0xf5   : > { %v934_v6 = vpop.permute.xlu1 %933  ;;  %1448 = vrot.lane.b32.xlu0 %v1344_v61, %s5828_s14  ;;  %v1388_v61 = vrot.slane %v1279_v52, 5  ;;  %v1387_v2 = vrot.slane %v1385_v56, 4 }
  0xf6   : > { %1025 = vst.msk [vmem:[#allocation2 + $0x44] sm:$0xf] %vm1007_vm8, %v934_v6  ;;  %v1386_v6 = vsel %vm5914_vm2, %v1384_v60, %v1385_v56  ;;  %v1292_v56 = vld [vmem:[%s5912_s10 + $0x94] sm:$0xf] }
  0xf7   : > { %1450 = vrot.lane.b32.xlu1 %v1347_v3, %s5828_s14  ;;  %v936_v11 = vpop.permute.xlu0 %935  ;;  %v1391_v3 = vrot.slane %v1280_v58, 5  ;;  %v1390_v7 = vrot.slane %v1388_v61, 4 }
  0xf8   : > { %1026 = vst.msk [vmem:[#allocation2 + $0x48] sm:$0xf] %vm1007_vm8, %v936_v11  ;;  %v1389_v11 = vsel %vm5914_vm2, %v1387_v2, %v1388_v61  ;;  %v1293_v61 = vld [vmem:[%s5912_s10 + $0x98] sm:$0xf] }
  0xf9   : > { %v938_v16 = vpop.permute.xlu1 %937  ;;  %1452 = vrot.lane.b32.xlu0 %v1350_v8, %s5828_s14  ;;  %v1394_v8 = vrot.slane %v1281_v63, 5  ;;  %v1393_v12 = vrot.slane %v1391_v3, 4 }
  0xfa   : > { %1027 = vst.msk [vmem:[#allocation2 + $0x4c] sm:$0xf] %vm1007_vm8, %v938_v16  ;;  %v1392_v16 = vsel %vm5914_vm2, %v1390_v7, %v1391_v3  ;;  %v1294_v3 = vld [vmem:[%s5912_s10 + $0x9c] sm:$0xf] }
  0xfb   : > { %1454 = vrot.lane.b32.xlu1 %v1353_v13, %s5828_s14  ;;  %v940_v21 = vpop.permute.xlu0 %939  ;;  %v1397_v13 = vrot.slane %v1282_v5, 5  ;;  %v1396_v17 = vrot.slane %v1394_v8, 4 }
  0xfc   : > { %1028 = vst.msk [vmem:[#allocation2 + $0x50] sm:$0xf] %vm1007_vm8, %v940_v21  ;;  %v1395_v21 = vsel %vm5914_vm2, %v1393_v12, %v1394_v8  ;;  %v1295_v8 = vld [vmem:[%s5912_s10 + $0xa0] sm:$0xf] }
  0xfd   : > { %v942_v26 = vpop.permute.xlu1 %941  ;;  %1456 = vrot.lane.b32.xlu0 %v1356_v18, %s5828_s14  ;;  %v1400_v18 = vrot.slane %v1283_v10, 5  ;;  %v1399_v22 = vrot.slane %v1397_v13, 4 }
  0xfe   : > { %1029 = vst.msk [vmem:[#allocation2 + $0x54] sm:$0xf] %vm1007_vm8, %v942_v26  ;;  %v1398_v26 = vsel %vm5914_vm2, %v1396_v17, %v1397_v13  ;;  %v1296_v13 = vld [vmem:[%s5912_s10 + $0xa4] sm:$0xf] }
  0xff   : > { %1458 = vrot.lane.b32.xlu1 %v1359_v23, %s5828_s14  ;;  %v944_v31 = vpop.permute.xlu0 %943  ;;  %v1403_v23 = vrot.slane %v1284_v15, 5  ;;  %v1402_v27 = vrot.slane %v1400_v18, 4 }
 0x100   : > { %1030 = vst.msk [vmem:[#allocation2 + $0x58] sm:$0xf] %vm1007_vm8, %v944_v31  ;;  %v1401_v31 = vsel %vm5914_vm2, %v1399_v22, %v1400_v18  ;;  %v1297_v22 = vld [vmem:[%s5912_s10 + $0xa8] sm:$0x1] }
 0x101   : > { %v946_v36 = vpop.permute.xlu1 %945  ;;  %1460 = vrot.lane.b32.xlu0 %v1362_v28, %s5828_s14  ;;  %v1406_v28 = vrot.slane %v1285_v20, 5  ;;  %v1405_v32 = vrot.slane %v1403_v23, 4  ;;  %v1439_v20 = vrot.slane %v1296_v13, 5 }
 0x102   : > { %1031 = vst.msk [vmem:[#allocation2 + $0x5c] sm:$0xf] %vm1007_vm8, %v946_v36  ;;  %v1404_v36 = vsel %vm5914_vm2, %v1402_v27, %v1403_v23  ;;  %v1590_v23 = vld [vmem:[%s5912_s10 + $0x1c] sm:$0xf]  ;;  %v1589_v27 = vld [vmem:[%s5912_s10 + $0x18] sm:$0xc] }
 0x103   : > { %1462 = vrot.lane.b32.xlu1 %v1365_v33, %s5828_s14  ;;  %v948_v41 = vpop.permute.xlu0 %947  ;;  %v1409_v33 = vrot.slane %v1286_v25, 5  ;;  %v1408_v37 = vrot.slane %v1406_v28, 4 }
 0x104   : > { %1032 = vst.msk [vmem:[#allocation2 + $0x60] sm:$0xf] %vm1007_vm8, %v948_v41  ;;  %v1407_v41 = vsel %vm5914_vm2, %v1405_v32, %v1406_v28  ;;  %v1591_v28 = vld [vmem:[%s5912_s10 + $0x20] sm:$0xf]  ;;  %v1665_v32 = vrot.slane %v1590_v23, 6 }
 0x105   : > { %v950_v46 = vpop.permute.xlu1 %949  ;;  %1464 = vrot.lane.b32.xlu0 %v1368_v38, %s5828_s14  ;;  %v1412_v38 = vrot.slane %v1287_v30, 5  ;;  %v1411_v42 = vrot.slane %v1409_v33, 4  ;;  %v1441_v30 = vrot.slane %v1439_v20, 4 }
 0x106   : > { %1033 = vst.msk [vmem:[#allocation2 + $0x64] sm:$0xf] %vm1007_vm8, %v950_v46  ;;  %v1410_v46 = vsel %vm5914_vm2, %v1408_v37, %v1409_v33  ;;  %v1668_v37 = vrot.slane %v1591_v28, 6 }
 0x107   : > { %1466 = vrot.lane.b32.xlu1 %v1371_v43, %s5828_s14  ;;  %v952_v51 = vpop.permute.xlu0 %951  ;;  %v1415_v43 = vrot.slane %v1288_v35, 5  ;;  %v1414_v47 = vrot.slane %v1412_v38, 4 }
 0x108   : > { %1034 = vst.msk [vmem:[#allocation2 + $0x68] sm:$0xf] %vm1007_vm8, %v952_v51  ;;  %v1413_v51 = vsel %vm5914_vm2, %v1411_v42, %v1412_v38 }
 0x109   : > { %v954_v57 = vpop.permute.xlu1 %953  ;;  %1468 = vrot.lane.b32.xlu0 %v1374_v48, %s5828_s14  ;;  %v1418_v48 = vrot.slane %v1289_v40, 5  ;;  %v1417_v52 = vrot.slane %v1415_v43, 4 }
 0x10a   : > { %1035 = vst.msk [vmem:[#allocation2 + $0x6c] sm:$0xf] %vm1007_vm8, %v954_v57  ;;  %v1416_v57 = vsel %vm5914_vm2, %v1414_v47, %v1415_v43 }
 0x10b   : > { %1470 = vrot.lane.b32.xlu1 %v1377_v53, %s5828_s14  ;;  %v956_v62 = vpop.permute.xlu0 %955  ;;  %v1421_v53 = vrot.slane %v1290_v45, 5  ;;  %v1420_v58 = vrot.slane %v1418_v48, 4 }
 0x10c   : > { %1036 = vst.msk [vmem:[#allocation2 + $0x70] sm:$0xf] %vm1007_vm8, %v956_v62  ;;  %v1419_v62 = vsel %vm5914_vm2, %v1417_v52, %v1418_v48 }
 0x10d   : > { %v958_v4 = vpop.permute.xlu1 %957  ;;  %1472 = vrot.lane.b32.xlu0 %v1380_v59, %s5828_s14  ;;  %v1424_v59 = vrot.slane %v1291_v50, 5  ;;  %v1423_v63 = vrot.slane %v1421_v53, 4 }
 0x10e   : > { %1037 = vst.msk [vmem:[#allocation2 + $0x74] sm:$0xf] %vm1007_vm8, %v958_v4  ;;  %v1422_v4 = vsel %vm5914_vm2, %v1420_v58, %v1421_v53 }
 0x10f   : > { %1474 = vrot.lane.b32.xlu1 %v1383_v1, %s5828_s14  ;;  %v960_v9 = vpop.permute.xlu0 %959  ;;  %v1427_v1 = vrot.slane %v1292_v56, 5  ;;  %v1426_v5 = vrot.slane %v1424_v59, 4 }
 0x110   : > { %1038 = vst.msk [vmem:[#allocation2 + $0x78] sm:$0xf] %vm1007_vm8, %v960_v9  ;;  %v1425_v9 = vsel %vm5914_vm2, %v1423_v63, %v1424_v59 }
 0x111   : > { %v962_v14 = vpop.permute.xlu1 %961  ;;  %1476 = vrot.lane.b32.xlu0 %v1386_v6, %s5828_s14  ;;  %v1430_v6 = vrot.slane %v1293_v61, 5  ;;  %v1429_v10 = vrot.slane %v1427_v1, 4 }
 0x112   : > { %1039 = vst.msk [vmem:[#allocation2 + $0x7c] sm:$0xf] %vm1007_vm8, %v962_v14  ;;  %v1428_v14 = vsel %vm5914_vm2, %v1426_v5, %v1427_v1 }
 0x113   : > { %1478 = vrot.lane.b32.xlu1 %v1389_v11, %s5828_s14  ;;  %v964_v19 = vpop.permute.xlu0 %963  ;;  %v1433_v11 = vrot.slane %v1294_v3, 5  ;;  %v1432_v15 = vrot.slane %v1430_v6, 4  ;;  %v1431_v18 = vsel %vm5914_vm2, %v1429_v10, %v1430_v6 }
 0x114   : > { %1040 = vst.msk [vmem:[#allocation2 + $0x80] sm:$0xf] %vm1007_vm8, %v964_v19 }
 0x115   : > { %v966_v24 = vpop.permute.xlu1 %965  ;;  %1480 = vrot.lane.b32.xlu0 %v1392_v16, %s5828_s14  ;;  %v1436_v16 = vrot.slane %v1295_v8, 5  ;;  %v1435_v19 = vrot.slane %v1433_v11, 4 }
 0x116   : > { %1041 = vst.msk [vmem:[#allocation2 + $0x84] sm:$0xf] %vm1007_vm8, %v966_v24  ;;  %v1434_v24 = vsel %vm5914_vm2, %v1432_v15, %v1433_v11 }
 0x117   : > { %1482 = vrot.lane.b32.xlu1 %v1395_v21, %s5828_s14  ;;  %v968_v29 = vpop.permute.xlu0 %967  ;;  %v1438_v25 = vrot.slane %v1436_v16, 4 }
 0x118   : > { %1042 = vst.msk [vmem:[#allocation2 + $0x88] sm:$0xf] %vm1007_vm8, %v968_v29  ;;  %v1437_v29 = vsel %vm5914_vm2, %v1435_v19, %v1436_v16 }
 0x119   : > { %v970_v34 = vpop.permute.xlu1 %969  ;;  %1484 = vrot.lane.b32.xlu0 %v1398_v26, %s5828_s14  ;;  %v1440_v35 = vsel %vm5914_vm2, %v1438_v25, %v1439_v20 }
 0x11a   : > { %1043 = vst.msk [vmem:[#allocation2 + $0x8c] sm:$0xf] %vm1007_vm8, %v970_v34  ;;  %v1592_v34 = vld [vmem:[%s5912_s10 + $0x24] sm:$0xf]  ;;  %vm4030_vm8 = vcmask 126016  }
 0x11b   : > { %1486 = vrot.lane.b32.xlu1 %v1401_v31, %s5828_s14  ;;  %v1117_v39 = vpop.permute.xlu0 %1116  ;;  %v1442_v31 = vrot.slane %v1297_v22, 5  ;;  %v1671_v42 = vrot.slane %v1592_v34, 6  ;;  %v1602_v22 = vld [vmem:[%s5912_s10 + $0x4c] sm:$0xf] }
 0x11c   : > { %1225 = vst.msk [vmem:[#allocation2] sm:$0xf] %vm1224_vm9, %v1117_v39  ;;  %v1593_v39 = vld [vmem:[%s5912_s10 + $0x28] sm:$0xf] }
 0x11d   : > { %v1119_v44 = vpop.permute.xlu1 %1118  ;;  %1488 = vrot.lane.b32.xlu0 %v1404_v36, %s5828_s14  ;;  %v5350_v36 = vrot.slane %v1589_v27, 10  ;;  %v1443_v40 = vsel %vm5914_vm2, %v1441_v30, %v1442_v31  ;;  %v1674_v47 = vrot.slane %v1593_v39, 6  ;;  %v1603_v27 = vld [vmem:[%s5912_s10 + $0x50] sm:$0xf]  ;;  %v1701_v30 = vrot.slane %v1602_v22, 6 }
 0x11e   : > { %1226 = vst.msk [vmem:[#allocation2 + $0x4] sm:$0xf] %vm1224_vm9, %v1119_v44  ;;  %v1594_v44 = vld [vmem:[%s5912_s10 + $0x2c] sm:$0xf] }
 0x11f   : > { %1490 = vrot.lane.b32.xlu1 %v1407_v41, %s5828_s14  ;;  %v1121_v49 = vpop.permute.xlu0 %1120  ;;  %v1667_v41 = vrot.slane %v1665_v32, 4  ;;  %v1666_v45 = vsel %vm6122_vm6, %v5350_v36, %v1665_v32  ;;  %v1677_v52 = vrot.slane %v1594_v44, 6  ;;  %v1604_v32 = vld [vmem:[%s5912_s10 + $0x54] sm:$0xf]  ;;  %v1703_v39 = vrot.slane %v1701_v30, 4 }
 0x120   : > { %1227 = vst.msk [vmem:[#allocation2 + $0x8] sm:$0xf] %vm1224_vm9, %v1121_v49  ;;  %v1595_v49 = vld [vmem:[%s5912_s10 + $0x30] sm:$0xf] }
 0x121   : > { %v1123_v54 = vpop.permute.xlu1 %1122  ;;  %1492 = vrot.lane.b32.xlu0 %v1410_v46, %s5828_s14  ;;  %v1670_v46 = vrot.slane %v1668_v37, 4  ;;  %v1669_v50 = vsel %vm6122_vm6, %v1667_v41, %v1668_v37  ;;  %v1680_v58 = vrot.slane %v1595_v49, 6  ;;  %v1605_v37 = vld [vmem:[%s5912_s10 + $0x58] sm:$0xf] }
 0x122   : > { %1228 = vst.msk [vmem:[#allocation2 + $0xc] sm:$0xf] %vm1224_vm9, %v1123_v54  ;;  %v1596_v54 = vld [vmem:[%s5912_s10 + $0x34] sm:$0xf] }
 0x123   : > { %1494 = vrot.lane.b32.xlu1 %v1413_v51, %s5828_s14  ;;  %v1125_v60 = vpop.permute.xlu0 %1124  ;;  %v1673_v51 = vrot.slane %v1671_v42, 4  ;;  %v1672_v56 = vsel %vm6122_vm6, %v1670_v46, %v1671_v42  ;;  %v1683_v63 = vrot.slane %v1596_v54, 6  ;;  %v1606_v42 = vld [vmem:[%s5912_s10 + $0x5c] sm:$0xf] }
 0x124   : > { %1229 = vst.msk [vmem:[#allocation2 + $0x10] sm:$0xf] %vm1224_vm9, %v1125_v60  ;;  %v1597_v60 = vld [vmem:[%s5912_s10 + $0x38] sm:$0xf] }
 0x125   : > { %v1127_v2 = vpop.permute.xlu1 %1126  ;;  %1496 = vrot.lane.b32.xlu0 %v1416_v57, %s5828_s14  ;;  %v1676_v57 = vrot.slane %v1674_v47, 4  ;;  %v1675_v61 = vsel %vm6122_vm6, %v1673_v51, %v1674_v47  ;;  %v1686_v5 = vrot.slane %v1597_v60, 6  ;;  %v1607_v47 = vld [vmem:[%s5912_s10 + $0x60] sm:$0xf] }
 0x126   : > { %1230 = vst.msk [vmem:[#allocation2 + $0x14] sm:$0xf] %vm1224_vm9, %v1127_v2  ;;  %v1598_v2 = vld [vmem:[%s5912_s10 + $0x3c] sm:$0xf] }
 0x127   : > { %1498 = vrot.lane.b32.xlu1 %v1419_v62, %s5828_s14  ;;  %v1129_v7 = vpop.permute.xlu0 %1128  ;;  %v1679_v62 = vrot.slane %v1677_v52, 4  ;;  %v1678_v3 = vsel %vm6122_vm6, %v1676_v57, %v1677_v52  ;;  %v1689_v10 = vrot.slane %v1598_v2, 6  ;;  %v1608_v52 = vld [vmem:[%s5912_s10 + $0x64] sm:$0xf] }
 0x128   : > { %1231 = vst.msk [vmem:[#allocation2 + $0x18] sm:$0xf] %vm1224_vm9, %v1129_v7  ;;  %v1599_v7 = vld [vmem:[%s5912_s10 + $0x40] sm:$0xf] }
 0x129   : > { %v1131_v12 = vpop.permute.xlu1 %1130  ;;  %1500 = vrot.lane.b32.xlu0 %v1422_v4, %s5828_s14  ;;  %v1682_v4 = vrot.slane %v1680_v58, 4  ;;  %v1681_v8 = vsel %vm6122_vm6, %v1679_v62, %v1680_v58  ;;  %v1692_v15 = vrot.slane %v1599_v7, 6  ;;  %v1691_v19 = vrot.slane %v1689_v10, 4  ;;  %v1609_v58 = vld [vmem:[%s5912_s10 + $0x68] sm:$0xf] }
 0x12a   : > { %1232 = vst.msk [vmem:[#allocation2 + $0x1c] sm:$0xf] %vm1224_vm9, %v1131_v12  ;;  %v1600_v12 = vld [vmem:[%s5912_s10 + $0x44] sm:$0xf] }
 0x12b   : > { %1502 = vrot.lane.b32.xlu1 %v1425_v9, %s5828_s14  ;;  %v1133_v17 = vpop.permute.xlu0 %1132  ;;  %v1685_v9 = vrot.slane %v1683_v63, 4  ;;  %v1684_v13 = vsel %vm6122_vm6, %v1682_v4, %v1683_v63  ;;  %v1695_v20 = vrot.slane %v1600_v12, 6  ;;  %v1693_v28 = vsel %vm6122_vm6, %v1691_v19, %v1692_v15  ;;  %v1610_v63 = vld [vmem:[%s5912_s10 + $0x6c] sm:$0xf] }
 0x12c   : > { %1233 = vst.msk [vmem:[#allocation2 + $0x20] sm:$0xf] %vm1224_vm9, %v1133_v17  ;;  %v1601_v17 = vld [vmem:[%s5912_s10 + $0x48] sm:$0xf] }
 0x12d   : > { %v1135_v21 = vpop.permute.xlu1 %1134  ;;  %1504 = vrot.lane.b32.xlu0 %v1428_v14, %s5828_s14  ;;  %v1688_v14 = vrot.slane %v1686_v5, 4  ;;  %v1698_v25 = vrot.slane %v1601_v17, 6 }
 0x12e   : > { %1234 = vst.msk [vmem:[#allocation2 + $0x24] sm:$0xf] %vm1224_vm9, %v1135_v21 }
 0x12f   : > { %1506 = vrot.lane.b32.xlu1 %v1431_v18, %s5828_s14  ;;  %v1137_v26 = vpop.permute.xlu0 %1136  ;;  %v1687_v18 = vsel %vm6122_vm6, %v1685_v9, %v1686_v5  ;;  %v1690_v23 = vsel %vm6122_vm6, %v1688_v14, %v1689_v10  ;;  %v1700_v34 = vrot.slane %v1698_v25, 4  ;;  %v1611_v5 = vld [vmem:[%s5912_s10 + $0x70] sm:$0xf]  ;;  %v1612_v10 = vld [vmem:[%s5912_s10 + $0x74] sm:$0xf] }
 0x130   : > { %1235 = vst.msk [vmem:[#allocation2 + $0x28] sm:$0xf] %vm1224_vm9, %v1137_v26 }
 0x131   : > { %v1139_v33 = vpop.permute.xlu1 %1138  ;;  %1508 = vrot.lane.b32.xlu0 %v1434_v24, %s5828_s14  ;;  %v1694_v24 = vrot.slane %v1692_v15, 4  ;;  %v1613_v15 = vld [vmem:[%s5912_s10 + $0x78] sm:$0xf] }
 0x132   : > { %1236 = vst.msk [vmem:[#allocation2 + $0x2c] sm:$0xf] %vm1224_vm9, %v1139_v33 }
 0x133   : > { %1510 = vrot.lane.b32.xlu1 %v1437_v29, %s5828_s14  ;;  %v1141_v38 = vpop.permute.xlu0 %1140  ;;  %v1697_v29 = vrot.slane %v1695_v20, 4  ;;  %v1696_v33 = vsel %vm6122_vm6, %v1694_v24, %v1695_v20  ;;  %v1614_v20 = vld [vmem:[%s5912_s10 + $0x7c] sm:$0xf] }
 0x134   : > { %1237 = vst.msk [vmem:[#allocation2 + $0x30] sm:$0xf] %vm1224_vm9, %v1141_v38 }
 0x135   : > { %v1143_v43 = vpop.permute.xlu1 %1142  ;;  %1512 = vrot.lane.b32.xlu0 %v1440_v35, %s5828_s14  ;;  %v1704_v35 = vrot.slane %v1603_v27, 6  ;;  %v1699_v38 = vsel %vm6122_vm6, %v1697_v29, %v1698_v25  ;;  %v1615_v25 = vld [vmem:[%s5912_s10 + $0x80] sm:$0xf] }
 0x136   : > { %1238 = vst.msk [vmem:[#allocation2 + $0x34] sm:$0xf] %vm1224_vm9, %v1143_v43  ;;  %v1702_v43 = vsel %vm6122_vm6, %v1700_v34, %v1701_v30  ;;  %v1616_v30 = vld [vmem:[%s5912_s10 + $0x84] sm:$0xf] }
 0x137   : > { %1514 = vrot.lane.b32.xlu1 %v1443_v40, %s5828_s14  ;;  %v1145_v48 = vpop.permute.xlu0 %1144  ;;  %v1707_v40 = vrot.slane %v1604_v32, 6  ;;  %v1706_v44 = vrot.slane %v1704_v35, 4 }
 0x138   : > { %1239 = vst.msk [vmem:[#allocation2 + $0x38] sm:$0xf] %vm1224_vm9, %v1145_v48  ;;  %v1705_v48 = vsel %vm6122_vm6, %v1703_v39, %v1704_v35  ;;  %v1617_v35 = vld [vmem:[%s5912_s10 + $0x88] sm:$0xf] }
 0x139   : > { %v1147_v53 = vpop.permute.xlu1 %1146  ;;  %1772 = vrot.lane.b32.xlu0 %v1666_v45, %s5829_s15  ;;  %v1710_v45 = vrot.slane %v1605_v37, 6  ;;  %v1709_v49 = vrot.slane %v1707_v40, 4 }
 0x13a   : > { %1240 = vst.msk [vmem:[#allocation2 + $0x3c] sm:$0xf] %vm1224_vm9, %v1147_v53  ;;  %v1708_v53 = vsel %vm6122_vm6, %v1706_v44, %v1707_v40  ;;  %v1618_v40 = vld [vmem:[%s5912_s10 + $0x8c] sm:$0xf] }
 0x13b   : > { %1774 = vrot.lane.b32.xlu1 %v1669_v50, %s5829_s15  ;;  %v1149_v59 = vpop.permute.xlu0 %1148  ;;  %v1713_v50 = vrot.slane %v1606_v42, 6  ;;  %v1712_v54 = vrot.slane %v1710_v45, 4 }
 0x13c   : > { %1241 = vst.msk [vmem:[#allocation2 + $0x40] sm:$0xf] %vm1224_vm9, %v1149_v59  ;;  %v1711_v59 = vsel %vm6122_vm6, %v1709_v49, %v1710_v45  ;;  %v1619_v45 = vld [vmem:[%s5912_s10 + $0x90] sm:$0xf] }
 0x13d   : > { %v1151_v1 = vpop.permute.xlu1 %1150  ;;  %1776 = vrot.lane.b32.xlu0 %v1672_v56, %s5829_s15  ;;  %v1716_v56 = vrot.slane %v1607_v47, 6  ;;  %v1715_v60 = vrot.slane %v1713_v50, 4 }
 0x13e   : > { %1242 = vst.msk [vmem:[#allocation2 + $0x44] sm:$0xf] %vm1224_vm9, %v1151_v1  ;;  %v1714_v1 = vsel %vm6122_vm6, %v1712_v54, %v1713_v50  ;;  %v1620_v50 = vld [vmem:[%s5912_s10 + $0x94] sm:$0xf] }
 0x13f   : > { %1778 = vrot.lane.b32.xlu1 %v1675_v61, %s5829_s15  ;;  %v1153_v6 = vpop.permute.xlu0 %1152  ;;  %v1719_v61 = vrot.slane %v1608_v52, 6  ;;  %v1718_v2 = vrot.slane %v1716_v56, 4 }
 0x140   : > { %1243 = vst.msk [vmem:[#allocation2 + $0x48] sm:$0xf] %vm1224_vm9, %v1153_v6  ;;  %v1717_v6 = vsel %vm6122_vm6, %v1715_v60, %v1716_v56  ;;  %v1621_v56 = vld [vmem:[%s5912_s10 + $0x98] sm:$0xf] }
 0x141   : > { %v1155_v11 = vpop.permute.xlu1 %1154  ;;  %1780 = vrot.lane.b32.xlu0 %v1678_v3, %s5829_s15  ;;  %v1722_v3 = vrot.slane %v1609_v58, 6  ;;  %v1721_v7 = vrot.slane %v1719_v61, 4 }
 0x142   : > { %1244 = vst.msk [vmem:[#allocation2 + $0x4c] sm:$0xf] %vm1224_vm9, %v1155_v11  ;;  %v1720_v11 = vsel %vm6122_vm6, %v1718_v2, %v1719_v61  ;;  %v1622_v61 = vld [vmem:[%s5912_s10 + $0x9c] sm:$0xf] }
 0x143   : > { %1782 = vrot.lane.b32.xlu1 %v1681_v8, %s5829_s15  ;;  %v1157_v16 = vpop.permute.xlu0 %1156  ;;  %v1725_v8 = vrot.slane %v1610_v63, 6  ;;  %v1724_v12 = vrot.slane %v1722_v3, 4 }
 0x144   : > { %1245 = vst.msk [vmem:[#allocation2 + $0x50] sm:$0xf] %vm1224_vm9, %v1157_v16  ;;  %v1723_v16 = vsel %vm6122_vm6, %v1721_v7, %v1722_v3  ;;  %v1623_v3 = vld [vmem:[%s5912_s10 + $0xa0] sm:$0xf] }
 0x145   : > { %v1159_v21 = vpop.permute.xlu1 %1158  ;;  %1784 = vrot.lane.b32.xlu0 %v1684_v13, %s5829_s15  ;;  %v1728_v13 = vrot.slane %v1611_v5, 6  ;;  %v1727_v17 = vrot.slane %v1725_v8, 4 }
 0x146   : > { %1246 = vst.msk [vmem:[#allocation2 + $0x54] sm:$0xf] %vm1224_vm9, %v1159_v21  ;;  %v1726_v21 = vsel %vm6122_vm6, %v1724_v12, %v1725_v8  ;;  %v1624_v8 = vld [vmem:[%s5912_s10 + $0xa4] sm:$0xf] }
 0x147   : > { %1786 = vrot.lane.b32.xlu1 %v1687_v18, %s5829_s15  ;;  %v1161_v26 = vpop.permute.xlu0 %1160  ;;  %v1731_v18 = vrot.slane %v1612_v10, 6  ;;  %v1730_v22 = vrot.slane %v1728_v13, 4 }
 0x148   : > { %1247 = vst.msk [vmem:[#allocation2 + $0x58] sm:$0xf] %vm1224_vm9, %v1161_v26  ;;  %v1729_v26 = vsel %vm6122_vm6, %v1727_v17, %v1728_v13  ;;  %v1625_v17 = vld [vmem:[%s5912_s10 + $0xa8] sm:$0x3] }
 0x149   : > { %v1163_v31 = vpop.permute.xlu1 %1162  ;;  %1788 = vrot.lane.b32.xlu0 %v1690_v23, %s5829_s15  ;;  %v1734_v23 = vrot.slane %v1613_v15, 6  ;;  %v1733_v27 = vrot.slane %v1731_v18, 4  ;;  %v1767_v15 = vrot.slane %v1624_v8, 6 }
 0x14a   : > { %1248 = vst.msk [vmem:[#allocation2 + $0x5c] sm:$0xf] %vm1224_vm9, %v1163_v31  ;;  %v1732_v31 = vsel %vm6122_vm6, %v1730_v22, %v1731_v18 }
 0x14b   : > { %1790 = vrot.lane.b32.xlu1 %v1693_v28, %s5829_s15  ;;  %v1165_v36 = vpop.permute.xlu0 %1164  ;;  %v1737_v28 = vrot.slane %v1614_v20, 6  ;;  %v1736_v32 = vrot.slane %v1734_v23, 4  ;;  %v1769_v22 = vrot.slane %v1767_v15, 4 }
 0x14c   : > { %1249 = vst.msk [vmem:[#allocation2 + $0x60] sm:$0xf] %vm1224_vm9, %v1165_v36  ;;  %v1735_v36 = vsel %vm6122_vm6, %v1733_v27, %v1734_v23  ;;  %v1770_v23 = vrot.slane %v1625_v17, 6  ;;  %v1942_v17 = vld [vmem:[%s5912_s10 + $0x94] sm:$0xf] }
 0x14d   : > { %v1167_v41 = vpop.permute.xlu1 %1166  ;;  %1792 = vrot.lane.b32.xlu0 %v1696_v33, %s5829_s15  ;;  %v1740_v33 = vrot.slane %v1615_v25, 6  ;;  %v1739_v37 = vrot.slane %v1737_v28, 4 }
 0x14e   : > { %1250 = vst.msk [vmem:[#allocation2 + $0x64] sm:$0xf] %vm1224_vm9, %v1167_v41  ;;  %v1738_v41 = vsel %vm6122_vm6, %v1736_v32, %v1737_v28  ;;  %v1771_v27 = vsel %vm6122_vm6, %v1769_v22, %v1770_v23  ;;  %v1945_v23 = vld [vmem:[%s5912_s10 + $0xa0] sm:$0xf] }
 0x14f   : > { %1794 = vrot.lane.b32.xlu1 %v1699_v38, %s5829_s15  ;;  %v1169_v46 = vpop.permute.xlu0 %1168  ;;  %v1743_v38 = vrot.slane %v1616_v30, 6  ;;  %v1742_v42 = vrot.slane %v1740_v33, 4 }
 0x150   : > { %1251 = vst.msk [vmem:[#allocation2 + $0x68] sm:$0xf] %vm1224_vm9, %v1169_v46  ;;  %v1741_v46 = vsel %vm6122_vm6, %v1739_v37, %v1740_v33  ;;  %v1919_v33 = vld [vmem:[%s5912_s10 + $0x38] sm:$0xf]  ;;  %v1921_v37 = vld [vmem:[%s5912_s10 + $0x40] sm:$0xf] }
 0x151   : > { %v1171_v51 = vpop.permute.xlu1 %1170  ;;  %1796 = vrot.lane.b32.xlu0 %v1702_v43, %s5829_s15  ;;  %v1746_v43 = vrot.slane %v1617_v35, 6  ;;  %v1745_v47 = vrot.slane %v1743_v38, 4  ;;  %v1920_v35 = vld [vmem:[%s5912_s10 + $0x3c] sm:$0xf] }
 0x152   : > { %1252 = vst.msk [vmem:[#allocation2 + $0x6c] sm:$0xf] %vm1224_vm9, %v1171_v51  ;;  %v1744_v51 = vsel %vm6122_vm6, %v1742_v42, %v1743_v38 }
 0x153   : > { %1798 = vrot.lane.b32.xlu1 %v1705_v48, %s5829_s15  ;;  %v1173_v57 = vpop.permute.xlu0 %1172  ;;  %v1749_v48 = vrot.slane %v1618_v40, 6  ;;  %v1748_v52 = vrot.slane %v1746_v43, 4 }
 0x154   : > { %1253 = vst.msk [vmem:[#allocation2 + $0x70] sm:$0xf] %vm1224_vm9, %v1173_v57  ;;  %v1747_v57 = vsel %vm6122_vm6, %v1745_v47, %v1746_v43  ;;  %v1924_v43 = vld [vmem:[%s5912_s10 + $0x4c] sm:$0xf]  ;;  %v1926_v47 = vld [vmem:[%s5912_s10 + $0x54] sm:$0xf] }
 0x155   : > { %v1175_v62 = vpop.permute.xlu1 %1174  ;;  %1800 = vrot.lane.b32.xlu0 %v1708_v53, %s5829_s15  ;;  %v1752_v53 = vrot.slane %v1619_v45, 6  ;;  %v1751_v58 = vrot.slane %v1749_v48, 4  ;;  %v1925_v45 = vld [vmem:[%s5912_s10 + $0x50] sm:$0xf] }
 0x156   : > { %1254 = vst.msk [vmem:[#allocation2 + $0x74] sm:$0xf] %vm1224_vm9, %v1175_v62  ;;  %v1750_v62 = vsel %vm6122_vm6, %v1748_v52, %v1749_v48 }
 0x157   : > { %1802 = vrot.lane.b32.xlu1 %v1711_v59, %s5829_s15  ;;  %v1177_v4 = vpop.permute.xlu0 %1176  ;;  %v1755_v59 = vrot.slane %v1620_v50, 6  ;;  %v1754_v63 = vrot.slane %v1752_v53, 4 }
 0x158   : > { %1255 = vst.msk [vmem:[#allocation2 + $0x78] sm:$0xf] %vm1224_vm9, %v1177_v4  ;;  %v1753_v4 = vsel %vm6122_vm6, %v1751_v58, %v1752_v53  ;;  %v1929_v53 = vld [vmem:[%s5912_s10 + $0x60] sm:$0xf]  ;;  %v1931_v58 = vld [vmem:[%s5912_s10 + $0x68] sm:$0xf] }
 0x159   : > { %v1179_v9 = vpop.permute.xlu1 %1178  ;;  %1804 = vrot.lane.b32.xlu0 %v1714_v1, %s5829_s15  ;;  %v1758_v1 = vrot.slane %v1621_v56, 6  ;;  %v1757_v5 = vrot.slane %v1755_v59, 4  ;;  %v1930_v56 = vld [vmem:[%s5912_s10 + $0x64] sm:$0xf] }
 0x15a   : > { %1256 = vst.msk [vmem:[#allocation2 + $0x7c] sm:$0xf] %vm1224_vm9, %v1179_v9  ;;  %v1756_v9 = vsel %vm6122_vm6, %v1754_v63, %v1755_v59 }
 0x15b   : > { %1806 = vrot.lane.b32.xlu1 %v1717_v6, %s5829_s15  ;;  %v1181_v14 = vpop.permute.xlu0 %1180  ;;  %v1761_v6 = vrot.slane %v1622_v61, 6  ;;  %v1760_v10 = vrot.slane %v1758_v1, 4  ;;  %v1759_v13 = vsel %vm6122_vm6, %v1757_v5, %v1758_v1  ;;  %v1934_v1 = vld [vmem:[%s5912_s10 + $0x74] sm:$0xf]  ;;  %v1936_v5 = vld [vmem:[%s5912_s10 + $0x7c] sm:$0xf] }
 0x15c   : > { %1257 = vst.msk [vmem:[#allocation2 + $0x80] sm:$0xf] %vm1224_vm9, %v1181_v14 }
 0x15d   : > { %v1183_v19 = vpop.permute.xlu1 %1182  ;;  %1808 = vrot.lane.b32.xlu0 %v1720_v11, %s5829_s15  ;;  %v1764_v11 = vrot.slane %v1623_v3, 6  ;;  %v1763_v14 = vrot.slane %v1761_v6, 4  ;;  %v1762_v18 = vsel %vm6122_vm6, %v1760_v10, %v1761_v6  ;;  %v1935_v3 = vld [vmem:[%s5912_s10 + $0x78] sm:$0xf] }
 0x15e   : > { %1258 = vst.msk [vmem:[#allocation2 + $0x84] sm:$0xf] %vm1224_vm9, %v1183_v19 }
 0x15f   : > { %1810 = vrot.lane.b32.xlu1 %v1723_v16, %s5829_s15  ;;  %v1185_v24 = vpop.permute.xlu0 %1184  ;;  %v1766_v19 = vrot.slane %v1764_v11, 4 }
 0x160   : > { %1259 = vst.msk [vmem:[#allocation2 + $0x88] sm:$0xf] %vm1224_vm9, %v1185_v24 }
 0x161   : > { %v1187_v29 = vpop.permute.xlu1 %1186  ;;  %1812 = vrot.lane.b32.xlu0 %v1726_v21, %s5829_s15  ;;  %v1765_v21 = vsel %vm6122_vm6, %v1763_v14, %v1764_v11  ;;  %v1768_v25 = vsel %vm6122_vm6, %v1766_v19, %v1767_v15  ;;  %v1939_v11 = vld [vmem:[%s5912_s10 + $0x88] sm:$0xf]  ;;  %v1941_v15 = vld [vmem:[%s5912_s10 + $0x90] sm:$0xf]  ;;  %v1943_v19 = vld [vmem:[%s5912_s10 + $0x98] sm:$0xf] }
 0x162   : > { %1260 = vst.msk [vmem:[#allocation2 + $0x8c] sm:$0xf] %vm1224_vm9, %v1187_v29  ;;  %v1917_v29 = vld [vmem:[%s5912_s10 + $0x30] sm:$0xf]  ;;  %vm4203_vm9 = vcmask 191616  }
 0x163   : > { %1814 = vrot.lane.b32.xlu1 %v1729_v26, %s5829_s15  ;;  %v1445_v34 = vpop.permute.xlu0 %1444 }
 0x164   : > { %1553 = vst.msk [vmem:[#allocation2] sm:$0xf] %vm1552_vm10, %v1445_v34 }
 0x165   : > { %v1447_v39 = vpop.permute.xlu1 %1446  ;;  %1816 = vrot.lane.b32.xlu0 %v1732_v31, %s5829_s15  ;;  %v1918_v31 = vld [vmem:[%s5912_s10 + $0x34] sm:$0xf] }
 0x166   : > { %1554 = vst.msk [vmem:[#allocation2 + $0x4] sm:$0xf] %vm1552_vm10, %v1447_v39  ;;  %v1922_v39 = vld [vmem:[%s5912_s10 + $0x44] sm:$0xf] }
 0x167   : > { %1818 = vrot.lane.b32.xlu1 %v1735_v36, %s5829_s15  ;;  %v1449_v44 = vpop.permute.xlu0 %1448 }
 0x168   : > { %1555 = vst.msk [vmem:[#allocation2 + $0x8] sm:$0xf] %vm1552_vm10, %v1449_v44 }
 0x169   : > { %v1451_v49 = vpop.permute.xlu1 %1450  ;;  %1820 = vrot.lane.b32.xlu0 %v1738_v41, %s5829_s15  ;;  %v1923_v41 = vld [vmem:[%s5912_s10 + $0x48] sm:$0xf] }
 0x16a   : > { %1556 = vst.msk [vmem:[#allocation2 + $0xc] sm:$0xf] %vm1552_vm10, %v1451_v49  ;;  %v1927_v49 = vld [vmem:[%s5912_s10 + $0x58] sm:$0xf] }
 0x16b   : > { %1822 = vrot.lane.b32.xlu1 %v1741_v46, %s5829_s15  ;;  %v1453_v54 = vpop.permute.xlu0 %1452 }
 0x16c   : > { %1557 = vst.msk [vmem:[#allocation2 + $0x10] sm:$0xf] %vm1552_vm10, %v1453_v54 }
 0x16d   : > { %v1455_v60 = vpop.permute.xlu1 %1454  ;;  %1824 = vrot.lane.b32.xlu0 %v1744_v51, %s5829_s15  ;;  %v1928_v51 = vld [vmem:[%s5912_s10 + $0x5c] sm:$0xf] }
 0x16e   : > { %1558 = vst.msk [vmem:[#allocation2 + $0x14] sm:$0xf] %vm1552_vm10, %v1455_v60  ;;  %v1932_v60 = vld [vmem:[%s5912_s10 + $0x6c] sm:$0xf] }
 0x16f   : > { %1826 = vrot.lane.b32.xlu1 %v1747_v57, %s5829_s15  ;;  %v1457_v2 = vpop.permute.xlu0 %1456 }
 0x170   : > { %1559 = vst.msk [vmem:[#allocation2 + $0x18] sm:$0xf] %vm1552_vm10, %v1457_v2 }
 0x171   : > { %v1459_v7 = vpop.permute.xlu1 %1458  ;;  %1828 = vrot.lane.b32.xlu0 %v1750_v62, %s5829_s15  ;;  %v1933_v62 = vld [vmem:[%s5912_s10 + $0x70] sm:$0xf] }
 0x172   : > { %1560 = vst.msk [vmem:[#allocation2 + $0x1c] sm:$0xf] %vm1552_vm10, %v1459_v7  ;;  %v1937_v7 = vld [vmem:[%s5912_s10 + $0x80] sm:$0xf] }
 0x173   : > { %1830 = vrot.lane.b32.xlu1 %v1753_v4, %s5829_s15  ;;  %v1461_v12 = vpop.permute.xlu0 %1460 }
 0x174   : > { %1561 = vst.msk [vmem:[#allocation2 + $0x20] sm:$0xf] %vm1552_vm10, %v1461_v12 }
 0x175   : > { %v1463_v16 = vpop.permute.xlu1 %1462  ;;  %1832 = vrot.lane.b32.xlu0 %v1756_v9, %s5829_s15  ;;  %v1938_v9 = vld [vmem:[%s5912_s10 + $0x84] sm:$0xf] }
 0x176   : > { %1562 = vst.msk [vmem:[#allocation2 + $0x24] sm:$0xf] %vm1552_vm10, %v1463_v16 }
 0x177   : > { %1834 = vrot.lane.b32.xlu1 %v1759_v13, %s5829_s15  ;;  %v1465_v20 = vpop.permute.xlu0 %1464  ;;  %v1940_v13 = vld [vmem:[%s5912_s10 + $0x8c] sm:$0xf] }
 0x178   : > { %1563 = vst.msk [vmem:[#allocation2 + $0x28] sm:$0xf] %vm1552_vm10, %v1465_v20 }
 0x179   : > { %v1467_v24 = vpop.permute.xlu1 %1466  ;;  %1836 = vrot.lane.b32.xlu0 %v1762_v18, %s5829_s15 }
 0x17a   : > { %1564 = vst.msk [vmem:[#allocation2 + $0x2c] sm:$0xf] %vm1552_vm10, %v1467_v24 }
 0x17b   : > { %1838 = vrot.lane.b32.xlu1 %v1765_v21, %s5829_s15  ;;  %v1469_v26 = vpop.permute.xlu0 %1468  ;;  %v1944_v21 = vld [vmem:[%s5912_s10 + $0x9c] sm:$0xf] }
 0x17c   : > { %1565 = vst.msk [vmem:[#allocation2 + $0x30] sm:$0xf] %vm1552_vm10, %v1469_v26 }
 0x17d   : > { %v1471_v28 = vpop.permute.xlu1 %1470  ;;  %1840 = vrot.lane.b32.xlu0 %v1768_v25, %s5829_s15  ;;  %v1946_v25 = vld [vmem:[%s5912_s10 + $0xa4] sm:$0xf] }
 0x17e   : > { %1566 = vst.msk [vmem:[#allocation2 + $0x34] sm:$0xf] %vm1552_vm10, %v1471_v28 }
 0x17f   : > { %1842 = vrot.lane.b32.xlu1 %v1771_v27, %s5829_s15  ;;  %v1473_v30 = vpop.permute.xlu0 %1472  ;;  %v1947_v27 = vld [vmem:[%s5912_s10 + $0xa8] sm:$0xf]  ;;  %s5837_s15 = smov 64  }
 0x180   : > { %1567 = vst.msk [vmem:[#allocation2 + $0x38] sm:$0xf] %vm1552_vm10, %v1473_v30 }
 0x181   : > { %v1475_v32 = vpop.permute.xlu1 %1474  ;;  %1989 = vrot.lane.b32.xlu0 %v1917_v29, %s5830_s16  ;;  %v1948_v29 = vld [vmem:[%s5912_s10 + $0xac] sm:$0xf] }
 0x182   : > { %1568 = vst.msk [vmem:[#allocation2 + $0x3c] sm:$0xf] %vm1552_vm10, %v1475_v32  ;;  %v1949_v32 = vld [vmem:[%s5912_s10 + $0xb0] sm:$0xf] }
 0x183   : > { %1991 = vrot.lane.b32.xlu1 %v1918_v31, %s5830_s16  ;;  %v1477_v34 = vpop.permute.xlu0 %1476  ;;  %v2135_v31 = vld [vmem:[%s5912_s10 + $0x34] sm:$0xf] }
 0x184   : > { %1569 = vst.msk [vmem:[#allocation2 + $0x40] sm:$0xf] %vm1552_vm10, %v1477_v34  ;;  %v2134_v34 = vld [vmem:[%s5912_s10 + $0x30] sm:$0xe] }
 0x185   : > { %v1479_v36 = vpop.permute.xlu1 %1478  ;;  %1993 = vrot.lane.b32.xlu0 %v1919_v33, %s5830_s16 }
 0x186   : > { %1570 = vst.msk [vmem:[#allocation2 + $0x44] sm:$0xf] %vm1552_vm10, %v1479_v36  ;;  %v1950_v36 = vld [vmem:[%s5912_s10 + $0xb4] sm:$0xf] }
 0x187   : > { %1995 = vrot.lane.b32.xlu1 %v1920_v35, %s5830_s16  ;;  %v1481_v38 = vpop.permute.xlu0 %1480  ;;  %v2136_v35 = vld [vmem:[%s5912_s10 + $0x38] sm:$0xf] }
 0x188   : > { %1571 = vst.msk [vmem:[#allocation2 + $0x48] sm:$0xf] %vm1552_vm10, %v1481_v38 }
 0x189   : > { %v1483_v40 = vpop.permute.xlu1 %1482  ;;  %1997 = vrot.lane.b32.xlu0 %v1921_v37, %s5830_s16  ;;  %v2210_v37 = vrot.slane %v2135_v31, 5 }
 0x18a   : > { %1572 = vst.msk [vmem:[#allocation2 + $0x4c] sm:$0xf] %vm1552_vm10, %v1483_v40  ;;  %v1951_v40 = vld [vmem:[%s5912_s10 + $0xb8] sm:$0xf] }
 0x18b   : > { %1999 = vrot.lane.b32.xlu1 %v1922_v39, %s5830_s16  ;;  %v1485_v42 = vpop.permute.xlu0 %1484  ;;  %v2137_v39 = vld [vmem:[%s5912_s10 + $0x3c] sm:$0xf] }
 0x18c   : > { %1573 = vst.msk [vmem:[#allocation2 + $0x50] sm:$0xf] %vm1552_vm10, %v1485_v42  ;;  %v2213_v42 = vrot.slane %v2136_v35, 5 }
 0x18d   : > { %v1487_v44 = vpop.permute.xlu1 %1486  ;;  %2001 = vrot.lane.b32.xlu0 %v1923_v41, %s5830_s16  ;;  %v5351_v41 = vrot.slane %v2134_v34, 9 }
 0x18e   : > { %1574 = vst.msk [vmem:[#allocation2 + $0x54] sm:$0xf] %vm1552_vm10, %v1487_v44  ;;  %v2138_v44 = vld [vmem:[%s5912_s10 + $0x40] sm:$0xf] }
 0x18f   : > { %2003 = vrot.lane.b32.xlu1 %v1924_v43, %s5830_s16  ;;  %v1489_v46 = vpop.permute.xlu0 %1488 }
 0x190   : > { %1575 = vst.msk [vmem:[#allocation2 + $0x58] sm:$0xf] %vm1552_vm10, %v1489_v46  ;;  %v2212_v46 = vrot.slane %v2210_v37, 4 }
 0x191   : > { %v1491_v48 = vpop.permute.xlu1 %1490  ;;  %2005 = vrot.lane.b32.xlu0 %v1925_v45, %s5830_s16  ;;  %v1952_v45 = vld [vmem:[%s5912_s10 + $0xbc] sm:$0xf] }
 0x192   : > { %1576 = vst.msk [vmem:[#allocation2 + $0x5c] sm:$0xf] %vm1552_vm10, %v1491_v48 }
 0x193   : > { %2007 = vrot.lane.b32.xlu1 %v1926_v47, %s5830_s16  ;;  %v1493_v50 = vpop.permute.xlu0 %1492  ;;  %v2216_v47 = vrot.slane %v2137_v39, 5 }
 0x194   : > { %1577 = vst.msk [vmem:[#allocation2 + $0x60] sm:$0xf] %vm1552_vm10, %v1493_v50  ;;  %v2211_v50 = vsel %vm5914_vm2, %v5351_v41, %v2210_v37 }
 0x195   : > { %v1495_v52 = vpop.permute.xlu1 %1494  ;;  %2009 = vrot.lane.b32.xlu0 %v1927_v49, %s5830_s16  ;;  %v2139_v49 = vld [vmem:[%s5912_s10 + $0x44] sm:$0xf] }
 0x196   : > { %1578 = vst.msk [vmem:[#allocation2 + $0x64] sm:$0xf] %vm1552_vm10, %v1495_v52  ;;  %v2219_v52 = vrot.slane %v2138_v44, 5 }
 0x197   : > { %2011 = vrot.lane.b32.xlu1 %v1928_v51, %s5830_s16  ;;  %v1497_v54 = vpop.permute.xlu0 %1496  ;;  %v2215_v51 = vrot.slane %v2213_v42, 4 }
 0x198   : > { %1579 = vst.msk [vmem:[#allocation2 + $0x68] sm:$0xf] %vm1552_vm10, %v1497_v54  ;;  %v2140_v54 = vld [vmem:[%s5912_s10 + $0x48] sm:$0xf] }
 0x199   : > { %v1499_v57 = vpop.permute.xlu1 %1498  ;;  %2013 = vrot.lane.b32.xlu0 %v1929_v53, %s5830_s16 }
 0x19a   : > { %1580 = vst.msk [vmem:[#allocation2 + $0x6c] sm:$0xf] %vm1552_vm10, %v1499_v57  ;;  %v2218_v57 = vrot.slane %v2216_v47, 4 }
 0x19b   : > { %2015 = vrot.lane.b32.xlu1 %v1930_v56, %s5830_s16  ;;  %v1501_v59 = vpop.permute.xlu0 %1500  ;;  %v2214_v56 = vsel %vm5914_vm2, %v2212_v46, %v2213_v42  ;;  %v2463_v42 = vld [vmem:[%s5912_s10 + $0x34] sm:$0xf] }
 0x19c   : > { %1581 = vst.msk [vmem:[#allocation2 + $0x70] sm:$0xf] %vm1552_vm10, %v1501_v59 }
 0x19d   : > { %v1503_v61 = vpop.permute.xlu1 %1502  ;;  %2017 = vrot.lane.b32.xlu0 %v1931_v58, %s5830_s16  ;;  %v2222_v58 = vrot.slane %v2139_v49, 5 }
 0x19e   : > { %1582 = vst.msk [vmem:[#allocation2 + $0x74] sm:$0xf] %vm1552_vm10, %v1503_v61  ;;  %v2217_v61 = vsel %vm5914_vm2, %v2215_v51, %v2216_v47  ;;  %v2462_v47 = vld [vmem:[%s5912_s10 + $0x30] sm:$0xc] }
 0x19f   : > { %2019 = vrot.lane.b32.xlu1 %v1932_v60, %s5830_s16  ;;  %v1505_v63 = vpop.permute.xlu0 %1504  ;;  %v2141_v60 = vld [vmem:[%s5912_s10 + $0x4c] sm:$0xf] }
 0x1a0   : > { %1583 = vst.msk [vmem:[#allocation2 + $0x78] sm:$0xf] %vm1552_vm10, %v1505_v63  ;;  %v2225_v63 = vrot.slane %v2140_v54, 5 }
 0x1a1   : > { %v1507_v2 = vpop.permute.xlu1 %1506  ;;  %2021 = vrot.lane.b32.xlu0 %v1933_v62, %s5830_s16  ;;  %v2221_v62 = vrot.slane %v2219_v52, 4 }
 0x1a2   : > { %1584 = vst.msk [vmem:[#allocation2 + $0x7c] sm:$0xf] %vm1552_vm10, %v1507_v2  ;;  %v2142_v2 = vld [vmem:[%s5912_s10 + $0x50] sm:$0xf] }
 0x1a3   : > { %2023 = vrot.lane.b32.xlu1 %v1934_v1, %s5830_s16  ;;  %v1509_v4 = vpop.permute.xlu0 %1508 }
 0x1a4   : > { %1585 = vst.msk [vmem:[#allocation2 + $0x80] sm:$0xf] %vm1552_vm10, %v1509_v4  ;;  %v2224_v4 = vrot.slane %v2222_v58, 4 }
 0x1a5   : > { %v1511_v6 = vpop.permute.xlu1 %1510  ;;  %2025 = vrot.lane.b32.xlu0 %v1935_v3, %s5830_s16  ;;  %v2220_v3 = vsel %vm5914_vm2, %v2218_v57, %v2219_v52  ;;  %v5675_v57 = vld [vmem:[%s8840_s1 + $0x8] sm:$0xff]  }
 0x1a6   : > { %1586 = vst.msk [vmem:[#allocation2 + $0x84] sm:$0xf] %vm1552_vm10, %v1511_v6 }
 0x1a7   : > { %2027 = vrot.lane.b32.xlu1 %v1936_v5, %s5830_s16  ;;  %v1513_v8 = vpop.permute.xlu0 %1512  ;;  %v2228_v5 = vrot.slane %v2141_v60, 5 }
 0x1a8   : > { %1587 = vst.msk [vmem:[#allocation2 + $0x88] sm:$0xf] %vm1552_vm10, %v1513_v8  ;;  %v2223_v8 = vsel %vm5914_vm2, %v2221_v62, %v2222_v58  ;;  %v2466_v62 = vld [vmem:[%s5912_s10 + $0x40] sm:$0xf] }
 0x1a9   : > { %v1515_v10 = vpop.permute.xlu1 %1514  ;;  %2029 = vrot.lane.b32.xlu0 %v1937_v7, %s5830_s16  ;;  %v2143_v7 = vld [vmem:[%s5912_s10 + $0x54] sm:$0xf] }
 0x1aa   : > { %1588 = vst.msk [vmem:[#allocation2 + $0x8c] sm:$0xf] %vm1552_vm10, %v1515_v10  ;;  %v2231_v10 = vrot.slane %v2142_v2, 5  ;;  %vm4330_vm10 = vcmask 257216  }
 0x1ab   : > { %2031 = vrot.lane.b32.xlu1 %v1938_v9, %s5830_s16  ;;  %v1773_v12 = vpop.permute.xlu0 %1772  ;;  %v2227_v9 = vrot.slane %v2225_v63, 4 }
 0x1ac   : > { %1881 = vst.msk [vmem:[#allocation2] sm:$0xf] %vm1880_vm11, %v1773_v12  ;;  %v2144_v12 = vld [vmem:[%s5912_s10 + $0x58] sm:$0xf] }
 0x1ad   : > { %v1775_v14 = vpop.permute.xlu1 %1774  ;;  %2033 = vrot.lane.b32.xlu0 %v1939_v11, %s5830_s16 }
 0x1ae   : > { %1882 = vst.msk [vmem:[#allocation2 + $0x4] sm:$0xf] %vm1880_vm11, %v1775_v14  ;;  %v2230_v14 = vrot.slane %v2228_v5, 4 }
 0x1af   : > { %2035 = vrot.lane.b32.xlu1 %v1940_v13, %s5830_s16  ;;  %v1777_v16 = vpop.permute.xlu0 %1776  ;;  %v2226_v13 = vsel %vm5914_vm2, %v2224_v4, %v2225_v63  ;;  %v2467_v4 = vld [vmem:[%s5912_s10 + $0x44] sm:$0xf] }
 0x1b0   : > { %1883 = vst.msk [vmem:[#allocation2 + $0x8] sm:$0xf] %vm1880_vm11, %v1777_v16 }
 0x1b1   : > { %v1779_v18 = vpop.permute.xlu1 %1778  ;;  %2037 = vrot.lane.b32.xlu0 %v1941_v15, %s5830_s16  ;;  %v2234_v15 = vrot.slane %v2143_v7, 5 }
 0x1b2   : > { %1884 = vst.msk [vmem:[#allocation2 + $0xc] sm:$0xf] %vm1880_vm11, %v1779_v18  ;;  %v2229_v18 = vsel %vm5914_vm2, %v2227_v9, %v2228_v5  ;;  %v5676_v5 = vld [vmem:[%s8840_s1] sm:$0xff]  }
 0x1b3   : > { %2039 = vrot.lane.b32.xlu1 %v1942_v17, %s5830_s16  ;;  %v1781_v20 = vpop.permute.xlu0 %1780  ;;  %v2145_v17 = vld [vmem:[%s5912_s10 + $0x5c] sm:$0xf] }
 0x1b4   : > { %1885 = vst.msk [vmem:[#allocation2 + $0x10] sm:$0xf] %vm1880_vm11, %v1781_v20  ;;  %v2237_v20 = vrot.slane %v2144_v12, 5 }
 0x1b5   : > { %v1783_v22 = vpop.permute.xlu1 %1782  ;;  %2041 = vrot.lane.b32.xlu0 %v1943_v19, %s5830_s16  ;;  %v2233_v19 = vrot.slane %v2231_v10, 4 }
 0x1b6   : > { %1886 = vst.msk [vmem:[#allocation2 + $0x14] sm:$0xf] %vm1880_vm11, %v1783_v22  ;;  %v2146_v22 = vld [vmem:[%s5912_s10 + $0x60] sm:$0xf] }
 0x1b7   : > { %2043 = vrot.lane.b32.xlu1 %v1944_v21, %s5830_s16  ;;  %v1785_v24 = vpop.permute.xlu0 %1784 }
 0x1b8   : > { %1887 = vst.msk [vmem:[#allocation2 + $0x18] sm:$0xf] %vm1880_vm11, %v1785_v24  ;;  %v2236_v24 = vrot.slane %v2234_v15, 4 }
 0x1b9   : > { %v1787_v26 = vpop.permute.xlu1 %1786  ;;  %2045 = vrot.lane.b32.xlu0 %v1945_v23, %s5830_s16  ;;  %v2232_v23 = vsel %vm5914_vm2, %v2230_v14, %v2231_v10  ;;  %v2468_v10 = vld [vmem:[%s5912_s10 + $0x48] sm:$0xf] }
 0x1ba   : > { %1888 = vst.msk [vmem:[#allocation2 + $0x1c] sm:$0xf] %vm1880_vm11, %v1787_v26 }
 0x1bb   : > { %2047 = vrot.lane.b32.xlu1 %v1946_v25, %s5830_s16  ;;  %v1789_v28 = vpop.permute.xlu0 %1788  ;;  %v2240_v25 = vrot.slane %v2145_v17, 5 }
 0x1bc   : > { %1889 = vst.msk [vmem:[#allocation2 + $0x20] sm:$0xf] %vm1880_vm11, %v1789_v28  ;;  %v2235_v28 = vsel %vm5914_vm2, %v2233_v19, %v2234_v15  ;;  %v2469_v15 = vld [vmem:[%s5912_s10 + $0x4c] sm:$0xf] }
 0x1bd   : > { %v1791_v30 = vpop.permute.xlu1 %1790  ;;  %2049 = vrot.lane.b32.xlu0 %v1947_v27, %s5830_s16  ;;  %v2147_v27 = vld [vmem:[%s5912_s10 + $0x64] sm:$0xf]  ;;  %v2242_v34 = vrot.slane %v2240_v25, 4 }
 0x1be   : > { %1890 = vst.msk [vmem:[#allocation2 + $0x24] sm:$0xf] %vm1880_vm11, %v1791_v30  ;;  %v2243_v30 = vrot.slane %v2146_v22, 5  ;;  %v2246_v35 = vrot.slane %v2147_v27, 5 }
 0x1bf   : > { %2051 = vrot.lane.b32.xlu1 %v1948_v29, %s5830_s16  ;;  %v1793_v33 = vpop.permute.xlu0 %1792  ;;  %v2239_v29 = vrot.slane %v2237_v20, 4 }
 0x1c0   : > { %1891 = vst.msk [vmem:[#allocation2 + $0x28] sm:$0xf] %vm1880_vm11, %v1793_v33  ;;  %v2238_v33 = vsel %vm5914_vm2, %v2236_v24, %v2237_v20  ;;  %v2244_v44 = vsel %vm5914_vm2, %v2242_v34, %v2243_v30  ;;  %v2470_v20 = vld [vmem:[%s5912_s10 + $0x50] sm:$0xf] }
 0x1c1   : > { %v1795_v38 = vpop.permute.xlu1 %1794  ;;  %2053 = vrot.lane.b32.xlu0 %v1949_v32, %s5830_s16  ;;  %v2148_v32 = vld [vmem:[%s5912_s10 + $0x68] sm:$0xf]  ;;  %v2241_v37 = vsel %vm5914_vm2, %v2239_v29, %v2240_v25  ;;  %v2471_v25 = vld [vmem:[%s5912_s10 + $0x54] sm:$0xf] }
 0x1c2   : > { %1892 = vst.msk [vmem:[#allocation2 + $0x2c] sm:$0xf] %vm1880_vm11, %v1795_v38  ;;  %v2245_v38 = vrot.slane %v2243_v30, 4  ;;  %v2249_v39 = vrot.slane %v2148_v32, 5  ;;  %v2472_v30 = vld [vmem:[%s5912_s10 + $0x58] sm:$0xf] }
 0x1c3   : > { %2055 = vrot.lane.b32.xlu1 %v1950_v36, %s5830_s16  ;;  %v1797_v43 = vpop.permute.xlu0 %1796 }
 0x1c4   : > { %1893 = vst.msk [vmem:[#allocation2 + $0x30] sm:$0xf] %vm1880_vm11, %v1797_v43  ;;  %v5674_v43 = vld [vmem:[%s8840_s1 + $0x10] ss:$0 sps:$4 sm:$0x33]   ;;  %v2251_v51 = vrot.slane %v2249_v39, 4 }
 0x1c5   : > { %v1799_v48 = vpop.permute.xlu1 %1798  ;;  %2057 = vrot.lane.b32.xlu0 %v1951_v40, %s5830_s16  ;;  %v6935_v40 = vld [vmem:[%s5912_s10 + $0x6c] sm:$0xf]  ;;  %5612 = vmatprep.subr.msk.bf16.mxu0 %vm787_vm4, %v5674_v43  ;;  %v3000_v49 = vsel %vm787_vm4, %v5674_v43, 0  ;;  %vm7658_vm4 = vmor %vm3835_vm1, %vm3836_vm3  ;;  %vm4794_vm1 = vcmask 585219   ;;  %vm4908_vm3 = vcmask 584192  }
 0x1c6   : > { %1894 = vst.msk [vmem:[#allocation2 + $0x34] sm:$0xf] %vm1880_vm11, %v1799_v48  ;;  %v2464_v48 = vld [vmem:[%s5912_s10 + $0x38] sm:$0xf]  ;;  %v2252_v52 = vrot.slane %v6935_v40, 5  ;;  %5537 = vmatpush3.bf16.msra.mxu0 %v3000_v49 }
 0x1c7   : > { %2059 = vrot.lane.b32.xlu1 %v1952_v45, %s5830_s16  ;;  %v1801_v53 = vpop.permute.xlu0 %1800  ;;  %v2248_v45 = vrot.slane %v2246_v35, 4  ;;  %v2541_v60 = vrot.slane %v2464_v48, 6  ;;  %5538 = vmatprep.subr.bf16.mxu0 %v5675_v57  ;;  %v2150_v49 = vld [vmem:[%s5912_s10 + $0x70] sm:$0xf] }
 0x1c8   : > { %1895 = vst.msk [vmem:[#allocation2 + $0x38] sm:$0xf] %vm1880_vm11, %v1801_v53  ;;  %v2538_v53 = vrot.slane %v2463_v42, 6  ;;  %v2253_v63 = vsel %vm5914_vm2, %v2251_v51, %v2252_v52 }
 0x1c9   : > { %v1803_v59 = vpop.permute.xlu1 %1802  ;;  %2317 = vrot.lane.b32.xlu0 %v2211_v50, %s5831_s17  ;;  %v2247_v50 = vsel %vm5914_vm2, %v2245_v38, %v2246_v35  ;;  %v2250_v58 = vsel %vm5914_vm2, %v2248_v45, %v2249_v39  ;;  %v2543_v7 = vrot.slane %v2541_v60, 4  ;;  %v2473_v35 = vld [vmem:[%s5912_s10 + $0x5c] sm:$0xf]  ;;  %v2565_v38 = vrot.slane %v2472_v30, 6  ;;  %v2474_v45 = vld [vmem:[%s5912_s10 + $0x60] sm:$0xf] }
 0x1ca   : > { %1896 = vst.msk [vmem:[#allocation2 + $0x3c] sm:$0xf] %vm1880_vm11, %v1803_v59  ;;  %v5352_v59 = vrot.slane %v2462_v47, 10  ;;  %5539 = vmatpush3.bf16.msra.mxu0 %v5675_v57  ;;  %v2568_v43 = vrot.slane %v2473_v35, 6 }
 0x1cb   : > { %2319 = vrot.lane.b32.xlu1 %v2214_v56, %s5831_s17  ;;  %v1805_v1 = vpop.permute.xlu0 %1804  ;;  %v2465_v56 = vld [vmem:[%s5912_s10 + $0x3c] sm:$0xf]  ;;  %5540 = vmatprep.subr.bf16.mxu0 %v5676_v5  ;;  %v2567_v47 = vrot.slane %v2565_v38, 4 }
 0x1cc   : > { %1897 = vst.msk [vmem:[#allocation2 + $0x40] sm:$0xf] %vm1880_vm11, %v1805_v1  ;;  %v2540_v1 = vrot.slane %v2538_v53, 4  ;;  %v2544_v2 = vrot.slane %v2465_v56, 6 }
 0x1cd   : > { %v1807_v6 = vpop.permute.xlu1 %1806  ;;  %2321 = vrot.lane.b32.xlu0 %v2217_v61, %s5831_s17  ;;  %v2569_v57 = vsel %vm6122_vm6, %v2567_v47, %v2568_v43 }
 0x1ce   : > { %1898 = vst.msk [vmem:[#allocation2 + $0x44] sm:$0xf] %vm1880_vm11, %v1807_v6  ;;  %v2539_v6 = vsel %vm6122_vm6, %v5352_v59, %v2538_v53  ;;  %v2546_v12 = vrot.slane %v2544_v2, 4  ;;  %5541 = vmatpush3.bf16.msra.mxu0 %v5676_v5  ;;  %v2570_v53 = vrot.slane %v2568_v43, 4  ;;  %v2255_v59 = vrot.slane %v2150_v49, 5 }
 0x1cf   : > { %2323 = vrot.lane.b32.xlu1 %v2220_v3, %s5831_s17  ;;  %v1809_v11 = vpop.permute.xlu0 %1808  ;;  %v2155_v49 = vld [vmem:[%s5912_s10 + $0x84] sm:$0xf] }
 0x1d0   : > { %1899 = vst.msk [vmem:[#allocation2 + $0x48] sm:$0xf] %vm1880_vm11, %v1809_v11  ;;  %v2542_v11 = vsel %vm6122_vm6, %v2540_v1, %v2541_v60 }
 0x1d1   : > { %v1811_v16 = vpop.permute.xlu1 %1810  ;;  %2325 = vrot.lane.b32.xlu0 %v2223_v8, %s5831_s17  ;;  %v2547_v8 = vrot.slane %v2466_v62, 6  ;;  %v2476_v62 = vld [vmem:[%s5912_s10 + $0x68] sm:$0xf] }
 0x1d2   : > { %1900 = vst.msk [vmem:[#allocation2 + $0x4c] sm:$0xf] %vm1880_vm11, %v1811_v16  ;;  %v2545_v16 = vsel %vm6122_vm6, %v2543_v7, %v2544_v2  ;;  %v2478_v7 = vld [vmem:[%s5912_s10 + $0x70] sm:$0xf] }
 0x1d3   : > { %2327 = vrot.lane.b32.xlu1 %v2226_v13, %s5831_s17  ;;  %v1813_v21 = vpop.permute.xlu0 %1812  ;;  %v2550_v13 = vrot.slane %v2467_v4, 6  ;;  %v2549_v17 = vrot.slane %v2547_v8, 4  ;;  %v2577_v4 = vrot.slane %v2476_v62, 6 }
 0x1d4   : > { %1901 = vst.msk [vmem:[#allocation2 + $0x50] sm:$0xf] %vm1880_vm11, %v1813_v21  ;;  %v2548_v21 = vsel %vm6122_vm6, %v2546_v12, %v2547_v8  ;;  %v2151_v8 = vld [vmem:[%s5912_s10 + $0x74] sm:$0xf] }
 0x1d5   : > { %v1815_v26 = vpop.permute.xlu1 %1814  ;;  %2329 = vrot.lane.b32.xlu0 %v2229_v18, %s5831_s17  ;;  %v2553_v18 = vrot.slane %v2468_v10, 6  ;;  %v2552_v22 = vrot.slane %v2550_v13, 4  ;;  %v2579_v10 = vrot.slane %v2577_v4, 4 }
 0x1d6   : > { %1902 = vst.msk [vmem:[#allocation2 + $0x54] sm:$0xf] %vm1880_vm11, %v1815_v26  ;;  %v2551_v26 = vsel %vm6122_vm6, %v2549_v17, %v2550_v13  ;;  %v2152_v17 = vld [vmem:[%s5912_s10 + $0x78] sm:$0xf] }
 0x1d7   : > { %2331 = vrot.lane.b32.xlu1 %v2232_v23, %s5831_s17  ;;  %v1817_v31 = vpop.permute.xlu0 %1816  ;;  %v2556_v23 = vrot.slane %v2469_v15, 6  ;;  %v2555_v27 = vrot.slane %v2553_v18, 4  ;;  %v2258_v15 = vrot.slane %v2151_v8, 5 }
 0x1d8   : > { %1903 = vst.msk [vmem:[#allocation2 + $0x58] sm:$0xf] %vm1880_vm11, %v1817_v31  ;;  %v2554_v31 = vsel %vm6122_vm6, %v2552_v22, %v2553_v18  ;;  %v2153_v18 = vld [vmem:[%s5912_s10 + $0x7c] sm:$0xf] }
 0x1d9   : > { %v1819_v36 = vpop.permute.xlu1 %1818  ;;  %2333 = vrot.lane.b32.xlu0 %v2235_v28, %s5831_s17  ;;  %v2559_v28 = vrot.slane %v2470_v20, 6  ;;  %v2558_v32 = vrot.slane %v2556_v23, 4  ;;  %v2257_v20 = vrot.slane %v2255_v59, 4 }
 0x1da   : > { %1904 = vst.msk [vmem:[#allocation2 + $0x5c] sm:$0xf] %vm1880_vm11, %v1819_v36  ;;  %v2557_v36 = vsel %vm6122_vm6, %v2555_v27, %v2556_v23  ;;  %v2260_v23 = vrot.slane %v2258_v15, 4  ;;  %v2154_v27 = vld [vmem:[%s5912_s10 + $0x80] sm:$0xf] }
 0x1db   : > { %2335 = vrot.lane.b32.xlu1 %v2238_v33, %s5831_s17  ;;  %v1821_v41 = vpop.permute.xlu0 %1820  ;;  %v2562_v33 = vrot.slane %v2471_v25, 6  ;;  %v2264_v25 = vrot.slane %v2153_v18, 5 }
 0x1dc   : > { %1905 = vst.msk [vmem:[#allocation2 + $0x60] sm:$0xf] %vm1880_vm11, %v1821_v41  ;;  %v2560_v41 = vsel %vm6122_vm6, %v2558_v32, %v2559_v28 }
 0x1dd   : > { %v1823_v46 = vpop.permute.xlu1 %1822  ;;  %2337 = vrot.lane.b32.xlu0 %v2241_v37, %s5831_s17  ;;  %v2561_v37 = vrot.slane %v2559_v28, 4  ;;  %v2564_v42 = vrot.slane %v2562_v33, 4  ;;  %v2479_v28 = vld [vmem:[%s5912_s10 + $0x74] sm:$0xf] }
 0x1de   : > { %1906 = vst.msk [vmem:[#allocation2 + $0x64] sm:$0xf] %vm1880_vm11, %v1823_v46  ;;  %v2586_v35 = vrot.slane %v2479_v28, 6 }
 0x1df   : > { %2339 = vrot.lane.b32.xlu1 %v2244_v44, %s5831_s17  ;;  %v1825_v54 = vpop.permute.xlu0 %1824  ;;  %v2563_v46 = vsel %vm6122_vm6, %v2561_v37, %v2562_v33  ;;  %v2566_v51 = vsel %vm6122_vm6, %v2564_v42, %v2565_v38  ;;  %v2266_v33 = vrot.slane %v2264_v25, 4  ;;  %v2480_v37 = vld [vmem:[%s5912_s10 + $0x78] sm:$0xf]  ;;  %v2481_v38 = vld [vmem:[%s5912_s10 + $0x7c] sm:$0xf] }
 0x1e0   : > { %1907 = vst.msk [vmem:[#allocation2 + $0x68] sm:$0xf] %vm1880_vm11, %v1825_v54  ;;  %v2571_v54 = vrot.slane %v2474_v45, 6  ;;  %v2589_v45 = vrot.slane %v2480_v37, 6  ;;  %v2161_v37 = vld [vmem:[%s5912_s10 + $0x9c] sm:$0xf] }
 0x1e1   : > { %v1827_v61 = vpop.permute.xlu1 %1826  ;;  %2341 = vrot.lane.b32.xlu0 %v2247_v50, %s5831_s17  ;;  %v2475_v50 = vld [vmem:[%s5912_s10 + $0x64] sm:$0xf] }
 0x1e2   : > { %1908 = vst.msk [vmem:[#allocation2 + $0x6c] sm:$0xf] %vm1880_vm11, %v1827_v61  ;;  %v2574_v60 = vrot.slane %v2475_v50, 6  ;;  %v2572_v1 = vsel %vm6122_vm6, %v2570_v53, %v2571_v54  ;;  %v2573_v2 = vrot.slane %v2571_v54, 4 }
 0x1e3   : > { %2343 = vrot.lane.b32.xlu1 %v2250_v58, %s5831_s17  ;;  %v1829_v3 = vpop.permute.xlu0 %1828  ;;  %v2254_v58 = vrot.slane %v2252_v52, 4 }
 0x1e4   : > { %1909 = vst.msk [vmem:[#allocation2 + $0x70] sm:$0xf] %vm1880_vm11, %v1829_v3  ;;  %v2576_v52 = vrot.slane %v2574_v60, 4 }
 0x1e5   : > { %v1831_v9 = vpop.permute.xlu1 %1830  ;;  %2345 = vrot.lane.b32.xlu0 %v2253_v63, %s5831_s17  ;;  %v2477_v63 = vld [vmem:[%s5912_s10 + $0x6c] sm:$0xf]  ;;  %v2256_v40 = vsel %vm5914_vm2, %v2254_v58, %v2255_v59  ;;  %v2270_v58 = vrot.slane %v2155_v49, 5 }
 0x1e6   : > { %1910 = vst.msk [vmem:[#allocation2 + $0x74] sm:$0xf] %vm1880_vm11, %v1831_v9  ;;  %v2580_v5 = vrot.slane %v2477_v63, 6  ;;  %v2575_v9 = vsel %vm6122_vm6, %v2573_v2, %v2574_v60  ;;  %v2578_v12 = vsel %vm6122_vm6, %v2576_v52, %v2577_v4  ;;  %v2156_v60 = vld [vmem:[%s5912_s10 + $0x88] sm:$0xf] }
 0x1e7   : > { %2645 = vrot.lane.b32.xlu1 %v2539_v6, %s5832_s7  ;;  %v1833_v14 = vpop.permute.xlu0 %1832 }
 0x1e8   : > { %1911 = vst.msk [vmem:[#allocation2 + $0x78] sm:$0xf] %vm1880_vm11, %v1833_v14  ;;  %v2582_v13 = vrot.slane %v2580_v5, 4  ;;  %v2583_v14 = vrot.slane %v2478_v7, 6 }
 0x1e9   : > { %v1835_v19 = vpop.permute.xlu1 %1834  ;;  %2647 = vrot.lane.b32.xlu0 %v2542_v11, %s5832_s7 }
 0x1ea   : > { %1912 = vst.msk [vmem:[#allocation2 + $0x7c] sm:$0xf] %vm1880_vm11, %v1835_v19  ;;  %v2581_v19 = vsel %vm6122_vm6, %v2579_v10, %v2580_v5  ;;  %v2584_v22 = vsel %vm6122_vm6, %v2582_v13, %v2583_v14  ;;  %v2158_v5 = vld [vmem:[%s5912_s10 + $0x90] sm:$0xf] }
 0x1eb   : > { %2649 = vrot.lane.b32.xlu1 %v2545_v16, %s5832_s7  ;;  %v1837_v24 = vpop.permute.xlu0 %1836 }
 0x1ec   : > { %1913 = vst.msk [vmem:[#allocation2 + $0x80] sm:$0xf] %vm1880_vm11, %v1837_v24  ;;  %v2261_v24 = vrot.slane %v2152_v17, 5 }
 0x1ed   : > { %v1839_v29 = vpop.permute.xlu1 %1838  ;;  %2651 = vrot.lane.b32.xlu0 %v2548_v21, %s5832_s7 }
 0x1ee   : > { %1914 = vst.msk [vmem:[#allocation2 + $0x84] sm:$0xf] %vm1880_vm11, %v1839_v29  ;;  %v2259_v29 = vsel %vm5914_vm2, %v2257_v20, %v2258_v15  ;;  %v2263_v30 = vrot.slane %v2261_v24, 4  ;;  %v2262_v32 = vsel %vm5914_vm2, %v2260_v23, %v2261_v24  ;;  %v2484_v15 = vld [vmem:[%s5912_s10 + $0x88] sm:$0xf] }
 0x1ef   : > { %2653 = vrot.lane.b32.xlu1 %v2551_v26, %s5832_s7  ;;  %v1841_v34 = vpop.permute.xlu0 %1840 }
 0x1f0   : > { %1915 = vst.msk [vmem:[#allocation2 + $0x88] sm:$0xf] %vm1880_vm11, %v1841_v34  ;;  %v2267_v34 = vrot.slane %v2154_v27, 5 }
 0x1f1   : > { %v1843_v39 = vpop.permute.xlu1 %1842  ;;  %2655 = vrot.lane.b32.xlu0 %v2554_v31, %s5832_s7 }
 0x1f2   : > { %1916 = vst.msk [vmem:[#allocation2 + $0x8c] sm:$0xf] %vm1880_vm11, %v1843_v39  ;;  %v2265_v39 = vsel %vm5914_vm2, %v2263_v30, %v2264_v25  ;;  %v2268_v43 = vsel %vm5914_vm2, %v2266_v33, %v2267_v34  ;;  %v2269_v63 = vrot.slane %v2267_v34, 4  ;;  %v2486_v25 = vld [vmem:[%s5912_s10 + $0x90] sm:$0xf]  ;;  %v5833_v30 = vmov 0  }
 0x1f3   : > { %2657 = vrot.lane.b32.xlu1 %v2557_v36, %s5832_s7  ;;  %v1990_v44 = vpop.permute.xlu0 %1989  ;;  %5672 = vset.pattern.permute.xlu0 %v5833_v30  ;;  %v2607_v33 = vrot.slane %v2486_v25, 6  ;;  %v2491_v25 = vld [vmem:[%s5912_s10 + $0xa4] sm:$0xf]  ;;  %3774 = vst.msk [vmem:[#allocation3] sm:$0x1] %vm3773_vm0, %v5833_v30  ;;  %vm4427_vm11 = vcmask 322816  }
 0x1f4   : > { %2098 = vst.msk [vmem:[#allocation2] sm:$0xf] %vm2097_vm12, %v1990_v44  ;;  %v2588_v44 = vrot.slane %v2586_v35, 4  ;;  %v2271_v7 = vsel %vm5914_vm2, %v2269_v63, %v2270_v58  ;;  %5673 = vset.pattern.permute.xlu1 %v5833_v30  ;;  %vm5037_vm0 = vcmask 588800  }
 0x1f5   : > { %v1992_v48 = vpop.permute.xlu1 %1991  ;;  %2659 = vrot.lane.b32.xlu0 %v2560_v41, %s5832_s7  ;;  %v2585_v41 = vrot.slane %v2583_v14, 4 }
 0x1f6   : > { %2099 = vst.msk [vmem:[#allocation2 + $0x4] sm:$0xf] %vm2097_vm12, %v1992_v48  ;;  %v2482_v48 = vld [vmem:[%s5912_s10 + $0x80] sm:$0xf]  ;;  %v2590_v54 = vsel %vm6122_vm6, %v2588_v44, %v2589_v45 }
 0x1f7   : > { %2661 = vrot.lane.b32.xlu1 %v2563_v46, %s5832_s7  ;;  %v1994_v56 = vpop.permute.xlu0 %1993  ;;  %v2592_v46 = vrot.slane %v2481_v38, 6  ;;  %v2587_v50 = vsel %vm6122_vm6, %v2585_v41, %v2586_v35 }
 0x1f8   : > { %2100 = vst.msk [vmem:[#allocation2 + $0x8] sm:$0xf] %vm2097_vm12, %v1994_v56 }
 0x1f9   : > { %v1996_v61 = vpop.permute.xlu1 %1995  ;;  %2663 = vrot.lane.b32.xlu0 %v2566_v51, %s5832_s7  ;;  %v2591_v51 = vrot.slane %v2589_v45, 4  ;;  %v2594_v56 = vrot.slane %v2592_v46, 4  ;;  %v2288_v45 = vrot.slane %v2161_v37, 5 }
 0x1fa   : > { %2101 = vst.msk [vmem:[#allocation2 + $0xc] sm:$0xf] %vm2097_vm12, %v1996_v61  ;;  %v2157_v61 = vld [vmem:[%s5912_s10 + $0x8c] sm:$0xf] }
 0x1fb   : > { %2665 = vrot.lane.b32.xlu1 %v2569_v57, %s5832_s7  ;;  %v1998_v3 = vpop.permute.xlu0 %1997  ;;  %v2595_v57 = vrot.slane %v2482_v48, 6  ;;  %v2593_v62 = vsel %vm6122_vm6, %v2591_v51, %v2592_v46  ;;  %v2276_v52 = vrot.slane %v2157_v61, 5  ;;  %v2487_v48 = vld [vmem:[%s5912_s10 + $0x94] sm:$0xf] }
 0x1fc   : > { %2102 = vst.msk [vmem:[#allocation2 + $0x10] sm:$0xf] %vm2097_vm12, %v1998_v3  ;;  %v2272_v3 = vrot.slane %v2270_v58, 4 }
 0x1fd   : > { %v2000_v6 = vpop.permute.xlu1 %1999  ;;  %2667 = vrot.lane.b32.xlu0 %v2572_v1, %s5832_s7  ;;  %v2596_v2 = vsel %vm6122_vm6, %v2594_v56, %v2595_v57  ;;  %v2597_v18 = vrot.slane %v2595_v57, 4  ;;  %v2610_v57 = vrot.slane %v2487_v48, 6 }
 0x1fe   : > { %2103 = vst.msk [vmem:[#allocation2 + $0x14] sm:$0xf] %vm2097_vm12, %v2000_v6  ;;  %v2483_v6 = vld [vmem:[%s5912_s10 + $0x84] sm:$0xf] }
 0x1ff   : > { %2347 = vrot.lane.b32.xlu1 %v2256_v40, %s5831_s17  ;;  %v2002_v11 = vpop.permute.xlu0 %2001  ;;  %v2273_v40 = vrot.slane %v2156_v60, 5  ;;  %v2598_v13 = vrot.slane %v2483_v6, 6  ;;  %v2489_v60 = vld [vmem:[%s5912_s10 + $0x9c] sm:$0xf] }
 0x200   : > { %2104 = vst.msk [vmem:[#allocation2 + $0x18] sm:$0xf] %vm2097_vm12, %v2002_v11  ;;  %v2278_v11 = vrot.slane %v2276_v52, 4 }
 0x201   : > { %v2004_v16 = vpop.permute.xlu1 %2003  ;;  %2669 = vrot.lane.b32.xlu0 %v2575_v9, %s5832_s7  ;;  %v2275_v8 = vrot.slane %v2273_v40, 4  ;;  %v2274_v10 = vsel %vm5914_vm2, %v2272_v3, %v2273_v40  ;;  %v2599_v27 = vsel %vm6122_vm6, %v2597_v18, %v2598_v13  ;;  %v2616_v40 = vrot.slane %v2489_v60, 6 }
 0x202   : > { %2105 = vst.msk [vmem:[#allocation2 + $0x1c] sm:$0xf] %vm2097_vm12, %v2004_v16  ;;  %v2485_v16 = vld [vmem:[%s5912_s10 + $0x8c] sm:$0xf] }
 0x203   : > { %2671 = vrot.lane.b32.xlu1 %v2578_v12, %s5832_s7  ;;  %v2006_v21 = vpop.permute.xlu0 %2005  ;;  %v2279_v12 = vrot.slane %v2158_v5, 5  ;;  %v2277_v17 = vsel %vm5914_vm2, %v2275_v8, %v2276_v52  ;;  %v2604_v23 = vrot.slane %v2485_v16, 6  ;;  %v2163_v5 = vld [vmem:[%s5912_s10 + $0xa4] sm:$0xf] }
 0x204   : > { %2106 = vst.msk [vmem:[#allocation2 + $0x20] sm:$0xf] %vm2097_vm12, %v2006_v21  ;;  %v2600_v21 = vrot.slane %v2598_v13, 4 }
 0x205   : > { %v2008_v26 = vpop.permute.xlu1 %2007  ;;  %2673 = vrot.lane.b32.xlu0 %v2581_v19, %s5832_s7  ;;  %v2280_v20 = vsel %vm5914_vm2, %v2278_v11, %v2279_v12 }
 0x206   : > { %2107 = vst.msk [vmem:[#allocation2 + $0x24] sm:$0xf] %vm2097_vm12, %v2008_v26  ;;  %v2159_v26 = vld [vmem:[%s5912_s10 + $0x94] sm:$0xf] }
 0x207   : > { %2675 = vrot.lane.b32.xlu1 %v2584_v22, %s5832_s7  ;;  %v2010_v31 = vpop.permute.xlu0 %2009  ;;  %v2601_v22 = vrot.slane %v2484_v15, 6  ;;  %v2282_v34 = vrot.slane %v2159_v26, 5  ;;  %v2165_v15 = vld [vmem:[%s5912_s10 + $0xac] sm:$0xf] }
 0x208   : > { %2108 = vst.msk [vmem:[#allocation2 + $0x28] sm:$0xf] %vm2097_vm12, %v2010_v31 }
 0x209   : > { %v2012_v36 = vpop.permute.xlu1 %2011  ;;  %2349 = vrot.lane.b32.xlu0 %v2259_v29, %s5831_s17  ;;  %v2603_v28 = vrot.slane %v2601_v22, 4  ;;  %v2602_v31 = vsel %vm6122_vm6, %v2600_v21, %v2601_v22  ;;  %v2300_v22 = vrot.slane %v2165_v15, 5 }
 0x20a   : > { %2109 = vst.msk [vmem:[#allocation2 + $0x2c] sm:$0xf] %vm2097_vm12, %v2012_v36  ;;  %v2160_v36 = vld [vmem:[%s5912_s10 + $0x98] sm:$0xf] }
 0x20b   : > { %2351 = vrot.lane.b32.xlu1 %v2262_v32, %s5831_s17  ;;  %v2014_v42 = vpop.permute.xlu0 %2013  ;;  %v2606_v32 = vrot.slane %v2604_v23, 4  ;;  %v2605_v38 = vsel %vm6122_vm6, %v2603_v28, %v2604_v23  ;;  %v2285_v44 = vrot.slane %v2160_v36, 5  ;;  %v2493_v36 = vld [vmem:[%s5912_s10 + $0xac] sm:$0xf] }
 0x20c   : > { %2110 = vst.msk [vmem:[#allocation2 + $0x30] sm:$0xf] %vm2097_vm12, %v2014_v42 }
 0x20d   : > { %v2016_v47 = vpop.permute.xlu1 %2015  ;;  %2353 = vrot.lane.b32.xlu0 %v2265_v39, %s5831_s17  ;;  %v2281_v39 = vrot.slane %v2279_v12, 4  ;;  %v2608_v42 = vsel %vm6122_vm6, %v2606_v32, %v2607_v33  ;;  %v2294_v12 = vrot.slane %v2163_v5, 5 }
 0x20e   : > { %2111 = vst.msk [vmem:[#allocation2 + $0x34] sm:$0xf] %vm2097_vm12, %v2016_v47  ;;  %v2162_v47 = vld [vmem:[%s5912_s10 + $0xa0] sm:$0xf] }
 0x20f   : > { %2355 = vrot.lane.b32.xlu1 %v2268_v43, %s5831_s17  ;;  %v2018_v53 = vpop.permute.xlu0 %2017  ;;  %v2284_v43 = vrot.slane %v2282_v34, 4  ;;  %v2283_v49 = vsel %vm5914_vm2, %v2281_v39, %v2282_v34  ;;  %v2291_v56 = vrot.slane %v2162_v47, 5  ;;  %v2167_v47 = vld [vmem:[%s5912_s10 + $0xb4] sm:$0xf] }
 0x210   : > { %2112 = vst.msk [vmem:[#allocation2 + $0x38] sm:$0xf] %vm2097_vm12, %v2018_v53 }
 0x211   : > { %v2020_v59 = vpop.permute.xlu1 %2019  ;;  %2677 = vrot.lane.b32.xlu0 %v2587_v50, %s5832_s7  ;;  %v2287_v50 = vrot.slane %v2285_v44, 4  ;;  %v2286_v53 = vsel %vm5914_vm2, %v2284_v43, %v2285_v44  ;;  %v2628_v44 = vrot.slane %v2493_v36, 6  ;;  %v3503_v36 = vld [vmem:[%s7258_s11] sm:$0xff] }
 0x212   : > { %2113 = vst.msk [vmem:[#allocation2 + $0x3c] sm:$0xf] %vm2097_vm12, %v2020_v59  ;;  %v2488_v59 = vld [vmem:[%s5912_s10 + $0x98] sm:$0xf] }
 0x213   : > { %2679 = vrot.lane.b32.xlu1 %v2590_v54, %s5832_s7  ;;  %v2022_v1 = vpop.permute.xlu0 %2021  ;;  %v2290_v54 = vrot.slane %v2288_v45, 4  ;;  %v2289_v61 = vsel %vm5914_vm2, %v2287_v50, %v2288_v45  ;;  %v2613_v3 = vrot.slane %v2488_v59, 6  ;;  %v2169_v59 = vld [vmem:[%s5912_s10 + $0xbc] sm:$0xf] }
 0x214   : > { %2114 = vst.msk [vmem:[#allocation2 + $0x40] sm:$0xf] %vm2097_vm12, %v2022_v1 }
 0x215   : > { %v2024_v4 = vpop.permute.xlu1 %2023  ;;  %2681 = vrot.lane.b32.xlu0 %v2593_v62, %s5832_s7  ;;  %v2609_v62 = vrot.slane %v2607_v33, 4  ;;  %v2292_v1 = vsel %vm5914_vm2, %v2290_v54, %v2291_v56  ;;  %v2622_v33 = vrot.slane %v2491_v25, 6 }
 0x216   : > { %2115 = vst.msk [vmem:[#allocation2 + $0x44] sm:$0xf] %vm2097_vm12, %v2024_v4  ;;  %v2490_v4 = vld [vmem:[%s5912_s10 + $0xa0] sm:$0xf] }
 0x217   : > { %2683 = vrot.lane.b32.xlu1 %v2596_v2, %s5832_s7  ;;  %v2026_v9 = vpop.permute.xlu0 %2025  ;;  %v2612_v2 = vrot.slane %v2610_v57, 4  ;;  %v2611_v6 = vsel %vm6122_vm6, %v2609_v62, %v2610_v57  ;;  %v2619_v11 = vrot.slane %v2490_v4, 6  ;;  %v2495_v4 = vld [vmem:[%s5912_s10 + $0xb4] sm:$0xf] }
 0x218   : > { %2116 = vst.msk [vmem:[#allocation2 + $0x48] sm:$0xf] %vm2097_vm12, %v2026_v9 }
 0x219   : > { %v2028_v14 = vpop.permute.xlu1 %2027  ;;  %2357 = vrot.lane.b32.xlu0 %v2271_v7, %s5831_s17  ;;  %v2615_v7 = vrot.slane %v2613_v3, 4  ;;  %v2614_v9 = vsel %vm6122_vm6, %v2612_v2, %v2613_v3  ;;  %v2312_v3 = vrot.slane %v2169_v59, 5 }
 0x21a   : > { %2117 = vst.msk [vmem:[#allocation2 + $0x4c] sm:$0xf] %vm2097_vm12, %v2028_v14  ;;  %v2164_v14 = vld [vmem:[%s5912_s10 + $0xa8] sm:$0xf] }
 0x21b   : > { %2359 = vrot.lane.b32.xlu1 %v2274_v10, %s5831_s17  ;;  %v2030_v19 = vpop.permute.xlu0 %2029  ;;  %v2618_v10 = vrot.slane %v2616_v40, 4  ;;  %v2617_v16 = vsel %vm6122_vm6, %v2615_v7, %v2616_v40  ;;  %v2297_v21 = vrot.slane %v2164_v14, 5  ;;  %v2497_v14 = vld [vmem:[%s5912_s10 + $0xbc] sm:$0xf] }
 0x21c   : > { %2118 = vst.msk [vmem:[#allocation2 + $0x50] sm:$0xf] %vm2097_vm12, %v2030_v19 }
 0x21d   : > { %v2032_v24 = vpop.permute.xlu1 %2031  ;;  %2361 = vrot.lane.b32.xlu0 %v2277_v17, %s5831_s17  ;;  %v2293_v17 = vrot.slane %v2291_v56, 4  ;;  %v2620_v19 = vsel %vm6122_vm6, %v2618_v10, %v2619_v11  ;;  %v2306_v56 = vrot.slane %v2167_v47, 5 }
 0x21e   : > { %2119 = vst.msk [vmem:[#allocation2 + $0x54] sm:$0xf] %vm2097_vm12, %v2032_v24  ;;  %v2166_v24 = vld [vmem:[%s5912_s10 + $0xb0] sm:$0xf] }
 0x21f   : > { %2363 = vrot.lane.b32.xlu1 %v2280_v20, %s5831_s17  ;;  %v2034_v29 = vpop.permute.xlu0 %2033  ;;  %v2296_v20 = vrot.slane %v2294_v12, 4  ;;  %v2295_v26 = vsel %vm5914_vm2, %v2293_v17, %v2294_v12  ;;  %v2303_v32 = vrot.slane %v2166_v24, 5 }
 0x220   : > { %2120 = vst.msk [vmem:[#allocation2 + $0x58] sm:$0xf] %vm2097_vm12, %v2034_v29 }
 0x221   : > { %v2036_v35 = vpop.permute.xlu1 %2035  ;;  %2685 = vrot.lane.b32.xlu0 %v2599_v27, %s5832_s7  ;;  %v2299_v27 = vrot.slane %v2297_v21, 4  ;;  %v2298_v29 = vsel %vm5914_vm2, %v2296_v20, %v2297_v21  ;;  %v2640_v21 = vrot.slane %v2497_v14, 6 }
 0x222   : > { %2121 = vst.msk [vmem:[#allocation2 + $0x5c] sm:$0xf] %vm2097_vm12, %v2036_v35  ;;  %v2492_v35 = vld [vmem:[%s5912_s10 + $0xa8] sm:$0xf] }
 0x223   : > { %2687 = vrot.lane.b32.xlu1 %v2602_v31, %s5832_s7  ;;  %v2038_v41 = vpop.permute.xlu0 %2037  ;;  %v2302_v31 = vrot.slane %v2300_v22, 4  ;;  %v2301_v37 = vsel %vm5914_vm2, %v2299_v27, %v2300_v22  ;;  %v2625_v43 = vrot.slane %v2492_v35, 6 }
 0x224   : > { %2122 = vst.msk [vmem:[#allocation2 + $0x60] sm:$0xf] %vm2097_vm12, %v2038_v41 }
 0x225   : > { %v2040_v46 = vpop.permute.xlu1 %2039  ;;  %2689 = vrot.lane.b32.xlu0 %v2605_v38, %s5832_s7  ;;  %v2621_v38 = vrot.slane %v2619_v11, 4  ;;  %v2304_v41 = vsel %vm5914_vm2, %v2302_v31, %v2303_v32  ;;  %v2634_v11 = vrot.slane %v2495_v4, 6 }
 0x226   : > { %2123 = vst.msk [vmem:[#allocation2 + $0x64] sm:$0xf] %vm2097_vm12, %v2040_v46  ;;  %v2494_v46 = vld [vmem:[%s5912_s10 + $0xb0] sm:$0xf] }
 0x227   : > { %2691 = vrot.lane.b32.xlu1 %v2608_v42, %s5832_s7  ;;  %v2042_v51 = vpop.permute.xlu0 %2041  ;;  %v2624_v42 = vrot.slane %v2622_v33, 4  ;;  %v2623_v48 = vsel %vm6122_vm6, %v2621_v38, %v2622_v33  ;;  %v2631_v54 = vrot.slane %v2494_v46, 6  ;;  %v3504_v38 = vld [vmem:[%s7258_s11 + $0x8] sm:$0xff]  ;;  %v3507_v46 = vld [vmem:[%s7258_s11 + $0x20] sm:$0xff] }
 0x228   : > { %2124 = vst.msk [vmem:[#allocation2 + $0x68] sm:$0xf] %vm2097_vm12, %v2042_v51 }
 0x229   : > { %v2044_v58 = vpop.permute.xlu1 %2043  ;;  %2365 = vrot.lane.b32.xlu0 %v2283_v49, %s5831_s17  ;;  %v2627_v49 = vrot.slane %v2625_v43, 4  ;;  %v2626_v51 = vsel %vm6122_vm6, %v2624_v42, %v2625_v43  ;;  %v3505_v42 = vld [vmem:[%s7258_s11 + $0x10] sm:$0xff] }
 0x22a   : > { %2125 = vst.msk [vmem:[#allocation2 + $0x6c] sm:$0xf] %vm2097_vm12, %v2044_v58  ;;  %v2168_v58 = vld [vmem:[%s5912_s10 + $0xb8] sm:$0xf] }
 0x22b   : > { %2367 = vrot.lane.b32.xlu1 %v2286_v53, %s5831_s17  ;;  %v2046_v63 = vpop.permute.xlu0 %2045  ;;  %v2630_v53 = vrot.slane %v2628_v44, 4  ;;  %v2629_v60 = vsel %vm6122_vm6, %v2627_v49, %v2628_v44  ;;  %v2309_v2 = vrot.slane %v2168_v58, 5  ;;  %v3508_v44 = vld [vmem:[%s7258_s11 + $0x28] sm:$0xff]  ;;  %v3511_v58 = vld [vmem:[%s7258_s11 + $0x40] sm:$0xff] }
 0x22c   : > { %2126 = vst.msk [vmem:[#allocation2 + $0x70] sm:$0xf] %vm2097_vm12, %v2046_v63 }
 0x22d   : > { %v2048_v52 = vpop.permute.xlu1 %2047  ;;  %2369 = vrot.lane.b32.xlu0 %v2289_v61, %s5831_s17  ;;  %v2305_v61 = vrot.slane %v2303_v32, 4  ;;  %v2632_v63 = vsel %vm6122_vm6, %v2630_v53, %v2631_v54 }
 0x22e   : > { %2127 = vst.msk [vmem:[#allocation2 + $0x74] sm:$0xf] %vm2097_vm12, %v2048_v52  ;;  %v2170_v52 = vld [vmem:[%s5912_s10 + $0xc0] sm:$0x1] }
 0x22f   : > { %2371 = vrot.lane.b32.xlu1 %v2292_v1, %s5831_s17  ;;  %v2050_v8 = vpop.permute.xlu0 %2049  ;;  %v2308_v1 = vrot.slane %v2306_v56, 4  ;;  %v2307_v5 = vsel %vm5914_vm2, %v2305_v61, %v2306_v56  ;;  %v2315_v10 = vrot.slane %v2170_v52, 5  ;;  %v3515_v52 = vld [vmem:[%s7258_s11 + $0x60] sm:$0xff] }
 0x230   : > { %2128 = vst.msk [vmem:[#allocation2 + $0x78] sm:$0xf] %vm2097_vm12, %v2050_v8 }
 0x231   : > { %v2052_v13 = vpop.permute.xlu1 %2051  ;;  %2693 = vrot.lane.b32.xlu0 %v2611_v6, %s5832_s7  ;;  %v2311_v6 = vrot.slane %v2309_v2, 4  ;;  %v2310_v8 = vsel %vm5914_vm2, %v2308_v1, %v2309_v2  ;;  %v3516_v2 = vld [vmem:[%s7258_s11 + $0x68] sm:$0xff] }
 0x232   : > { %2129 = vst.msk [vmem:[#allocation2 + $0x7c] sm:$0xf] %vm2097_vm12, %v2052_v13  ;;  %v2496_v13 = vld [vmem:[%s5912_s10 + $0xb8] sm:$0xf] }
 0x233   : > { %2695 = vrot.lane.b32.xlu1 %v2614_v9, %s5832_s7  ;;  %v2054_v18 = vpop.permute.xlu0 %2053  ;;  %v2314_v9 = vrot.slane %v2312_v3, 4  ;;  %v2313_v15 = vsel %vm5914_vm2, %v2311_v6, %v2312_v3  ;;  %v2637_v20 = vrot.slane %v2496_v13, 6  ;;  %v3519_v13 = vld [vmem:[%s7258_s11 + $0x80] sm:$0xff] }
 0x234   : > { %2130 = vst.msk [vmem:[#allocation2 + $0x80] sm:$0xf] %vm2097_vm12, %v2054_v18 }
 0x235   : > { %v2056_v23 = vpop.permute.xlu1 %2055  ;;  %2697 = vrot.lane.b32.xlu0 %v2617_v16, %s5832_s7  ;;  %v2633_v16 = vrot.slane %v2631_v54, 4  ;;  %v2316_v18 = vsel %vm5914_vm2, %v2314_v9, %v2315_v10  ;;  %v2639_v25 = vrot.slane %v2637_v20, 4  ;;  %v3512_v54 = vld [vmem:[%s7258_s11 + $0x48] sm:$0xff] }
 0x236   : > { %2131 = vst.msk [vmem:[#allocation2 + $0x84] sm:$0xf] %vm2097_vm12, %v2056_v23  ;;  %v2498_v23 = vld [vmem:[%s5912_s10 + $0xc0] sm:$0x3]  ;;  %v3520_v10 = vld [vmem:[%s7258_s11 + $0x88] sm:$0xff] }
 0x237   : > { %2699 = vrot.lane.b32.xlu1 %v2620_v19, %s5832_s7  ;;  %v2058_v28 = vpop.permute.xlu0 %2057  ;;  %v2636_v19 = vrot.slane %v2634_v11, 4  ;;  %v2635_v24 = vsel %vm6122_vm6, %v2633_v16, %v2634_v11  ;;  %v2641_v32 = vsel %vm6122_vm6, %v2639_v25, %v2640_v21  ;;  %v3526_v25 = vld [vmem:[%s7258_s11 + $0xb8] sm:$0xff] }
 0x238   : > { %2132 = vst.msk [vmem:[#allocation2 + $0x88] sm:$0xf] %vm2097_vm12, %v2058_v28  ;;  %v2642_v28 = vrot.slane %v2640_v21, 4 }
 0x239   : > { %v2060_v34 = vpop.permute.xlu1 %2059  ;;  %2373 = vrot.lane.b32.xlu0 %v2295_v26, %s5831_s17  ;;  %v2638_v27 = vsel %vm6122_vm6, %v2636_v19, %v2637_v20  ;;  %v3524_v20 = vld [vmem:[%s7258_s11 + $0xa8] sm:$0xff] }
 0x23a   : > { %2133 = vst.msk [vmem:[#allocation2 + $0x8c] sm:$0xf] %vm2097_vm12, %v2060_v34  ;;  %vm4545_vm12 = vcmask 388416  }
 0x23b   : > { %2375 = vrot.lane.b32.xlu1 %v2298_v29, %s5831_s17  ;;  %v2318_v39 = vpop.permute.xlu0 %2317  ;;  %v2643_v29 = vrot.slane %v2498_v23, 6 }
 0x23c   : > { %2426 = vst.msk [vmem:[#allocation2] sm:$0xf] %vm2425_vm13, %v2318_v39 }
 0x23d   : > { %v2320_v45 = vpop.permute.xlu1 %2319  ;;  %2377 = vrot.lane.b32.xlu0 %v2301_v37, %s5831_s17  ;;  %v2644_v34 = vsel %vm6122_vm6, %v2642_v28, %v2643_v29  ;;  %v3528_v29 = vld [vmem:[%s7258_s11 + $0xc8] sm:$0xff]  ;;  %vm3932_vm6 = vcmask 60417  }
 0x23e   : > { %2427 = vst.msk [vmem:[#allocation2 + $0x4] sm:$0xf] %vm2425_vm13, %v2320_v45 }
 0x23f   : > { %2379 = vrot.lane.b32.xlu1 %v2304_v41, %s5831_s17  ;;  %v2322_v50 = vpop.permute.xlu0 %2321 }
 0x240   : > { %2428 = vst.msk [vmem:[#allocation2 + $0x8] sm:$0xf] %vm2425_vm13, %v2322_v50 }
 0x241   : > { %v2324_v57 = vpop.permute.xlu1 %2323  ;;  %2701 = vrot.lane.b32.xlu0 %v2623_v48, %s5832_s7  ;;  %v3510_v48 = vld [vmem:[%s7258_s11 + $0x38] sm:$0xff] }
 0x242   : > { %2429 = vst.msk [vmem:[#allocation2 + $0xc] sm:$0xf] %vm2425_vm13, %v2324_v57 }
 0x243   : > { %2703 = vrot.lane.b32.xlu1 %v2626_v51, %s5832_s7  ;;  %v2326_v62 = vpop.permute.xlu0 %2325  ;;  %v3509_v51 = vld [vmem:[%s7258_s11 + $0x30] sm:$0xff] }
 0x244   : > { %2430 = vst.msk [vmem:[#allocation2 + $0x10] sm:$0xf] %vm2425_vm13, %v2326_v62 }
 0x245   : > { %v2328_v40 = vpop.permute.xlu1 %2327  ;;  %2705 = vrot.lane.b32.xlu0 %v2629_v60, %s5832_s7  ;;  %v3514_v60 = vld [vmem:[%s7258_s11 + $0x58] sm:$0xff] }
 0x246   : > { %2431 = vst.msk [vmem:[#allocation2 + $0x14] sm:$0xf] %vm2425_vm13, %v2328_v40 }
 0x247   : > { %2707 = vrot.lane.b32.xlu1 %v2632_v63, %s5832_s7  ;;  %v2330_v7 = vpop.permute.xlu0 %2329  ;;  %v3513_v63 = vld [vmem:[%s7258_s11 + $0x50] sm:$0xff] }
 0x248   : > { %2432 = vst.msk [vmem:[#allocation2 + $0x18] sm:$0xf] %vm2425_vm13, %v2330_v7 }
 0x249   : > { %v2332_v12 = vpop.permute.xlu1 %2331  ;;  %2381 = vrot.lane.b32.xlu0 %v2307_v5, %s5831_s17  ;;  %v3518_v5 = vld [vmem:[%s7258_s11 + $0x78] sm:$0xff] }
 0x24a   : > { %2433 = vst.msk [vmem:[#allocation2 + $0x1c] sm:$0xf] %vm2425_vm13, %v2332_v12 }
 0x24b   : > { %2383 = vrot.lane.b32.xlu1 %v2310_v8, %s5831_s17  ;;  %v2334_v17 = vpop.permute.xlu0 %2333  ;;  %v3517_v8 = vld [vmem:[%s7258_s11 + $0x70] sm:$0xff] }
 0x24c   : > { %2434 = vst.msk [vmem:[#allocation2 + $0x20] sm:$0xf] %vm2425_vm13, %v2334_v17  ;;  %v3521_v17 = vld [vmem:[%s7258_s11 + $0x90] sm:$0xff] }
 0x24d   : > { %v2336_v22 = vpop.permute.xlu1 %2335  ;;  %2385 = vrot.lane.b32.xlu0 %v2313_v15, %s5831_s17  ;;  %v3522_v15 = vld [vmem:[%s7258_s11 + $0x98] sm:$0xff] }
 0x24e   : > { %2435 = vst.msk [vmem:[#allocation2 + $0x24] sm:$0xf] %vm2425_vm13, %v2336_v22  ;;  %v3523_v22 = vld [vmem:[%s7258_s11 + $0xa0] sm:$0xff] }
 0x24f   : > { %2387 = vrot.lane.b32.xlu1 %v2316_v18, %s5831_s17  ;;  %v2338_v26 = vpop.permute.xlu0 %2337 }
 0x250   : > { %2436 = vst.msk [vmem:[#allocation2 + $0x28] sm:$0xf] %vm2425_vm13, %v2338_v26 }
 0x251   : > { %v2340_v31 = vpop.permute.xlu1 %2339  ;;  %2709 = vrot.lane.b32.xlu0 %v2635_v24, %s5832_s7 }
 0x252   : > { %2437 = vst.msk [vmem:[#allocation2 + $0x2c] sm:$0xf] %vm2425_vm13, %v2340_v31 }
 0x253   : > { %2711 = vrot.lane.b32.xlu1 %v2638_v27, %s5832_s7  ;;  %v2342_v33 = vpop.permute.xlu0 %2341  ;;  %v3525_v27 = vld [vmem:[%s7258_s11 + $0xb0] sm:$0xff] }
 0x254   : > { %2438 = vst.msk [vmem:[#allocation2 + $0x30] sm:$0xf] %vm2425_vm13, %v2342_v33 }
 0x255   : > { %v2344_v35 = vpop.permute.xlu1 %2343  ;;  %2713 = vrot.lane.b32.xlu0 %v2641_v32, %s5832_s7  ;;  %v3527_v32 = vld [vmem:[%s7258_s11 + $0xc0] sm:$0xff] }
 0x256   : > { %2439 = vst.msk [vmem:[#allocation2 + $0x34] sm:$0xf] %vm2425_vm13, %v2344_v35 }
 0x257   : > { %2715 = vrot.lane.b32.xlu1 %v2644_v34, %s5832_s7  ;;  %v2346_v37 = vpop.permute.xlu0 %2345  ;;  %v3530_v34 = vld [vmem:[%s7258_s11 + $0xd8] sm:$0xff] }
 0x258   : > { %2440 = vst.msk [vmem:[#allocation2 + $0x38] sm:$0xf] %vm2425_vm13, %v2346_v37 }
 0x259   : > { %v2646_v39 = vpop.permute.xlu1 %2645  ;;  %3541 = vperm.xlu0 %5672, %v3503_v36   ;;  %v3529_v36 = vld [vmem:[%s7258_s11 + $0xd0] sm:$0xff] }
 0x25a   : > { %2754 = vst.msk [vmem:[#allocation2] sm:$0xf] %vm2753_vm14, %v2646_v39  ;;  %v3532_v39 = vld [vmem:[%s7258_s11 + $0xe8] sm:$0xff] }
 0x25b   : > { %v2648_v41 = vpop.permute.xlu0 %2647  ;;  %3546 = vperm.xlu1 %5673, %v3504_v38  }
 0x25c   : > { %2755 = vst.msk [vmem:[#allocation2 + $0x4] sm:$0xf] %vm2753_vm14, %v2648_v41  ;;  %v3531_v41 = vld [vmem:[%s7258_s11 + $0xe0] sm:$0xff] }
 0x25d   : > { %v2650_v43 = vpop.permute.xlu1 %2649  ;;  %3556 = vperm.xlu0 %5672, %v3506_v55  }
 0x25e   : > { %2756 = vst.msk [vmem:[#allocation2 + $0x8] sm:$0xf] %vm2753_vm14, %v2650_v43 }
 0x25f   : > { %v2652_v45 = vpop.permute.xlu0 %2651  ;;  %3551 = vperm.xlu1 %5673, %v3505_v42  }
 0x260   : > { %2757 = vst.msk [vmem:[#allocation2 + $0xc] sm:$0xf] %vm2753_vm14, %v2652_v45 }
 0x261   : > { %v2654_v47 = vpop.permute.xlu1 %2653  ;;  %3566 = vperm.xlu0 %5672, %v3508_v44   ;;  %v3534_v44 = vld [vmem:[%s7258_s11 + $0xf8] sm:$0xff] }
 0x262   : > { %2758 = vst.msk [vmem:[#allocation2 + $0x10] sm:$0xf] %vm2753_vm14, %v2654_v47 }
 0x263   : > { %v2656_v49 = vpop.permute.xlu0 %2655  ;;  %v5677_v50 = vld [vmem:[#allocation2] sm:$0xff]   ;;  %3561 = vperm.xlu1 %5673, %v3507_v46   ;;  %v3533_v46 = vld [vmem:[%s7258_s11 + $0xf0] sm:$0xff] }
 0x264   : > { %2759 = vst.msk [vmem:[#allocation2 + $0x14] sm:$0xf] %vm2753_vm14, %v2656_v49  ;;  %5542 = vmatprep.mubr.msk.bf16.mxu0 %vm2943_vm15, %v5677_v50  ;;  %v3535_v50 = vld [vmem:[%s7258_s11 + $0x100] sm:$0xff] }
 0x265   : > { %v2658_v53 = vpop.permute.xlu1 %2657  ;;  %3576 = vperm.xlu0 %5672, %v3510_v48   ;;  %v3536_v48 = vld [vmem:[%s7258_s11 + $0x108] sm:$0xff] }
 0x266   : > { %2760 = vst.msk [vmem:[#allocation2 + $0x18] sm:$0xf] %vm2753_vm14, %v2658_v53  ;;  %v3538_v53 = vld [vmem:[%s7258_s11 + $0x118] sm:$0xff] }
 0x267   : > { %v2660_v56 = vpop.permute.xlu0 %2659  ;;  %v5678_v57 = vld [vmem:[#allocation2 + $0x8] sm:$0xff]   ;;  %3571 = vperm.xlu1 %5673, %v3509_v51  }
 0x268   : > { %2761 = vst.msk [vmem:[#allocation2 + $0x1c] sm:$0xf] %vm2753_vm14, %v2660_v56  ;;  %5543 = vmatmul.mubr.msk.bf16.vlgmr.msra.gmra.mxu0 %vm2943_vm15, %v5678_v57  ;;  %v3537_v56 = vld [vmem:[%s7258_s11 + $0x110] sm:$0xff] }
 0x269   : > { %v2662_v59 = vpop.permute.xlu1 %2661  ;;  %3586 = vperm.xlu0 %5672, %v3512_v54  }
 0x26a   : > { %2762 = vst.msk [vmem:[#allocation2 + $0x20] sm:$0xf] %vm2753_vm14, %v2662_v59 }
 0x26b   : > { %v2664_v61 = vpop.permute.xlu0 %2663  ;;  %v5679_v62 = vld [vmem:[#allocation2 + $0x10] sm:$0xff]   ;;  %3581 = vperm.xlu1 %5673, %v3511_v58  }
 0x26c   : > { %2763 = vst.msk [vmem:[#allocation2 + $0x24] sm:$0xf] %vm2753_vm14, %v2664_v61  ;;  %5546 = vmatprep.mubr.msk.bf16.mxu0 %vm2943_vm15, %v5679_v62 }
 0x26d   : > { %v2666_v1 = vpop.permute.xlu1 %2665  ;;  %3596 = vperm.xlu0 %5672, %v3514_v60  }
 0x26e   : > { %2764 = vst.msk [vmem:[#allocation2 + $0x28] sm:$0xf] %vm2753_vm14, %v2666_v1 }
 0x26f   : > { %v2668_v3 = vpop.permute.xlu0 %2667  ;;  %v5680_v40 = vld [vmem:[#allocation2 + $0x18] sm:$0xff]   ;;  %3591 = vperm.xlu1 %5673, %v3513_v63  }
 0x270   : > { %2765 = vst.msk [vmem:[#allocation2 + $0x2c] sm:$0xf] %vm2753_vm14, %v2668_v3  ;;  %5547 = vmatmul.mubr.msk.bf16.gmra.mxu0 %vm2943_vm15, %v5680_v40 }
 0x271   : > { %v2348_v4 = vpop.permute.xlu1 %2347  ;;  %3606 = vperm.xlu0 %5672, %v3516_v2  }
 0x272   : > { %2441 = vst.msk [vmem:[#allocation2 + $0x3c] sm:$0xf] %vm2425_vm13, %v2348_v4 }
 0x273   : > { %v2670_v6 = vpop.permute.xlu0 %2669  ;;  %v5681_v7 = vld [vmem:[#allocation2 + $0x20] sm:$0xff]   ;;  %3601 = vperm.xlu1 %5673, %v3515_v52  }
 0x274   : > { %2766 = vst.msk [vmem:[#allocation2 + $0x30] sm:$0xf] %vm2753_vm14, %v2670_v6  ;;  %5550 = vmatprep.mubr.msk.bf16.mxu0 %vm2943_vm15, %v5681_v7 }
 0x275   : > { %v2672_v9 = vpop.permute.xlu1 %2671  ;;  %3616 = vperm.xlu0 %5672, %v3518_v5  }
 0x276   : > { %2767 = vst.msk [vmem:[#allocation2 + $0x34] sm:$0xf] %vm2753_vm14, %v2672_v9 }
 0x277   : > { %v2674_v11 = vpop.permute.xlu0 %2673  ;;  %v5682_v12 = vld [vmem:[#allocation2 + $0x28] sm:$0xff]   ;;  %3611 = vperm.xlu1 %5673, %v3517_v8  }
 0x278   : > { %2768 = vst.msk [vmem:[#allocation2 + $0x38] sm:$0xf] %vm2753_vm14, %v2674_v11  ;;  %5551 = vmatmul.mubr.msk.bf16.gmra.mxu0 %vm2943_vm15, %v5682_v12 }
 0x279   : > { %v2676_v14 = vpop.permute.xlu1 %2675  ;;  %3626 = vperm.xlu0 %5672, %v3520_v10  }
 0x27a   : > { %2769 = vst.msk [vmem:[#allocation2 + $0x3c] sm:$0xf] %vm2753_vm14, %v2676_v14 }
 0x27b   : > { %v2350_v16 = vpop.permute.xlu0 %2349  ;;  %3621 = vperm.xlu1 %5673, %v3519_v13  }
 0x27c   : > { %2442 = vst.msk [vmem:[#allocation2 + $0x40] sm:$0xf] %vm2425_vm13, %v2350_v16 }
 0x27d   : > { %v2352_v18 = vpop.permute.xlu1 %2351  ;;  %v5683_v19 = vld [vmem:[#allocation2 + $0x30] sm:$0xff]   ;;  %3636 = vperm.xlu0 %5672, %v3522_v15  }
 0x27e   : > { %2443 = vst.msk [vmem:[#allocation2 + $0x44] sm:$0xf] %vm2425_vm13, %v2352_v18  ;;  %5554 = vmatprep.mubr.msk.bf16.mxu0 %vm2943_vm15, %v5683_v19 }
 0x27f   : > { %v2354_v21 = vpop.permute.xlu0 %2353  ;;  %3631 = vperm.xlu1 %5673, %v3521_v17  }
 0x280   : > { %2444 = vst.msk [vmem:[#allocation2 + $0x48] sm:$0xf] %vm2425_vm13, %v2354_v21 }
 0x281   : > { %v2356_v23 = vpop.permute.xlu1 %2355  ;;  %v5684_v24 = vld [vmem:[#allocation2 + $0x38] sm:$0xff]   ;;  %3646 = vperm.xlu0 %5672, %v3524_v20  }
 0x282   : > { %2445 = vst.msk [vmem:[#allocation2 + $0x4c] sm:$0xf] %vm2425_vm13, %v2356_v23  ;;  %5555 = vmatmul.mubr.msk.bf16.gmra.mxu0 %vm2943_vm15, %v5684_v24  ;;  %v7381_v23 = vld [vmem:[%s8841_s2] ss:$0 sm:$0xff] }
 0x283   : > { %v2678_v26 = vpop.permute.xlu0 %2677  ;;  %3641 = vperm.xlu1 %5673, %v3523_v22  }
 0x284   : > { %2770 = vst.msk [vmem:[#allocation2 + $0x40] sm:$0xf] %vm2753_vm14, %v2678_v26 }
 0x285   : > { %v2680_v28 = vpop.permute.xlu1 %2679  ;;  %3656 = vperm.xlu0 %5672, %v3526_v25  }
 0x286   : > { %2771 = vst.msk [vmem:[#allocation2 + $0x44] sm:$0xf] %vm2753_vm14, %v2680_v28 }
 0x287   : > { %v2682_v31 = vpop.permute.xlu0 %2681  ;;  %3651 = vperm.xlu1 %5673, %v3525_v27  }
 0x288   : > { %2772 = vst.msk [vmem:[#allocation2 + $0x48] sm:$0xf] %vm2753_vm14, %v2682_v31 }
 0x289   : > { %v2684_v33 = vpop.permute.xlu1 %2683  ;;  %3666 = vperm.xlu0 %5672, %v3528_v29  }
 0x28a   : > { %2773 = vst.msk [vmem:[#allocation2 + $0x4c] sm:$0xf] %vm2753_vm14, %v2684_v33 }
 0x28b   : > { %v2358_v35 = vpop.permute.xlu0 %2357  ;;  %3661 = vperm.xlu1 %5673, %v3527_v32  }
 0x28c   : > { %2446 = vst.msk [vmem:[#allocation2 + $0x50] sm:$0xf] %vm2425_vm13, %v2358_v35 }
 0x28d   : > { %v2360_v37 = vpop.permute.xlu1 %2359  ;;  %v5685_v38 = vld [vmem:[#allocation2 + $0x40] sm:$0xff]   ;;  %3676 = vperm.xlu0 %5672, %v3530_v34  }
 0x28e   : > { %2447 = vst.msk [vmem:[#allocation2 + $0x54] sm:$0xf] %vm2425_vm13, %v2360_v37  ;;  %5558 = vmatprep.mubr.msk.bf16.mxu0 %vm2943_vm15, %v5685_v38 }
 0x28f   : > { %v2362_v55 = vpop.permute.xlu0 %2361  ;;  %3671 = vperm.xlu1 %5673, %v3529_v36  }
 0x290   : > { %2448 = vst.msk [vmem:[#allocation2 + $0x58] sm:$0xf] %vm2425_vm13, %v2362_v55 }
 0x291   : > { %v2364_v42 = vpop.permute.xlu1 %2363  ;;  %v5686_v43 = vld [vmem:[#allocation2 + $0x48] sm:$0xff]   ;;  %3686 = vperm.xlu0 %5672, %v3532_v39  }
 0x292   : > { %2449 = vst.msk [vmem:[#allocation2 + $0x5c] sm:$0xf] %vm2425_vm13, %v2364_v42  ;;  %5559 = vmatmul.mubr.msk.bf16.gmra.mxu0 %vm2943_vm15, %v5686_v43 }
 0x293   : > { %v2686_v45 = vpop.permute.xlu0 %2685  ;;  %3681 = vperm.xlu1 %5673, %v3531_v41  }
 0x294   : > { %2774 = vst.msk [vmem:[#allocation2 + $0x50] sm:$0xf] %vm2753_vm14, %v2686_v45 }
 0x295   : > { %v2688_v47 = vpop.permute.xlu1 %2687  ;;  %3696 = vperm.xlu0 %5672, %v3534_v44  }
 0x296   : > { %2775 = vst.msk [vmem:[#allocation2 + $0x54] sm:$0xf] %vm2753_vm14, %v2688_v47 }
 0x297   : > { %v2690_v49 = vpop.permute.xlu0 %2689  ;;  %3691 = vperm.xlu1 %5673, %v3533_v46  }
 0x298   : > { %2776 = vst.msk [vmem:[#allocation2 + $0x58] sm:$0xf] %vm2753_vm14, %v2690_v49 }
 0x299   : > { %v2692_v51 = vpop.permute.xlu1 %2691  ;;  %3706 = vperm.xlu0 %5672, %v3536_v48  }
 0x29a   : > { %2777 = vst.msk [vmem:[#allocation2 + $0x5c] sm:$0xf] %vm2753_vm14, %v2692_v51 }
 0x29b   : > { %v2366_v54 = vpop.permute.xlu0 %2365  ;;  %3701 = vperm.xlu1 %5673, %v3535_v50  }
 0x29c   : > { %2450 = vst.msk [vmem:[#allocation2 + $0x60] sm:$0xf] %vm2425_vm13, %v2366_v54 }
 0x29d   : > { %v2368_v57 = vpop.permute.xlu1 %2367  ;;  %v5687_v58 = vld [vmem:[#allocation2 + $0x50] sm:$0xff]   ;;  %3716 = vperm.xlu0 %5672, %v3538_v53  }
 0x29e   : > { %2451 = vst.msk [vmem:[#allocation2 + $0x64] sm:$0xf] %vm2425_vm13, %v2368_v57  ;;  %5562 = vmatprep.mubr.msk.bf16.mxu0 %vm2943_vm15, %v5687_v58 }
 0x29f   : > { %v2370_v59 = vpop.permute.xlu0 %2369  ;;  %3711 = vperm.xlu1 %5673, %v3537_v56  }
 0x2a0   : > { %2452 = vst.msk [vmem:[#allocation2 + $0x68] sm:$0xf] %vm2425_vm13, %v2370_v59 }
 0x2a1   : > { %v2372_v60 = vpop.permute.xlu1 %2371  ;;  %v5688_v61 = vld [vmem:[#allocation2 + $0x58] sm:$0xff]  }
 0x2a2   : > { %2453 = vst.msk [vmem:[#allocation2 + $0x6c] sm:$0xf] %vm2425_vm13, %v2372_v60  ;;  %5563 = vmatmul.mubr.msk.bf16.gmra.mxu0 %vm2943_vm15, %v5688_v61 }
 0x2a3   : > { %v2694_v62 = vpop.permute.xlu0 %2693 }
 0x2a4   : > { %2778 = vst.msk [vmem:[#allocation2 + $0x60] sm:$0xf] %vm2753_vm14, %v2694_v62 }
 0x2a5   : > { %v2696_v63 = vpop.permute.xlu1 %2695 }
 0x2a6   : > { %2779 = vst.msk [vmem:[#allocation2 + $0x64] sm:$0xf] %vm2753_vm14, %v2696_v63 }
 0x2a7   : > { %v2698_v1 = vpop.permute.xlu0 %2697 }
 0x2a8   : > { %2780 = vst.msk [vmem:[#allocation2 + $0x68] sm:$0xf] %vm2753_vm14, %v2698_v1 }
 0x2a9   : > { %v2700_v2 = vpop.permute.xlu1 %2699 }
 0x2aa   : > { %2781 = vst.msk [vmem:[#allocation2 + $0x6c] sm:$0xf] %vm2753_vm14, %v2700_v2 }
 0x2ab   : > { %v2374_v3 = vpop.permute.xlu0 %2373 }
 0x2ac   : > { %2454 = vst.msk [vmem:[#allocation2 + $0x70] sm:$0xf] %vm2425_vm13, %v2374_v3 }
 0x2ad   : > { %v2376_v40 = vpop.permute.xlu1 %2375  ;;  %v5689_v52 = vld [vmem:[#allocation2 + $0x60] sm:$0xff]  }
 0x2ae   : > { %2455 = vst.msk [vmem:[#allocation2 + $0x74] sm:$0xf] %vm2425_vm13, %v2376_v40  ;;  %5566 = vmatprep.mubr.msk.bf16.mxu0 %vm2943_vm15, %v5689_v52 }
 0x2af   : > { %v2378_v4 = vpop.permute.xlu0 %2377 }
 0x2b0   : > { %2456 = vst.msk [vmem:[#allocation2 + $0x78] sm:$0xf] %vm2425_vm13, %v2378_v4 }
 0x2b1   : > { %v2380_v5 = vpop.permute.xlu1 %2379  ;;  %v5690_v6 = vld [vmem:[#allocation2 + $0x68] sm:$0xff]  }
 0x2b2   : > { %2457 = vst.msk [vmem:[#allocation2 + $0x7c] sm:$0xf] %vm2425_vm13, %v2380_v5  ;;  %5567 = vmatmul.mubr.msk.bf16.gmra.mxu0 %vm2943_vm15, %v5690_v6 }
 0x2b3   : > { %v2702_v7 = vpop.permute.xlu0 %2701 }
 0x2b4   : > { %2782 = vst.msk [vmem:[#allocation2 + $0x70] sm:$0xf] %vm2753_vm14, %v2702_v7 }
 0x2b5   : > { %v2704_v8 = vpop.permute.xlu1 %2703 }
 0x2b6   : > { %2783 = vst.msk [vmem:[#allocation2 + $0x74] sm:$0xf] %vm2753_vm14, %v2704_v8 }
 0x2b7   : > { %v2706_v9 = vpop.permute.xlu0 %2705 }
 0x2b8   : > { %2784 = vst.msk [vmem:[#allocation2 + $0x78] sm:$0xf] %vm2753_vm14, %v2706_v9 }
 0x2b9   : > { %v2708_v10 = vpop.permute.xlu1 %2707 }
 0x2ba   : > { %2785 = vst.msk [vmem:[#allocation2 + $0x7c] sm:$0xf] %vm2753_vm14, %v2708_v10 }
 0x2bb   : > { %v2382_v11 = vpop.permute.xlu0 %2381 }
 0x2bc   : > { %2458 = vst.msk [vmem:[#allocation2 + $0x80] sm:$0xf] %vm2425_vm13, %v2382_v11 }
 0x2bd   : > { %v2384_v12 = vpop.permute.xlu1 %2383  ;;  %v5691_v13 = vld [vmem:[#allocation2 + $0x70] sm:$0xff]  }
 0x2be   : > { %2459 = vst.msk [vmem:[#allocation2 + $0x84] sm:$0xf] %vm2425_vm13, %v2384_v12  ;;  %5570 = vmatprep.mubr.msk.bf16.mxu0 %vm2943_vm15, %v5691_v13 }
 0x2bf   : > { %v2386_v14 = vpop.permute.xlu0 %2385 }
 0x2c0   : > { %2460 = vst.msk [vmem:[#allocation2 + $0x88] sm:$0xf] %vm2425_vm13, %v2386_v14 }
 0x2c1   : > { %v2388_v15 = vpop.permute.xlu1 %2387  ;;  %v5692_v16 = vld [vmem:[#allocation2 + $0x78] sm:$0xff]  }
 0x2c2   : > { %2461 = vst.msk [vmem:[#allocation2 + $0x8c] sm:$0xf] %vm2425_vm13, %v2388_v15  ;;  %5571 = vmatmul.mubr.msk.bf16.gmra.mxu0 %vm2943_vm15, %v5692_v16  ;;  %vm4672_vm13 = vcmask 454016  }
 0x2c3   : > { %v2710_v17 = vpop.permute.xlu0 %2709 }
 0x2c4   : > { %2786 = vst.msk [vmem:[#allocation2 + $0x80] sm:$0xf] %vm2753_vm14, %v2710_v17 }
 0x2c5   : > { %v2712_v18 = vpop.permute.xlu1 %2711 }
 0x2c6   : > { %2787 = vst.msk [vmem:[#allocation2 + $0x84] sm:$0xf] %vm2753_vm14, %v2712_v18 }
 0x2c7   : > { %v2714_v19 = vpop.permute.xlu0 %2713 }
 0x2c8   : > { %2788 = vst.msk [vmem:[#allocation2 + $0x88] sm:$0xf] %vm2753_vm14, %v2714_v19 }
 0x2c9   : > { %v2716_v20 = vpop.permute.xlu1 %2715 }
 0x2ca   : > { %2789 = vst.msk [vmem:[#allocation2 + $0x8c] sm:$0xf] %vm2753_vm14, %v2716_v20  ;;  %vm4769_vm14 = vcmask 519616  }
 0x2cd   : > { %v5693_v21 = vld [vmem:[#allocation2 + $0x80] sm:$0xff]  }
 0x2ce   : > { %5574 = vmatprep.mubr.msk.bf16.mxu0 %vm2943_vm15, %v5693_v21 }
 0x2d1   : > { %v5694_v22 = vld [vmem:[#allocation2 + $0x88] sm:$0xff]  }
 0x2d2   : > { %5575 = vmatmul.mubr.msk.bf16.gmra.mxu0 %vm2943_vm15, %v5694_v22  ;;  %vm4884_vm15 = vcmask 585216  }
 0x2d6   : > { %v7398_v14 = vpop.permute.xlu1 %3546 }
 0x328   : > { %v5544_v24 = vpop.f32.mrf.mxu0 }
 0x329   : > { %v3045_v25 = vadd.f32 %v5544_v24, %v7381_v23 }
 0x32a   : > { %v3036_v26 = vpop.f32.mrf.mxu0 }
 0x32b   : > { %v3217_v27 = vmul.f32 0.044715, %v3045_v25  ;;  %v3037_v28 = vadd.f32 %v7381_v23, %v3036_v26  ;;  %v7389_v57 = vmul.f32 0.5, %v3045_v25 }
 0x32c   : > { %v5545_v29 = vpop.f32.mrf.mxu0 }
 0x32d   : > { %v3253_v31 = vmul.f32 %v3217_v27, %v3045_v25  ;;  %v3215_v32 = vmul.f32 0.044715, %v3037_v28  ;;  %v3048_v33 = vadd.f32 %v5545_v29, %v7381_v23  ;;  %v7393_v2 = vmul.f32 0.5, %v3037_v28 }
 0x32e   : > { %v3039_v34 = vpop.f32.mrf.mxu0 }
 0x32f   : > { %v3289_v35 = vmul.f32 %v3253_v31, %v3045_v25  ;;  %v3251_v36 = vmul.f32 %v3215_v32, %v3037_v28  ;;  %v3218_v37 = vmul.f32 0.044715, %v3048_v33  ;;  %v3040_v38 = vadd.f32 %v7381_v23, %v3039_v34 }
 0x330   : > { %v5548_v39 = vpop.f32.mrf.mxu0  ;;  %v7395_v5 = vmul.f32 0.5, %v3048_v33 }
 0x331   : > { %v3325_v55 = vadd.f32 %v3289_v35, %v3045_v25  ;;  %v3287_v41 = vmul.f32 %v3251_v36, %v3037_v28  ;;  %v3254_v42 = vmul.f32 %v3218_v37, %v3048_v33  ;;  %v3216_v43 = vmul.f32 0.044715, %v3040_v38 }
 0x332   : > { %v3061_v44 = vadd.f32 %v5548_v39, %v7381_v23  ;;  %v3052_v45 = vpop.f32.mrf.mxu0  ;;  %v7401_v22 = vmul.f32 0.5, %v3040_v38 }
 0x333   : > { %v3323_v46 = vadd.f32 %v3287_v41, %v3037_v28  ;;  %v3290_v47 = vmul.f32 %v3254_v42, %v3048_v33  ;;  %v3252_v48 = vmul.f32 %v3216_v43, %v3040_v38  ;;  %v3053_v50 = vadd.f32 %v7381_v23, %v3052_v45  ;;  %v7413_v41 = vpop.permute.xlu1 %3551 }
 0x334   : > { %v3221_v49 = vmul.f32 0.044715, %v3061_v44  ;;  %v5549_v51 = vpop.f32.mrf.mxu0  ;;  %v3361_v53 = vmul.f32 0.7978846, %v3325_v55  ;;  %v7404_v32 = vmul.f32 0.5, %v3061_v44 }
 0x335   : > { %v3359_v54 = vmul.f32 0.7978846, %v3323_v46  ;;  %v3288_v56 = vmul.f32 %v3252_v48, %v3040_v38  ;;  %v3326_v58 = vadd.f32 %v3290_v47, %v3048_v33  ;;  %v3219_v60 = vmul.f32 0.044715, %v3053_v50  ;;  %v7406_v33 = vpop.permute.xlu0 %3541 }
 0x336   : > { %v3257_v59 = vmul.f32 %v3221_v49, %v3061_v44  ;;  %v3064_v61 = vadd.f32 %v5549_v51, %v7381_v23  ;;  %v3055_v62 = vpop.f32.mrf.mxu0  ;;  %v7411_v55 = vmul.f32 0.5, %v3053_v50 }
 0x337   : > { %5712 = vtanh.f32 %v3359_v54  ;;  %v3324_v63 = vadd.f32 %v3288_v56, %v3040_v38  ;;  %v3056_v1 = vadd.f32 %v7381_v23, %v3055_v62  ;;  %v3255_v40 = vmul.f32 %v3219_v60, %v3053_v50 }
 0x338   : > { %v3293_v3 = vmul.f32 %v3257_v59, %v3061_v44  ;;  %v3222_v52 = vmul.f32 0.044715, %v3064_v61  ;;  %v5552_v4 = vpop.f32.mrf.mxu0  ;;  %5714 = vtanh.f32 %v3361_v53  ;;  %v3362_v9 = vmul.f32 0.7978846, %v3326_v58 }
 0x339   : > { %v3360_v6 = vmul.f32 0.7978846, %v3324_v63  ;;  %v3220_v7 = vmul.f32 0.044715, %v3056_v1  ;;  %v3077_v8 = vadd.f32 %v5552_v4, %v7381_v23  ;;  %v3291_v11 = vmul.f32 %v3255_v40, %v3053_v50  ;;  %v7427_v60 = vpop.permute.xlu0 %3556 }
 0x33a   : > { %v3329_v10 = vadd.f32 %v3293_v3, %v3061_v44  ;;  %v3258_v12 = vmul.f32 %v3222_v52, %v3064_v61  ;;  %v3068_v13 = vpop.f32.mrf.mxu0  ;;  %v7416_v51 = vmul.f32 0.5, %v3064_v61  ;;  %v7423_v58 = vmul.f32 0.5, %v3056_v1 }
 0x33b   : > { %5716 = vtanh.f32 %v3360_v6  ;;  %v3256_v15 = vmul.f32 %v3220_v7, %v3056_v1  ;;  %v3225_v16 = vmul.f32 0.044715, %v3077_v8  ;;  %v3069_v17 = vadd.f32 %v7381_v23, %v3068_v13 }
 0x33c   : > { %v3365_v18 = vmul.f32 0.7978846, %v3329_v10  ;;  %v3327_v19 = vadd.f32 %v3291_v11, %v3053_v50  ;;  %v3294_v20 = vmul.f32 %v3258_v12, %v3064_v61  ;;  %v5553_v21 = vpop.f32.mrf.mxu0  ;;  %5718 = vtanh.f32 %v3362_v9  ;;  %v7436_v9 = vpop.permute.xlu1 %3561 }
 0x33d   : > { %v3292_v24 = vmul.f32 %v3256_v15, %v3056_v1  ;;  %v3261_v25 = vmul.f32 %v3225_v16, %v3077_v8  ;;  %v3223_v26 = vmul.f32 0.044715, %v3069_v17  ;;  %v3080_v27 = vadd.f32 %v5553_v21, %v7381_v23 }
 0x33e   : > { %v3363_v28 = vmul.f32 0.7978846, %v3327_v19  ;;  %v3330_v29 = vadd.f32 %v3294_v20, %v3064_v61  ;;  %v3071_v31 = vpop.f32.mrf.mxu0  ;;  %v7425_v59 = vmul.f32 0.5, %v3077_v8  ;;  %v7432_v3 = vmul.f32 0.5, %v3069_v17 }
 0x33f   : > { %v3328_v34 = vadd.f32 %v3292_v24, %v3056_v1  ;;  %v3297_v35 = vmul.f32 %v3261_v25, %v3077_v8  ;;  %v3259_v36 = vmul.f32 %v3223_v26, %v3069_v17  ;;  %v3226_v37 = vmul.f32 0.044715, %v3080_v27 }
 0x340   : > { %5720 = vtanh.f32 %v3363_v28  ;;  %v3366_v38 = vmul.f32 0.7978846, %v3330_v29  ;;  %v7409_v39 = vadd.f32 %v7381_v23, %v3071_v31  ;;  %v7439_v11 = vmul.f32 0.5, %v3080_v27  ;;  %v3567_v29 = vpop.permute.xlu0 %3566 }
 0x341   : > { %5722 = vtanh.f32 %v3365_v18  ;;  %v3364_v42 = vmul.f32 0.7978846, %v3328_v34  ;;  %v3295_v43 = vmul.f32 %v3259_v36, %v3069_v17  ;;  %v3262_v44 = vmul.f32 %v3226_v37, %v3080_v27 }
 0x342   : > { %5724 = vtanh.f32 %v3366_v38  ;;  %v3333_v45 = vadd.f32 %v3297_v35, %v3077_v8  ;;  %v3224_v46 = vmul.f32 0.044715, %v7409_v39  ;;  %v5556_v47 = vpop.f32.mrf.mxu0 }
 0x343   : > { %5726 = vtanh.f32 %v3364_v42  ;;  %v3331_v48 = vadd.f32 %v3295_v43, %v3069_v17  ;;  %v3298_v49 = vmul.f32 %v3262_v44, %v3080_v27  ;;  %v7421_v54 = vadd.f32 %v5556_v47, %v7381_v23  ;;  %v3572_v42 = vpop.permute.xlu1 %3571 }
 0x344   : > { %v5713_v50 = vpop.eup %5712  ;;  %v3260_v53 = vmul.f32 %v3224_v46, %v7409_v39  ;;  %v3084_v56 = vpop.f32.mrf.mxu0  ;;  %v3369_v52 = vmul.f32 0.7978846, %v3333_v45 }
 0x345   : > { %v3367_v62 = vmul.f32 0.7978846, %v3331_v48  ;;  %v3334_v63 = vadd.f32 %v3298_v49, %v3080_v27  ;;  %v7430_v61 = vadd.f32 %v7381_v23, %v3084_v56  ;;  %v5715_v40 = vpop.eup %5714  ;;  %v3229_v6 = vmul.f32 0.044715, %v7421_v54 }
 0x346   : > { %v3296_v4 = vmul.f32 %v3260_v53, %v7409_v39  ;;  %v5557_v7 = vpop.f32.mrf.mxu0  ;;  %v3431_v1 = vadd.f32 1.0, %v5713_v50  ;;  %v3433_v24 = vadd.f32 1.0, %v5715_v40 }
 0x347   : > { %5728 = vtanh.f32 %v3367_v62  ;;  %v3370_v8 = vmul.f32 0.7978846, %v3334_v63  ;;  %v3227_v10 = vmul.f32 0.044715, %v7430_v61  ;;  %v3265_v15 = vmul.f32 %v3229_v6, %v7421_v54 }
 0x348   : > { %v5717_v12 = vpop.eup %5716  ;;  %v3332_v13 = vadd.f32 %v3296_v4, %v7409_v39  ;;  %v7444_v16 = vadd.f32 %v5557_v7, %v7381_v23  ;;  %v3087_v17 = vpop.f32.mrf.mxu0  ;;  %v3467_v18 = vmul.f32 %v3431_v1, %v7393_v2  ;;  %5730 = vtanh.f32 %v3369_v52 }
 0x349   : > { %v3263_v19 = vmul.f32 %v3227_v10, %v7430_v61  ;;  %v7449_v20 = vadd.f32 %v7381_v23, %v3087_v17  ;;  %v3432_v21 = vadd.f32 1.0, %v5717_v12  ;;  %v3301_v26 = vmul.f32 %v3265_v15, %v7421_v54  ;;  %v5719_v28 = vpop.eup %5718  ;;  %v3582_v15 = vpop.permute.xlu1 %3581 }
 0x34a   : > { %v3368_v25 = vmul.f32 0.7978846, %v3332_v13  ;;  %v3230_v27 = vmul.f32 0.044715, %v7444_v16  ;;  %5732 = vtanh.f32 %v3370_v8  ;;  %v3719_v34 = vmul.f32 %v7406_v33, %v3467_v18 }
 0x34b   : > { %v3299_v31 = vmul.f32 %v3263_v19, %v7430_v61  ;;  %v3228_v2 = vmul.f32 0.044715, %v7449_v20  ;;  %v3337_v35 = vadd.f32 %v3301_v26, %v7421_v54  ;;  %v3468_v37 = vmul.f32 %v3432_v21, %v7401_v22 }
 0x34c   : > { %5734 = vtanh.f32 %v3368_v25  ;;  %v3266_v36 = vmul.f32 %v3230_v27, %v7444_v16  ;;  %v7461_v45 = vpack.c.bf16 %v3719_v34, %v3719_v34  ;;  %v3469_v46 = vmul.f32 %v3433_v24, %v7389_v57 }
 0x34d   : > { %v5721_v38 = vpop.eup %5720  ;;  %v3335_v43 = vadd.f32 %v3299_v31, %v7430_v61  ;;  %v3264_v44 = vmul.f32 %v3228_v2, %v7449_v20  ;;  %v3373_v48 = vmul.f32 0.7978846, %v3337_v35  ;;  %v3720_v49 = vmul.f32 %v7398_v14, %v3468_v37  ;;  %v3577_v14 = vpop.permute.xlu0 %3576 }
 0x34e   : > { %v5723_v47 = vpop.eup %5722  ;;  %v3302_v33 = vmul.f32 %v3266_v36, %v7444_v16  ;;  %v3434_v50 = vadd.f32 1.0, %v5719_v28  ;;  %3958 = vrot.lane.b32.xlu1 %v7461_v45, %s5826_s12  ;;  %v3721_v62 = vmul.f32 %v7413_v41, %v3469_v46  ;;  %v3435_v63 = vadd.f32 1.0, %v5721_v38 }
 0x34f   : > { %v5725_v53 = vpop.eup %5724  ;;  %v3371_v56 = vmul.f32 0.7978846, %v3335_v43  ;;  %v3300_v22 = vmul.f32 %v3264_v44, %v7449_v20  ;;  %5736 = vtanh.f32 %v3373_v48  ;;  %v7471_v52 = vpack.c.bf16 %v3720_v49, %v3720_v49 }
 0x350   : > { %v5727_v40 = vpop.eup %5726  ;;  %v3338_v57 = vadd.f32 %v3302_v33, %v7444_v16  ;;  %v3470_v4 = vmul.f32 %v3434_v50, %v7395_v5  ;;  %v7475_v7 = vpack.c.bf16 %v3721_v62, %v3721_v62  ;;  %v3471_v1 = vmul.f32 %v3435_v63, %v7411_v55 }
 0x351   : > { %5738 = vtanh.f32 %v3371_v56  ;;  %v3336_v6 = vadd.f32 %v3300_v22, %v7449_v20  ;;  %3960 = vrot.lane.b32.xlu0 %v7471_v52, %s5826_s12  ;;  %v3436_v12 = vadd.f32 1.0, %v5727_v40  ;;  %v3437_v13 = vadd.f32 1.0, %v5723_v47  ;;  %v3592_v47 = vpop.permute.xlu1 %3591 }
 0x352   : > { %v3374_v8 = vmul.f32 0.7978846, %v3338_v57  ;;  %v5560_v41 = vpop.f32.mrf.mxu0  ;;  %v3722_v10 = vmul.f32 %v7427_v60, %v3470_v4  ;;  %3962 = vrot.lane.b32.xlu1 %v7475_v7, %s5826_s12  ;;  %v3723_v18 = vmul.f32 %v7436_v9, %v3471_v1  ;;  %v3438_v55 = vadd.f32 1.0, %v5725_v53 }
 0x353   : > { %v3372_v17 = vmul.f32 0.7978846, %v3336_v6  ;;  %v7484_v5 = vadd.f32 %v5560_v41, %v7381_v23  ;;  %v3472_v60 = vmul.f32 %v3436_v12, %v7423_v58  ;;  %v3473_v25 = vmul.f32 %v3437_v13, %v7404_v32  ;;  %v3587_v32 = vpop.permute.xlu0 %3586 }
 0x354   : > { %v5729_v19 = vpop.eup %5728  ;;  %5740 = vtanh.f32 %v3374_v8  ;;  %v3100_v21 = vpop.f32.mrf.mxu0  ;;  %v7487_v24 = vpack.c.bf16 %v3722_v10, %v3722_v10  ;;  %v3188_v28 = vmul.f32 0.5, %v7409_v39  ;;  %v7498_v9 = vpack.c.bf16 %v3723_v18, %v3723_v18 }
 0x355   : > { %5742 = vtanh.f32 %v3372_v17  ;;  %v3233_v26 = vmul.f32 0.044715, %v7484_v5  ;;  %v7493_v27 = vadd.f32 %v7381_v23, %v3100_v21  ;;  %v3724_v2 = vmul.f32 %v3567_v29, %v3472_v60  ;;  %v5731_v35 = vpop.eup %5730 }
 0x356   : > { %3964 = vrot.lane.b32.xlu0 %v7487_v24, %s5826_s12  ;;  %v5561_v31 = vpop.f32.mrf.mxu0  ;;  %v3725_v34 = vmul.f32 %v3572_v42, %v3473_v25  ;;  %v3474_v58 = vmul.f32 %v3438_v55, %v7416_v51  ;;  %v7502_v36 = vmul.f32 0.5, %v7421_v54  ;;  %v3191_v44 = vmul.f32 0.5, %v7430_v61  ;;  %3966 = vrot.lane.b32.xlu1 %v7498_v9, %s5826_s12 }
 0x357   : > { %v3269_v37 = vmul.f32 %v3233_v26, %v7484_v5  ;;  %v3231_v38 = vmul.f32 0.044715, %v7493_v27  ;;  %v7507_v39 = vadd.f32 %v5561_v31, %v7381_v23  ;;  %v5733_v43 = vpop.eup %5732  ;;  %v7512_v51 = vpack.c.bf16 %v3724_v2, %v3724_v2  ;;  %v3597_v8 = vpop.permute.xlu0 %3596 }
 0x358   : > { %v3103_v29 = vpop.f32.mrf.mxu0  ;;  %v3726_v42 = vmul.f32 %v3577_v14, %v3474_v58  ;;  %v3439_v46 = vadd.f32 1.0, %v5729_v19  ;;  %v7515_v48 = vmul.f32 0.5, %v7449_v20  ;;  %v7525_v53 = vpack.c.bf16 %v3725_v34, %v3725_v34  ;;  %v3602_v19 = vpop.permute.xlu1 %3601 }
 0x359   : > { %v5735_v54 = vpop.eup %5734  ;;  %v3305_v33 = vmul.f32 %v3269_v37, %v7484_v5  ;;  %v3267_v49 = vmul.f32 %v3231_v38, %v7493_v27  ;;  %v3234_v50 = vmul.f32 0.044715, %v7507_v39  ;;  %v7521_v61 = vadd.f32 %v7381_v23, %v3103_v29 }
 0x35a   : > { %3968 = vrot.lane.b32.xlu0 %v7512_v51, %s5826_s12  ;;  %v3475_v56 = vmul.f32 %v3439_v46, %v7432_v3  ;;  %v3440_v22 = vadd.f32 1.0, %v5735_v54  ;;  %v3441_v40 = vadd.f32 1.0, %v5731_v35  ;;  %3970 = vrot.lane.b32.xlu1 %v7525_v53, %s5826_s12  ;;  %v7534_v4 = vpack.c.bf16 %v3726_v42, %v3726_v42 }
 0x35b   : > { %v3341_v20 = vadd.f32 %v3305_v33, %v7484_v5  ;;  %v3303_v62 = vmul.f32 %v3267_v49, %v7493_v27  ;;  %v3270_v63 = vmul.f32 %v3234_v50, %v7507_v39  ;;  %v3232_v57 = vmul.f32 0.044715, %v7521_v61  ;;  %v3607_v46 = vpop.permute.xlu0 %3606 }
 0x35c   : > { %v3727_v14 = vmul.f32 %v3582_v15, %v3475_v56  ;;  %v3476_v6 = vmul.f32 %v3440_v22, %v3188_v28  ;;  %v5737_v1 = vpop.eup %5736  ;;  %v3477_v12 = vmul.f32 %v3441_v40, %v7425_v59  ;;  %v3442_v15 = vadd.f32 1.0, %v5733_v43 }
 0x35d   : > { %v3377_v3 = vmul.f32 0.7978846, %v3341_v20  ;;  %v3339_v41 = vadd.f32 %v3303_v62, %v7493_v27  ;;  %v3306_v10 = vmul.f32 %v3270_v63, %v7507_v39  ;;  %v3268_v17 = vmul.f32 %v3232_v57, %v7521_v61 }
 0x35e   : > { %v5739_v13 = vpop.eup %5738  ;;  %3972 = vrot.lane.b32.xlu0 %v7534_v4, %s5826_s12  ;;  %v7542_v18 = vpack.c.bf16 %v3727_v14, %v3727_v14  ;;  %v3728_v55 = vmul.f32 %v3587_v32, %v3476_v6  ;;  %v3729_v25 = vmul.f32 %v3592_v47, %v3477_v12  ;;  %v3478_v28 = vmul.f32 %v3442_v15, %v7439_v11 }
 0x35f   : > { %5744 = vtanh.f32 %v3377_v3  ;;  %v3375_v21 = vmul.f32 0.7978846, %v3339_v41  ;;  %v3342_v60 = vadd.f32 %v3306_v10, %v7507_v39  ;;  %v3304_v26 = vmul.f32 %v3268_v17, %v7521_v61  ;;  %v3617_v3 = vpop.permute.xlu0 %3616 }
 0x360   : > { %3974 = vrot.lane.b32.xlu1 %v7542_v18, %s5826_s12  ;;  %v7548_v59 = vpack.c.bf16 %v3728_v55, %v3728_v55  ;;  %v3443_v31 = vadd.f32 1.0, %v5739_v13  ;;  %v7551_v58 = vpack.c.bf16 %v3729_v25, %v3729_v25  ;;  %v3445_v35 = vadd.f32 1.0, %v5737_v1 }
 0x361   : > { %v5741_v2 = vpop.eup %5740  ;;  %5746 = vtanh.f32 %v3375_v21  ;;  %v3378_v34 = vmul.f32 0.7978846, %v3342_v60  ;;  %v3340_v37 = vadd.f32 %v3304_v26, %v7521_v61  ;;  %v3730_v43 = vmul.f32 %v3597_v8, %v3478_v28 }
 0x362   : > { %v5743_v32 = vpop.eup %5742  ;;  %3976 = vrot.lane.b32.xlu0 %v7548_v59, %s5826_s12  ;;  %v5564_v38 = vpop.f32.mrf.mxu0  ;;  %v3479_v29 = vmul.f32 %v3443_v31, %v3191_v44  ;;  %v3446_v42 = vadd.f32 1.0, %v5741_v2  ;;  %v3481_v47 = vmul.f32 %v3445_v35, %v7502_v36  ;;  %v3194_v33 = vmul.f32 0.5, %v7444_v16 }
 0x363   : > { %5748 = vtanh.f32 %v3378_v34  ;;  %v7557_v11 = vadd.f32 %v5564_v38, %v7381_v23  ;;  %v3444_v54 = vadd.f32 1.0, %v5743_v32  ;;  %v3376_v49 = vmul.f32 0.7978846, %v3340_v37  ;;  %v3612_v44 = vpop.permute.xlu1 %3611 }
 0x364   : > { %3978 = vrot.lane.b32.xlu1 %v7551_v58, %s5826_s12  ;;  %v3116_v50 = vpop.f32.mrf.mxu0  ;;  %v7563_v56 = vpack.c.bf16 %v3730_v43, %v3730_v43  ;;  %v3731_v22 = vmul.f32 %v3602_v19, %v3479_v29  ;;  %v3733_v40 = vmul.f32 %v3612_v44, %v3481_v47  ;;  %v3482_v57 = vmul.f32 %v3446_v42, %v3194_v33  ;;  %v3627_v44 = vpop.permute.xlu0 %3626 }
 0x365   : > { %v3237_v20 = vmul.f32 0.044715, %v7557_v11  ;;  %v7567_v62 = vadd.f32 %v7381_v23, %v3116_v50  ;;  %v3480_v63 = vmul.f32 %v3444_v54, %v7515_v48  ;;  %5750 = vtanh.f32 %v3376_v49 }
 0x366   : > { %3980 = vrot.lane.b32.xlu0 %v7563_v56, %s5826_s12  ;;  %v5565_v16 = vpop.f32.mrf.mxu0  ;;  %v7572_v36 = vpack.c.bf16 %v3731_v22, %v3731_v22  ;;  %v7589_v55 = vpack.c.bf16 %v3733_v40, %v3733_v40  ;;  %v3734_v15 = vmul.f32 %v3617_v3, %v3482_v57  ;;  %v3197_v32 = vmul.f32 0.5, %v7484_v5 }
 0x367   : > { %v3273_v14 = vmul.f32 %v3237_v20, %v7557_v11  ;;  %v3235_v6 = vmul.f32 0.044715, %v7567_v62  ;;  %v7577_v1 = vadd.f32 %v5565_v16, %v7381_v23  ;;  %v3732_v8 = vmul.f32 %v3607_v46, %v3480_v63  ;;  %v3622_v35 = vpop.permute.xlu1 %3621 }
 0x368   : > { %3982 = vrot.lane.b32.xlu1 %v7572_v36, %s5826_s12  ;;  %v3119_v48 = vpop.f32.mrf.mxu0  ;;  %v3195_v37 = vmul.f32 0.5, %v7493_v27  ;;  %v7604_v43 = vpack.c.bf16 %v3734_v15, %v3734_v15  ;;  %v3198_v16 = vmul.f32 0.5, %v7507_v39  ;;  %v3196_v40 = vmul.f32 0.5, %v7521_v61 }
 0x369   : > { %v3309_v41 = vmul.f32 %v3273_v14, %v7557_v11  ;;  %v3271_v10 = vmul.f32 %v3235_v6, %v7567_v62  ;;  %v3238_v12 = vmul.f32 0.044715, %v7577_v1  ;;  %v7585_v13 = vadd.f32 %v7381_v23, %v3119_v48 }
 0x36a   : > { %v7587_v17 = vpack.c.bf16 %v3732_v8, %v3732_v8 }
 0x36b   : > { %v3345_v19 = vadd.f32 %v3309_v41, %v7557_v11  ;;  %v3307_v21 = vmul.f32 %v3271_v10, %v7567_v62  ;;  %v3274_v60 = vmul.f32 %v3238_v12, %v7577_v1  ;;  %v3236_v26 = vmul.f32 0.044715, %v7585_v13  ;;  %v3632_v63 = vpop.permute.xlu1 %3631  ;;  %v3637_v10 = vpop.permute.xlu0 %3636 }
 0x36c   : > { %v5745_v25 = vpop.eup %5744  ;;  %3984 = vrot.lane.b32.xlu0 %v7587_v17, %s5826_s12  ;;  %3986 = vrot.lane.b32.xlu1 %v7589_v55, %s5826_s12 }
 0x36d   : > { %v3381_v23 = vmul.f32 0.7978846, %v3345_v19  ;;  %v3343_v28 = vadd.f32 %v3307_v21, %v7567_v62  ;;  %v3310_v31 = vmul.f32 %v3274_v60, %v7577_v1  ;;  %v3449_v2 = vadd.f32 1.0, %v5745_v25 }
 0x36e   : > { %v5747_v34 = vpop.eup %5746  ;;  %v3272_v38 = vmul.f32 %v3236_v26, %v7585_v13  ;;  %v3201_v26 = vmul.f32 0.5, %v7557_v11 }
 0x36f   : > { %5752 = vtanh.f32 %v3381_v23  ;;  %v3379_v29 = vmul.f32 0.7978846, %v3343_v28  ;;  %v3346_v42 = vadd.f32 %v3310_v31, %v7577_v1  ;;  %v3447_v46 = vadd.f32 1.0, %v5747_v34  ;;  %v3642_v60 = vpop.permute.xlu1 %3641 }
 0x370   : > { %v5749_v54 = vpop.eup %5748  ;;  %v3308_v47 = vmul.f32 %v3272_v38, %v7585_v13  ;;  %3988 = vrot.lane.b32.xlu0 %v7604_v43, %s5826_s12  ;;  %v3485_v49 = vmul.f32 %v3449_v2, %v3197_v32  ;;  %v3199_v23 = vmul.f32 0.5, %v7567_v62 }
 0x371   : > { %5754 = vtanh.f32 %v3379_v29  ;;  %v3382_v33 = vmul.f32 0.7978846, %v3346_v42  ;;  %v3483_v5 = vmul.f32 %v3447_v46, %v3195_v37  ;;  %v3450_v50 = vadd.f32 1.0, %v5749_v54  ;;  %v3647_v37 = vpop.permute.xlu0 %3646 }
 0x372   : > { %v3344_v27 = vadd.f32 %v3308_v47, %v7585_v13  ;;  %v5751_v22 = vpop.eup %5750  ;;  %v3737_v48 = vmul.f32 %v3632_v63, %v3485_v49  ;;  %v3202_v42 = vmul.f32 0.5, %v7577_v1  ;;  %v3200_v46 = vmul.f32 0.5, %v7585_v13 }
 0x373   : > { %5756 = vtanh.f32 %v3382_v33  ;;  %v3735_v20 = vmul.f32 %v3622_v35, %v3483_v5  ;;  %v3448_v14 = vadd.f32 1.0, %v5751_v22  ;;  %v3486_v3 = vmul.f32 %v3450_v50, %v3198_v16  ;;  %v3652_v29 = vpop.permute.xlu1 %3651 }
 0x374   : > { %v3380_v57 = vmul.f32 0.7978846, %v3344_v27  ;;  %v7617_v12 = vpack.c.bf16 %v3737_v48, %v3737_v48  ;;  %v3852_v49 = vrot.slane %v7512_v51, 7  ;;  %v4060_v22 = vrot.slane %v7471_v52, 5 }
 0x375   : > { %v7613_v6 = vpack.c.bf16 %v3735_v20, %v3735_v20  ;;  %v3484_v8 = vmul.f32 %v3448_v14, %v3196_v40  ;;  %v3738_v39 = vmul.f32 %v3637_v10, %v3486_v3  ;;  %v3657_v27 = vpop.permute.xlu0 %3656  ;;  %v5418_v20 = vrot.slane %v7461_v45, 9 }
 0x376   : > { %5758 = vtanh.f32 %v3380_v57  ;;  %v3855_v63 = vrot.slane %v7525_v53, 7  ;;  %v4063_v16 = vrot.slane %v7475_v7, 5  ;;  %v3858_v40 = vrot.slane %v7534_v4, 7 }
 0x377   : > { %3990 = vrot.lane.b32.xlu1 %v7613_v6, %s5826_s12  ;;  %v3736_v41 = vmul.f32 %v3627_v44, %v3484_v8  ;;  %v7625_v25 = vpack.c.bf16 %v3738_v39, %v3738_v39  ;;  %v3854_v44 = vrot.slane %v3852_v49, 4  ;;  %v3861_v57 = vrot.slane %v7542_v18, 7 }
 0x378   : > { %v4061_v14 = vsel %vm5914_vm2, %v5418_v20, %v4060_v22  ;;  %v4062_v48 = vrot.slane %v4060_v22, 4  ;;  %v4066_v8 = vrot.slane %v7487_v24, 5  ;;  %v3857_v39 = vrot.slane %v3855_v63, 4 }
 0x379   : > { %v7619_v15 = vpack.c.bf16 %v3736_v41, %v3736_v41  ;;  %v7666_v10 = vsel %vm7658_vm4, %v3854_v44, %v3855_v63 }
 0x37a   : > { %3940 = vst.msk [vmem:[#allocation3 + $0x18] sm:$0xf] %vm3934_vm5, %v7666_v10 }
 0x37b   : > { %3994 = vrot.lane.b32.xlu1 %v7617_v12, %s5826_s12  ;;  %3992 = vrot.lane.b32.xlu0 %v7619_v15, %s5826_s12 }
 0x37c   : > { %v5753_v61 = vpop.eup %5752 }
 0x37d   : > { %v3453_v19 = vadd.f32 1.0, %v5753_v61  ;;  %v3860_v61 = vrot.slane %v3858_v40, 4 }
 0x37e   : > { %v5755_v21 = vpop.eup %5754 }
 0x37f   : > { %v3451_v28 = vadd.f32 1.0, %v5755_v21  ;;  %3996 = vrot.lane.b32.xlu0 %v7625_v25, %s5826_s12  ;;  %v3489_v34 = vmul.f32 %v3453_v19, %v3201_v26  ;;  %v4069_v19 = vrot.slane %v7498_v9, 5  ;;  %v4065_v21 = vrot.slane %v4063_v16, 4 }
 0x380   : > { %v5757_v31 = vpop.eup %5756  ;;  %v7680_v26 = vsel %vm7658_vm4, %v3860_v61, %v3861_v57  ;;  %v4087_v61 = vrot.slane %v7551_v58, 5 }
 0x381   : > { %v3487_v2 = vmul.f32 %v3451_v28, %v3199_v23  ;;  %v3454_v35 = vadd.f32 1.0, %v5757_v31  ;;  %v3741_v62 = vmul.f32 %v3652_v29, %v3489_v34  ;;  %v4064_v23 = vsel %vm5914_vm2, %v4062_v48, %v4063_v16  ;;  %3942 = vst.msk [vmem:[#allocation3 + $0x20] sm:$0xf] %vm3934_vm5, %v7680_v26 }
 0x382   : > { %v4072_v28 = vrot.slane %v7512_v51, 5  ;;  %v4067_v31 = vsel %vm5914_vm2, %v4065_v21, %v4066_v8  ;;  %v3864_v34 = vrot.slane %v7548_v59, 7  ;;  %v3838_v29 = vrot.slane %v7461_v45, 7 }
 0x383   : > { %v5759_v32 = vpop.eup %5758  ;;  %v3739_v38 = vmul.f32 %v3642_v60, %v3487_v2  ;;  %v3490_v33 = vmul.f32 %v3454_v35, %v3202_v42  ;;  %v7638_v50 = vpack.c.bf16 %v3741_v62, %v3741_v62  ;;  %v7676_v60 = vsel %vm7658_vm4, %v3857_v39, %v3858_v40 }
 0x384   : > { %v3452_v54 = vadd.f32 1.0, %v5759_v32  ;;  %3941 = vst.msk [vmem:[#allocation3 + $0x1c] sm:$0xf] %vm3934_vm5, %v7676_v60  ;;  %v3863_v2 = vrot.slane %v3861_v57, 4  ;;  %v3870_v35 = vrot.slane %v7563_v56, 7  ;;  %v4071_v32 = vrot.slane %v4069_v19, 4 }
 0x385   : > { %v7633_v11 = vpack.c.bf16 %v3739_v38, %v3739_v38  ;;  %v3742_v13 = vmul.f32 %v3657_v27, %v3490_v33  ;;  %v3873_v38 = vrot.slane %v7572_v36, 7  ;;  %3933 = vst.msk [vmem:[#allocation3] sm:$0xe] %vm3932_vm6, %v3838_v29  ;;  %v4078_v62 = vrot.slane %v7534_v4, 5 }
 0x386   : > { %v3488_v47 = vmul.f32 %v3452_v54, %v3200_v46  ;;  %v7702_v42 = vsel %vm7658_vm4, %v3863_v2, %v3864_v34  ;;  %v4068_v46 = vrot.slane %v4066_v8, 4  ;;  %v4073_v54 = vsel %vm5914_vm2, %v4071_v32, %v4072_v28 }
 0x387   : > { %3998 = vrot.lane.b32.xlu1 %v7633_v11, %s5826_s12  ;;  %v7662_v41 = vpack.c.bf16 %v3742_v13, %v3742_v13  ;;  %3943 = vst.msk [vmem:[#allocation3 + $0x24] sm:$0xf] %vm3934_vm5, %v7702_v42  ;;  %v3872_v45 = vrot.slane %v3870_v35, 4  ;;  %v3876_v33 = vrot.slane %v7587_v17, 7  ;;  %v4074_v27 = vrot.slane %v4072_v28, 4 }
 0x388   : > { %v3740_v5 = vmul.f32 %v3647_v37, %v3488_v47  ;;  %v4075_v37 = vrot.slane %v7525_v53, 5  ;;  %v3875_v47 = vrot.slane %v3873_v38, 4  ;;  %v4081_v13 = vrot.slane %v7542_v18, 5 }
 0x389   : > { %v7720_v44 = vsel %vm7658_vm4, %v3872_v45, %v3873_v38  ;;  %v3839_v63 = vrot.slane %v3838_v29, 4  ;;  %v3840_v16 = vrot.slane %v7471_v52, 7  ;;  %v4084_v40 = vrot.slane %v7548_v59, 5  ;;  %v7761_v29 = vpop.permute.xlu1 %3661 }
 0x38a   : > { %v7641_v1 = vpack.c.bf16 %v3740_v5, %v3740_v5  ;;  %v4070_v5 = vsel %vm5914_vm2, %v4068_v46, %v4069_v19  ;;  %v4077_v22 = vrot.slane %v4075_v37, 4  ;;  %v7724_v20 = vsel %vm7658_vm4, %v3875_v47, %v3876_v33  ;;  %3946 = vst.msk [vmem:[#allocation3 + $0x30] sm:$0xf] %vm3934_vm5, %v7720_v44 }
 0x38b   : > { %4002 = vrot.lane.b32.xlu1 %v7638_v50, %s5826_s12  ;;  %3947 = vst.msk [vmem:[#allocation3 + $0x34] sm:$0xf] %vm3934_vm5, %v7724_v20  ;;  %v3878_v48 = vrot.slane %v3876_v33, 4  ;;  %v3879_v8 = vrot.slane %v7589_v55, 7  ;;  %v4076_v52 = vsel %vm5914_vm2, %v4074_v27, %v4075_v37  ;;  %v4083_v39 = vrot.slane %v4081_v13, 4 }
 0x38c   : > { %4000 = vrot.lane.b32.xlu0 %v7641_v1, %s5826_s12  ;;  %v7734_v57 = vsel %vm5914_vm2, %v4077_v22, %v4078_v62  ;;  %v3842_v19 = vrot.slane %v3840_v16, 4  ;;  %v4080_v28 = vrot.slane %v4078_v62, 4  ;;  %v4090_v2 = vrot.slane %v7563_v56, 5 }
 0x38d   : > { %v7748_v21 = vsel %vm7658_vm4, %v3878_v48, %v3879_v8  ;;  %v3881_v37 = vrot.slane %v3879_v8, 4  ;;  %v3882_v38 = vrot.slane %v7604_v43, 7  ;;  %v4086_v46 = vrot.slane %v4084_v40, 4 }
 0x38e   : > { %3948 = vst.msk [vmem:[#allocation3 + $0x38] sm:$0xf] %vm3934_vm5, %v7748_v21  ;;  %v3846_v47 = vrot.slane %v7487_v24, 7  ;;  %v3849_v33 = vrot.slane %v7498_v9, 7  ;;  %v3867_v48 = vrot.slane %v7551_v58, 7 }
 0x38f   : > { %4131 = vrot.lane.b32.xlu1 %v4061_v14, %s5828_s14  ;;  %v3841_v14 = vsel %vm7658_vm4, %v3839_v63, %v3840_v16  ;;  %v7774_v62 = vsel %vm7658_vm4, %v3881_v37, %v3882_v38  ;;  %v7792_v24 = vsel %vm5914_vm2, %v4086_v46, %v4087_v61 }
 0x390   : > { %4004 = vrot.lane.b32.xlu0 %v7662_v41, %s5826_s12  ;;  %3935 = vst.msk [vmem:[#allocation3 + $0x4] sm:$0xf] %vm3934_vm5, %v3841_v14  ;;  %3949 = vst.msk [vmem:[#allocation3 + $0x3c] sm:$0xf] %vm3934_vm5, %v7774_v62  ;;  %v3851_v63 = vrot.slane %v3849_v33, 4  ;;  %v3866_v14 = vrot.slane %v3864_v34, 4 }
 0x391   : > { %v3885_v34 = vrot.slane %v7613_v6, 7  ;;  %s5834_s12 = smov 40  }
 0x392   : > { %v3853_v16 = vsel %vm7658_vm4, %v3851_v63, %v3852_v49  ;;  %v7820_v51 = vsel %vm7658_vm4, %v3866_v14, %v3867_v48  ;;  %v3869_v49 = vrot.slane %v3867_v48, 4 }
 0x393   : > { %4135 = vrot.lane.b32.xlu1 %v4067_v31, %s5828_s14  ;;  %v7753_v31 = vsel %vm5914_vm2, %v4083_v39, %v4084_v40  ;;  %v7805_v40 = vpop.permute.xlu1 %3671  ;;  %3939 = vst.msk [vmem:[#allocation3 + $0x14] sm:$0xf] %vm3934_vm5, %v3853_v16  ;;  %3944 = vst.msk [vmem:[#allocation3 + $0x28] sm:$0xf] %vm3934_vm5, %v7820_v51  ;;  %v3888_v39 = vrot.slane %v7619_v15, 7  ;;  %v3906_v16 = vrot.slane %v7662_v41, 7 }
 0x394   : > { %4133 = vrot.lane.b32.xlu0 %v4064_v23, %s5828_s14  ;;  %v3843_v23 = vrot.slane %v7475_v7, 7  ;;  %v7765_v7 = vsel %vm5914_vm2, %v4080_v28, %v4081_v13  ;;  %v3848_v13 = vrot.slane %v3846_v47, 4 }
 0x395   : > { %v3890_v37 = vrot.slane %v3888_v39, 4 }
 0x396   : > { %v3844_v32 = vsel %vm7658_vm4, %v3842_v19, %v3843_v23  ;;  %v3845_v45 = vrot.slane %v3843_v23, 4  ;;  %v3850_v9 = vsel %vm7658_vm4, %v3848_v13, %v3849_v33  ;;  %v3897_v19 = vrot.slane %v7633_v11, 7 }
 0x397   : > { %4139 = vrot.lane.b32.xlu1 %v4073_v54, %s5828_s14  ;;  %v4089_v54 = vrot.slane %v4087_v61, 4  ;;  %3936 = vst.msk [vmem:[#allocation3 + $0x8] sm:$0xf] %vm3934_vm5, %v3844_v32  ;;  %3938 = vst.msk [vmem:[#allocation3 + $0x10] sm:$0xf] %vm3934_vm5, %v3850_v9  ;;  %v3894_v61 = vrot.slane %v7625_v25, 7  ;;  %v7835_v23 = vpop.permute.xlu1 %3681 }
 0x398   : > { %4137 = vrot.lane.b32.xlu0 %v4070_v5, %s5828_s14  ;;  %v7780_v5 = vpop.permute.xlu0 %3666  ;;  %v3847_v22 = vsel %vm7658_vm4, %v3845_v45, %v3846_v47  ;;  %v3887_v32 = vrot.slane %v3885_v34, 4  ;;  %v3899_v46 = vrot.slane %v3897_v19, 4 }
 0x399   : > { %v7786_v27 = vsel %vm5914_vm2, %v4089_v54, %v4090_v2  ;;  %3937 = vst.msk [vmem:[#allocation3 + $0xc] sm:$0xf] %vm3934_vm5, %v3847_v22  ;;  %v3903_v54 = vrot.slane %v7638_v50, 7 }
 0x39a   : > { %v7853_v45 = vsel %vm7658_vm4, %v3887_v32, %v3888_v39  ;;  %v5697_v39 = vld [vmem:[%s8842_s3 + $0x10] sm:$0xff]   ;;  %v5698_v32 = vld [vmem:[%s8842_s3 + $0x8] sm:$0xff]  }
 0x39b   : > { %4143 = vrot.lane.b32.xlu1 %v7734_v57, %s5828_s14  ;;  %3951 = vst.msk [vmem:[#allocation3 + $0x44] sm:$0xf] %vm3934_vm5, %v7853_v45  ;;  %v3905_v9 = vrot.slane %v3903_v54, 4  ;;  %v7892_v48 = vpop.permute.xlu1 %3691 }
 0x39c   : > { %4141 = vrot.lane.b32.xlu0 %v4076_v52, %s5828_s14  ;;  %v7814_v8 = vpop.permute.xlu0 %3676  ;;  %v3884_v52 = vrot.slane %v3882_v38, 4  ;;  %v3896_v38 = vrot.slane %v3894_v61, 4 }
 0x39e   : > { %v7843_v28 = vsel %vm7658_vm4, %v3884_v52, %v3885_v34  ;;  %v7873_v22 = vsel %vm7658_vm4, %v3896_v38, %v3897_v19 }
 0x39f   : > { %4147 = vrot.lane.b32.xlu1 %v7753_v31, %s5828_s14  ;;  %3950 = vst.msk [vmem:[#allocation3 + $0x40] sm:$0xf] %vm3934_vm5, %v7843_v28  ;;  %3954 = vst.msk [vmem:[#allocation3 + $0x50] sm:$0xf] %vm3934_vm5, %v7873_v22 }
 0x3a0   : > { %4145 = vrot.lane.b32.xlu0 %v7765_v7, %s5828_s14  ;;  %v7863_v33 = vpop.permute.xlu0 %3686 }
 0x3a3   : > { %4151 = vrot.lane.b32.xlu1 %v7786_v27, %s5828_s14 }
 0x3a4   : > { %4149 = vrot.lane.b32.xlu0 %v7792_v24, %s5828_s14 }
 0x3a7   : > { %4260 = vrot.lane.b32.xlu1 %v7676_v60, %s5830_s16  ;;  %v3891_v60 = vrot.slane %v7617_v12, 7 }
 0x3a8   : > { %4258 = vrot.lane.b32.xlu0 %v7666_v10, %s5830_s16  ;;  %v7831_v10 = vsel %vm7658_vm4, %v3869_v49, %v3870_v35  ;;  %v7910_v49 = vpop.permute.xlu1 %3701 }
 0x3a9   : > { %3945 = vst.msk [vmem:[#allocation3 + $0x2c] sm:$0xf] %vm3934_vm5, %v7831_v10  ;;  %v3893_v35 = vrot.slane %v3891_v60, 4  ;;  %v7857_v47 = vsel %vm7658_vm4, %v3890_v37, %v3891_v60  ;;  %v4093_v37 = vrot.slane %v7572_v36, 5 }
 0x3aa   : > { %3952 = vst.msk [vmem:[#allocation3 + $0x48] sm:$0xf] %vm3934_vm5, %v7857_v47 }
 0x3ab   : > { %4264 = vrot.lane.b32.xlu1 %v7702_v42, %s5830_s16  ;;  %v3900_v42 = vrot.slane %v7641_v1, 7 }
 0x3ac   : > { %4262 = vrot.lane.b32.xlu0 %v7680_v26, %s5830_s16  ;;  %v7861_v26 = vsel %vm7658_vm4, %v3893_v35, %v3894_v61  ;;  %v4096_v61 = vrot.slane %v7587_v17, 5 }
 0x3ad   : > { %3953 = vst.msk [vmem:[#allocation3 + $0x4c] sm:$0xf] %vm3934_vm5, %v7861_v26  ;;  %v7877_v13 = vsel %vm7658_vm4, %v3899_v46, %v3900_v42  ;;  %v3902_v63 = vrot.slane %v3900_v42, 4  ;;  %v4099_v42 = vrot.slane %v7589_v55, 5 }
 0x3ae   : > { %3955 = vst.msk [vmem:[#allocation3 + $0x54] sm:$0xf] %vm3934_vm5, %v7877_v13  ;;  %v4098_v38 = vrot.slane %v4096_v61, 4 }
 0x3af   : > { %4357 = vrot.lane.b32.xlu1 %v7534_v4, %s5832_s7  ;;  %v7890_v14 = vsel %vm7658_vm4, %v3902_v63, %v3903_v54  ;;  %v7900_v4 = vsel %vm7658_vm4, %v3905_v9, %v3906_v16  ;;  %v4102_v54 = vrot.slane %v7604_v43, 5  ;;  %v5699_v63 = vld [vmem:[%s8842_s3] sm:$0xff]   ;;  %v4095_v9 = vrot.slane %v4093_v37, 4 }
 0x3b0   : > { %4355 = vrot.lane.b32.xlu0 %v7525_v53, %s5832_s7  ;;  %3956 = vst.msk [vmem:[#allocation3 + $0x58] sm:$0xf] %vm3934_vm5, %v7890_v14  ;;  %3957 = vst.msk [vmem:[#allocation3 + $0x5c] sm:$0xf] %vm3934_vm5, %v7900_v4  ;;  %v7906_v53 = vpop.permute.xlu0 %3696 }
 0x3b3   : > { %4361 = vrot.lane.b32.xlu1 %v7548_v59, %s5832_s7  ;;  %v7925_v59 = vpop.permute.xlu1 %3711 }
 0x3b4   : > { %4359 = vrot.lane.b32.xlu0 %v7542_v18, %s5832_s7  ;;  %v7916_v52 = vpop.permute.xlu0 %3706  ;;  %v5695_v18 = vld [vmem:[%s8842_s3 + $0x20] ss:$0 sps:$4 sm:$0xff]  }
 0x3b5   : > { %5613 = vmatprep.subr.msk.bf16.mxu1 %vm5074_vm7, %v5695_v18 }
 0x3b7   : > { %4475 = vrot.lane.b32.xlu1 %v7765_v7, %s5834_s12  ;;  %v5076_v7 = vsel %vm5074_vm7, %v5695_v18, 0 }
 0x3b8   : > { %4473 = vrot.lane.b32.xlu0 %v7734_v57, %s5834_s12  ;;  %5579 = vmatpush3.bf16.msra.mxu1 %v5076_v7  ;;  %v7929_v57 = vpop.permute.xlu0 %3716  ;;  %v7969_v7 = vsel %vm5914_vm2, %v4098_v38, %v4099_v42 }
 0x3bb   : > { %4479 = vrot.lane.b32.xlu1 %v7792_v24, %s5834_s12 }
 0x3bc   : > { %4477 = vrot.lane.b32.xlu0 %v7753_v31, %s5834_s12  ;;  %v5696_v31 = vld [vmem:[%s8842_s3 + $0x18] sm:$0xff]  }
 0x3bd   : > { %5580 = vmatprep.subr.bf16.mxu1 %v5696_v31 }
 0x3be   : > { %5581 = vmatpush3.bf16.msra.mxu1 %v5696_v31  ;;  %v4105_v31 = vrot.slane %v7613_v6, 5 }
 0x3bf   : > { %4602 = vrot.lane.b32.xlu1 %v7724_v20, %s5835_s19  ;;  %5582 = vmatprep.subr.bf16.mxu1 %v5697_v39 }
 0x3c0   : > { %4600 = vrot.lane.b32.xlu0 %v7720_v44, %s5835_s19  ;;  %v3959_v24 = vpop.permute.xlu1 %3958 }
 0x3c1   : > { %4031 = vst.msk [vmem:[#allocation3] sm:$0xf] %vm4030_vm8, %v3959_v24  ;;  %v7975_v24 = vsel %vm5914_vm2, %v4095_v9, %v4096_v61 }
 0x3c2   : > { %5583 = vmatpush3.bf16.msra.mxu1 %v5697_v39  ;;  %v4104_v39 = vrot.slane %v4102_v54, 4 }
 0x3c3   : > { %4606 = vrot.lane.b32.xlu1 %v7774_v62, %s5835_s19  ;;  %v3961_v34 = vpop.permute.xlu0 %3960  ;;  %5584 = vmatprep.subr.bf16.mxu1 %v5698_v32 }
 0x3c4   : > { %4604 = vrot.lane.b32.xlu0 %v7748_v21, %s5835_s19  ;;  %4032 = vst.msk [vmem:[#allocation3 + $0x4] sm:$0xf] %vm4030_vm8, %v3961_v34  ;;  %v3963_v60 = vpop.permute.xlu1 %3962  ;;  %v7986_v61 = vsel %vm5914_vm2, %v4104_v39, %v4105_v31  ;;  %v4111_v39 = vrot.slane %v7617_v12, 5 }
 0x3c5   : > { %4033 = vst.msk [vmem:[#allocation3 + $0x8] sm:$0xf] %vm4030_vm8, %v3963_v60  ;;  %v4101_v60 = vrot.slane %v4099_v42, 4 }
 0x3c6   : > { %5585 = vmatpush3.bf16.msra.mxu1 %v5698_v32 }
 0x3c7   : > { %4699 = vrot.lane.b32.xlu1 %v7587_v17, %s5836_s8  ;;  %5586 = vmatprep.subr.bf16.mxu1 %v5699_v63  ;;  %v7991_v32 = vsel %vm5914_vm2, %v4101_v60, %v4102_v54  ;;  %v4114_v60 = vrot.slane %v7625_v25, 5 }
 0x3c8   : > { %v3965_v19 = vpop.permute.xlu0 %3964  ;;  %4697 = vrot.lane.b32.xlu0 %v7572_v36, %s5836_s8  ;;  %v3967_v35 = vpop.permute.xlu1 %3966 }
 0x3c9   : > { %4034 = vst.msk [vmem:[#allocation3 + $0xc] sm:$0xf] %vm4030_vm8, %v3965_v19  ;;  %4035 = vst.msk [vmem:[#allocation3 + $0x10] sm:$0xf] %vm4030_vm8, %v3967_v35 }
 0x3ca   : > { %5587 = vmatpush3.bf16.msra.mxu1 %v5699_v63 }
 0x3cb   : > { %4703 = vrot.lane.b32.xlu1 %v7604_v43, %s5836_s8 }
 0x3cc   : > { %v3969_v46 = vpop.permute.xlu0 %3968  ;;  %4701 = vrot.lane.b32.xlu0 %v7589_v55, %s5836_s8  ;;  %v3971_v18 = vpop.permute.xlu1 %3970 }
 0x3cd   : > { %4036 = vst.msk [vmem:[#allocation3 + $0x14] sm:$0xf] %vm4030_vm8, %v3969_v46  ;;  %4037 = vst.msk [vmem:[#allocation3 + $0x18] sm:$0xf] %vm4030_vm8, %v3971_v18  ;;  %v8054_v18 = vld [vmem:[%s8841_s2] ss:$0 sm:$0xff] }
 0x3cf   : > { %4814 = vrot.lane.b32.xlu1 %v7969_v7, %s5837_s15 }
 0x3d0   : > { %v3973_v34 = vpop.permute.xlu0 %3972  ;;  %4812 = vrot.lane.b32.xlu0 %v7975_v24, %s5837_s15 }
 0x3d1   : > { %4038 = vst.msk [vmem:[#allocation3 + $0x1c] sm:$0xf] %vm4030_vm8, %v3973_v34 }
 0x3d2   : > { %v3975_v19 = vpop.permute.xlu1 %3974 }
 0x3d3   : > { %4039 = vst.msk [vmem:[#allocation3 + $0x20] sm:$0xf] %vm4030_vm8, %v3975_v19  ;;  %4818 = vrot.lane.b32.xlu1 %v7986_v61, %s5837_s15 }
 0x3d4   : > { %v3977_v35 = vpop.permute.xlu0 %3976  ;;  %4816 = vrot.lane.b32.xlu0 %v7991_v32, %s5837_s15 }
 0x3d5   : > { %4040 = vst.msk [vmem:[#allocation3 + $0x24] sm:$0xf] %vm4030_vm8, %v3977_v35  ;;  %v4107_v35 = vrot.slane %v4105_v31, 4  ;;  %v4116_v31 = vrot.slane %v4114_v60, 4 }
 0x3d6   : > { %v3979_v38 = vpop.permute.xlu1 %3978 }
 0x3d7   : > { %4041 = vst.msk [vmem:[#allocation3 + $0x28] sm:$0xf] %vm4030_vm8, %v3979_v38  ;;  %4268 = vrot.lane.b32.xlu1 %v7831_v10, %s5830_s16 }
 0x3d8   : > { %v3981_v46 = vpop.permute.xlu0 %3980  ;;  %4266 = vrot.lane.b32.xlu0 %v7820_v51, %s5830_s16 }
 0x3d9   : > { %4042 = vst.msk [vmem:[#allocation3 + $0x2c] sm:$0xf] %vm4030_vm8, %v3981_v46 }
 0x3da   : > { %v3983_v42 = vpop.permute.xlu1 %3982 }
 0x3db   : > { %4043 = vst.msk [vmem:[#allocation3 + $0x30] sm:$0xf] %vm4030_vm8, %v3983_v42  ;;  %4272 = vrot.lane.b32.xlu1 %v7724_v20, %s5830_s16  ;;  %v4117_v42 = vrot.slane %v7633_v11, 5 }
 0x3dc   : > { %4270 = vrot.lane.b32.xlu0 %v7720_v44, %s5830_s16  ;;  %v4092_v44 = vrot.slane %v4090_v2, 4  ;;  %v8041_v2 = vpop.f32.mrf.mxu0 }
 0x3de   : > { %v3985_v54 = vpop.permute.xlu0 %3984  ;;  %v3987_v63 = vpop.permute.xlu1 %3986  ;;  %v4094_v20 = vsel %vm5914_vm2, %v4092_v44, %v4093_v37  ;;  %v4113_v44 = vrot.slane %v4111_v39, 4 }
 0x3df   : > { %4044 = vst.msk [vmem:[#allocation3 + $0x34] sm:$0xf] %vm4030_vm8, %v3985_v54  ;;  %4045 = vst.msk [vmem:[#allocation3 + $0x38] sm:$0xf] %vm4030_vm8, %v3987_v63  ;;  %4365 = vrot.lane.b32.xlu1 %v7563_v56, %s5832_s7  ;;  %v3132_v10 = vpop.f32.mrf.mxu0 }
 0x3e0   : > { %4363 = vrot.lane.b32.xlu0 %v7551_v58, %s5832_s7  ;;  %v8057_v34 = vadd.f32 %v8054_v18, %v3132_v10 }
 0x3e2   : > { %v3989_v51 = vpop.permute.xlu0 %3988  ;;  %v3239_v54 = vmul.f32 0.044715, %v8057_v34 }
 0x3e3   : > { %4046 = vst.msk [vmem:[#allocation3 + $0x3c] sm:$0xf] %vm4030_vm8, %v3989_v51  ;;  %4369 = vrot.lane.b32.xlu1 %v7587_v17, %s5832_s7 }
 0x3e4   : > { %4367 = vrot.lane.b32.xlu0 %v7572_v36, %s5832_s7 }
 0x3e7   : > { %4483 = vrot.lane.b32.xlu1 %v4094_v20, %s5834_s12 }
 0x3e8   : > { %4481 = vrot.lane.b32.xlu0 %v7786_v27, %s5834_s12  ;;  %v4108_v27 = vrot.slane %v7619_v15, 5 }
 0x3e9   : > { %v3991_v58 = vpop.permute.xlu1 %3990 }
 0x3ea   : > { %4047 = vst.msk [vmem:[#allocation3 + $0x40] sm:$0xf] %vm4030_vm8, %v3991_v58  ;;  %v4110_v9 = vrot.slane %v4108_v27, 4  ;;  %v8077_v63 = vsel %vm5914_vm2, %v4107_v35, %v4108_v27 }
 0x3eb   : > { %4487 = vrot.lane.b32.xlu1 %v7969_v7, %s5834_s12 }
 0x3ec   : > { %4485 = vrot.lane.b32.xlu0 %v7975_v24, %s5834_s12  ;;  %v8070_v46 = vsel %vm5914_vm2, %v4110_v9, %v4111_v39 }
 0x3ed   : > { %v3995_v36 = vpop.permute.xlu1 %3994  ;;  %v3993_v56 = vpop.permute.xlu0 %3992 }
 0x3ee   : > { %4049 = vst.msk [vmem:[#allocation3 + $0x48] sm:$0xf] %vm4030_vm8, %v3995_v36  ;;  %4048 = vst.msk [vmem:[#allocation3 + $0x44] sm:$0xf] %vm4030_vm8, %v3993_v56  ;;  %v8088_v36 = vsel %vm5914_vm2, %v4116_v31, %v4117_v42  ;;  %v3275_v56 = vmul.f32 %v3239_v54, %v8057_v34 }
 0x3ef   : > { %4610 = vrot.lane.b32.xlu1 %v7853_v45, %s5835_s19 }
 0x3f0   : > { %4608 = vrot.lane.b32.xlu0 %v7843_v28, %s5835_s19 }
 0x3f1   : > { %v3997_v17 = vpop.permute.xlu0 %3996 }
 0x3f2   : > { %4050 = vst.msk [vmem:[#allocation3 + $0x4c] sm:$0xf] %vm4030_vm8, %v3997_v17  ;;  %v8094_v17 = vsel %vm5914_vm2, %v4113_v44, %v4114_v60 }
 0x3f3   : > { %4614 = vrot.lane.b32.xlu1 %v7861_v26, %s5835_s19 }
 0x3f4   : > { %4612 = vrot.lane.b32.xlu0 %v7857_v47, %s5835_s19 }
 0x3f7   : > { %4707 = vrot.lane.b32.xlu1 %v7619_v15, %s5836_s8 }
 0x3f8   : > { %4705 = vrot.lane.b32.xlu0 %v7613_v6, %s5836_s8 }
 0x3f9   : > { %v3999_v37 = vpop.permute.xlu1 %3998 }
 0x3fa   : > { %4051 = vst.msk [vmem:[#allocation3 + $0x50] sm:$0xf] %vm4030_vm8, %v3999_v37  ;;  %v3311_v37 = vmul.f32 %v3275_v56, %v8057_v34 }
 0x3fb   : > { %4711 = vrot.lane.b32.xlu1 %v7625_v25, %s5836_s8 }
 0x3fc   : > { %4709 = vrot.lane.b32.xlu0 %v7617_v12, %s5836_s8  ;;  %v3347_v60 = vadd.f32 %v3311_v37, %v8057_v34  ;;  %v3203_v37 = vmul.f32 0.5, %v8057_v34 }
 0x3fd   : > { %v4003_v19 = vpop.permute.xlu1 %4002 }
 0x3fe   : > { %v4001_v38 = vpop.permute.xlu0 %4000  ;;  %4053 = vst.msk [vmem:[#allocation3 + $0x58] sm:$0xf] %vm4030_vm8, %v4003_v19 }
 0x3ff   : > { %4052 = vst.msk [vmem:[#allocation3 + $0x54] sm:$0xf] %vm4030_vm8, %v4001_v38  ;;  %4822 = vrot.lane.b32.xlu1 %v8070_v46, %s5837_s15 }
 0x400   : > { %4820 = vrot.lane.b32.xlu0 %v8077_v63, %s5837_s15 }
 0x401   : > { %v4132_v51 = vpop.permute.xlu1 %4131 }
 0x402   : > { %v4005_v58 = vpop.permute.xlu0 %4004  ;;  %4204 = vst.msk [vmem:[#allocation3] sm:$0xf] %vm4203_vm9, %v4132_v51 }
 0x403   : > { %4054 = vst.msk [vmem:[#allocation3 + $0x5c] sm:$0xf] %vm4030_vm8, %v4005_v58  ;;  %4826 = vrot.lane.b32.xlu1 %v8088_v36, %s5837_s15  ;;  %v8147_v58 = vadd.f32 %v8054_v18, %v8041_v2 }
 0x404   : > { %4824 = vrot.lane.b32.xlu0 %v8094_v17, %s5837_s15 }
 0x405   : > { %v4136_v27 = vpop.permute.xlu1 %4135  ;;  %v3241_v2 = vmul.f32 0.044715, %v8147_v58 }
 0x406   : > { %v4134_v10 = vpop.permute.xlu0 %4133  ;;  %4206 = vst.msk [vmem:[#allocation3 + $0x8] sm:$0xf] %vm4203_vm9, %v4136_v27 }
 0x407   : > { %4205 = vst.msk [vmem:[#allocation3 + $0x4] sm:$0xf] %vm4203_vm9, %v4134_v10  ;;  %4274 = vrot.lane.b32.xlu1 %v7748_v21, %s5830_s16  ;;  %v3383_v21 = vmul.f32 0.7978846, %v3347_v60 }
 0x408   : > { %4153 = vrot.lane.b32.xlu0 %v4094_v20, %s5828_s14 }
 0x409   : > { %v4140_v9 = vpop.permute.xlu1 %4139  ;;  %5760 = vtanh.f32 %v3383_v21 }
 0x40a   : > { %v4138_v39 = vpop.permute.xlu0 %4137  ;;  %4208 = vst.msk [vmem:[#allocation3 + $0x10] sm:$0xf] %vm4203_vm9, %v4140_v9 }
 0x40b   : > { %4207 = vst.msk [vmem:[#allocation3 + $0xc] sm:$0xf] %vm4203_vm9, %v4138_v39  ;;  %4278 = vrot.lane.b32.xlu1 %v7843_v28, %s5830_s16  ;;  %v5569_v28 = vpop.f32.mrf.mxu0 }
 0x40c   : > { %4276 = vrot.lane.b32.xlu0 %v7774_v62, %s5830_s16  ;;  %v8155_v39 = vadd.f32 %v8054_v18, %v5569_v28 }
 0x40d   : > { %v4144_v19 = vpop.permute.xlu1 %4143 }
 0x40e   : > { %v4142_v35 = vpop.permute.xlu0 %4141  ;;  %4210 = vst.msk [vmem:[#allocation3 + $0x18] sm:$0xf] %vm4203_vm9, %v4144_v19  ;;  %v3242_v21 = vmul.f32 0.044715, %v8155_v39 }
 0x40f   : > { %4209 = vst.msk [vmem:[#allocation3 + $0x14] sm:$0xf] %vm4203_vm9, %v4142_v35  ;;  %4371 = vrot.lane.b32.xlu1 %v7589_v55, %s5832_s7  ;;  %v3135_v55 = vpop.f32.mrf.mxu0 }
 0x410   : > { %4280 = vrot.lane.b32.xlu0 %v7853_v45, %s5830_s16 }
 0x411   : > { %v4148_v20 = vpop.permute.xlu1 %4147 }
 0x412   : > { %v4146_v38 = vpop.permute.xlu0 %4145  ;;  %4212 = vst.msk [vmem:[#allocation3 + $0x20] sm:$0xf] %vm4203_vm9, %v4148_v20  ;;  %v3277_v20 = vmul.f32 %v3241_v2, %v8147_v58 }
 0x413   : > { %4211 = vst.msk [vmem:[#allocation3 + $0x1c] sm:$0xf] %vm4203_vm9, %v4146_v38  ;;  %4375 = vrot.lane.b32.xlu1 %v7613_v6, %s5832_s7  ;;  %v8132_v6 = vadd.f32 %v8054_v18, %v3135_v55  ;;  %v3278_v55 = vmul.f32 %v3242_v21, %v8155_v39 }
 0x414   : > { %4373 = vrot.lane.b32.xlu0 %v7604_v43, %s5832_s7 }
 0x415   : > { %v4152_v62 = vpop.permute.xlu1 %4151  ;;  %v3240_v51 = vmul.f32 0.044715, %v8132_v6 }
 0x416   : > { %v4150_v54 = vpop.permute.xlu0 %4149  ;;  %4214 = vst.msk [vmem:[#allocation3 + $0x28] sm:$0xf] %vm4203_vm9, %v4152_v62 }
 0x417   : > { %4213 = vst.msk [vmem:[#allocation3 + $0x24] sm:$0xf] %vm4203_vm9, %v4150_v54  ;;  %4489 = vrot.lane.b32.xlu1 %v7991_v32, %s5834_s12  ;;  %v3276_v27 = vmul.f32 %v3240_v51, %v8132_v6  ;;  %v4120_v54 = vrot.slane %v7641_v1, 5  ;;  %v4119_v51 = vrot.slane %v4117_v42, 4 }
 0x418   : > { %4377 = vrot.lane.b32.xlu0 %v7619_v15, %s5832_s7  ;;  %v5761_v15 = vpop.eup %5760 }
 0x419   : > { %v4261_v45 = vpop.permute.xlu1 %4260  ;;  %v3455_v9 = vadd.f32 1.0, %v5761_v15  ;;  %v3312_v19 = vmul.f32 %v3276_v27, %v8132_v6  ;;  %v4122_v42 = vrot.slane %v4120_v54, 4 }
 0x41a   : > { %v4259_v31 = vpop.permute.xlu0 %4258  ;;  %4332 = vst.msk [vmem:[#allocation3 + $0x4] sm:$0xf] %vm4330_vm10, %v4261_v45 }
 0x41b   : > { %4331 = vst.msk [vmem:[#allocation3] sm:$0xf] %vm4330_vm10, %v4259_v31  ;;  %4493 = vrot.lane.b32.xlu1 %v8077_v63, %s5834_s12  ;;  %v3491_v34 = vmul.f32 %v3455_v9, %v3203_v37  ;;  %v3348_v28 = vadd.f32 %v3312_v19, %v8132_v6  ;;  %v3313_v31 = vmul.f32 %v3277_v20, %v8147_v58 }
 0x41c   : > { %4491 = vrot.lane.b32.xlu0 %v7986_v61, %s5834_s12  ;;  %v3314_v37 = vmul.f32 %v3278_v55, %v8155_v39 }
 0x41d   : > { %v4265_v43 = vpop.permute.xlu1 %4264  ;;  %v3743_v45 = vmul.f32 %v7761_v29, %v3491_v34  ;;  %v8191_v29 = vsel %vm5914_vm2, %v4119_v51, %v4120_v54  ;;  %v3349_v2 = vadd.f32 %v3313_v31, %v8147_v58 }
 0x41e   : > { %v4263_v44 = vpop.permute.xlu0 %4262  ;;  %4334 = vst.msk [vmem:[#allocation3 + $0xc] sm:$0xf] %vm4330_vm10, %v4265_v43  ;;  %v8181_v43 = vpop.f32.mrf.mxu0  ;;  %v3350_v20 = vadd.f32 %v3314_v37, %v8155_v39 }
 0x41f   : > { %4333 = vst.msk [vmem:[#allocation3 + $0x8] sm:$0xf] %vm4330_vm10, %v4263_v44  ;;  %4616 = vrot.lane.b32.xlu1 %v7873_v22, %s5835_s19  ;;  %v4123_v44 = vrot.slane %v7638_v50, 5  ;;  %v8198_v9 = vpack.c.bf16 %v3743_v45, %v3743_v45  ;;  %v3385_v54 = vmul.f32 0.7978846, %v3349_v2 }
 0x420   : > { %4495 = vrot.lane.b32.xlu0 %v8070_v46, %s5834_s12  ;;  %v3386_v51 = vmul.f32 0.7978846, %v3350_v20 }
 0x421   : > { %v4358_v56 = vpop.permute.xlu1 %4357  ;;  %v4125_v19 = vrot.slane %v4123_v44, 4 }
 0x422   : > { %v4356_v10 = vpop.permute.xlu0 %4355  ;;  %4429 = vst.msk [vmem:[#allocation3 + $0x4] sm:$0xf] %vm4427_vm11, %v4358_v56  ;;  %v3384_v56 = vmul.f32 0.7978846, %v3348_v28  ;;  %v8215_v28 = vsel %vm5914_vm2, %v4122_v42, %v4123_v44 }
 0x423   : > { %4428 = vst.msk [vmem:[#allocation3] sm:$0xf] %vm4427_vm11, %v4356_v10  ;;  %4620 = vrot.lane.b32.xlu1 %v7890_v14, %s5835_s19  ;;  %v4126_v10 = vrot.slane %v7662_v41, 5 }
 0x424   : > { %4618 = vrot.lane.b32.xlu0 %v7877_v13, %s5835_s19  ;;  %5762 = vtanh.f32 %v3384_v56 }
 0x425   : > { %v4362_v60 = vpop.permute.xlu1 %4361  ;;  %v8206_v21 = vsel %vm5914_vm2, %v4125_v19, %v4126_v10  ;;  %v4128_v45 = vrot.slane %v4126_v10, 4  ;;  %5764 = vtanh.f32 %v3385_v54 }
 0x426   : > { %v4360_v35 = vpop.permute.xlu0 %4359  ;;  %4431 = vst.msk [vmem:[#allocation3 + $0xc] sm:$0xf] %vm4427_vm11, %v4362_v60  ;;  %v3148_v60 = vpop.f32.mrf.mxu0  ;;  %5766 = vtanh.f32 %v3386_v51 }
 0x427   : > { %4430 = vst.msk [vmem:[#allocation3 + $0x8] sm:$0xf] %vm4427_vm11, %v4360_v35  ;;  %4713 = vrot.lane.b32.xlu1 %v7633_v11, %s5836_s8 }
 0x428   : > { %4622 = vrot.lane.b32.xlu0 %v7900_v4, %s5835_s19 }
 0x429   : > { %v4476_v38 = vpop.permute.xlu1 %4475 }
 0x42a   : > { %v4474_v62 = vpop.permute.xlu0 %4473  ;;  %4547 = vst.msk [vmem:[#allocation3 + $0x4] sm:$0xf] %vm4545_vm12, %v4476_v38  ;;  %v8210_v38 = vadd.f32 %v8054_v18, %v3148_v60  ;;  %v3204_v60 = vmul.f32 0.5, %v8132_v6 }
 0x42b   : > { %4546 = vst.msk [vmem:[#allocation3] sm:$0xf] %vm4545_vm12, %v4474_v62  ;;  %4717 = vrot.lane.b32.xlu1 %v7638_v50, %s5836_s8  ;;  %v4129_v62 = vrot.slane %v8198_v9, 5 }
 0x42c   : > { %4715 = vrot.lane.b32.xlu0 %v7641_v1, %s5836_s8 }
 0x42d   : > { %v4480_v15 = vpop.permute.xlu1 %4479  ;;  %v8229_v44 = vsel %vm5914_vm2, %v4128_v45, %v4129_v62 }
 0x42e   : > { %v4478_v27 = vpop.permute.xlu0 %4477  ;;  %4549 = vst.msk [vmem:[#allocation3 + $0xc] sm:$0xf] %vm4545_vm12, %v4480_v15  ;;  %v3243_v15 = vmul.f32 0.044715, %v8210_v38 }
 0x42f   : > { %4548 = vst.msk [vmem:[#allocation3 + $0x8] sm:$0xf] %vm4545_vm12, %v4478_v27  ;;  %4828 = vrot.lane.b32.xlu1 %v8191_v29, %s5837_s15 }
 0x430   : > { %4719 = vrot.lane.b32.xlu0 %v7662_v41, %s5836_s8  ;;  %v3279_v10 = vmul.f32 %v3243_v15, %v8210_v38  ;;  %v3206_v15 = vmul.f32 0.5, %v8155_v39 }
 0x431   : > { %v4603_v35 = vpop.permute.xlu1 %4602  ;;  %v5763_v42 = vpop.eup %5762 }
 0x432   : > { %v4601_v34 = vpop.permute.xlu0 %4600  ;;  %4674 = vst.msk [vmem:[#allocation3 + $0x4] sm:$0xf] %vm4672_vm13, %v4603_v35  ;;  %v3315_v2 = vmul.f32 %v3279_v10, %v8210_v38 }
 0x433   : > { %4673 = vst.msk [vmem:[#allocation3] sm:$0xf] %vm4672_vm13, %v4601_v34  ;;  %4832 = vrot.lane.b32.xlu1 %v8206_v21, %s5837_s15 }
 0x434   : > { %4830 = vrot.lane.b32.xlu0 %v8215_v28, %s5837_s15  ;;  %v3351_v35 = vadd.f32 %v3315_v2, %v8210_v38  ;;  %v4241_v2 = vrot.slane %v8198_v9, 7 }
 0x435   : > { %v4607_v55 = vpop.permute.xlu1 %4606 }
 0x436   : > { %v4605_v31 = vpop.permute.xlu0 %4604  ;;  %4676 = vst.msk [vmem:[#allocation3 + $0xc] sm:$0xf] %vm4672_vm13, %v4607_v55  ;;  %v3387_v6 = vmul.f32 0.7978846, %v3351_v35  ;;  %v3205_v55 = vmul.f32 0.5, %v8147_v58 }
 0x437   : > { %4675 = vst.msk [vmem:[#allocation3 + $0x8] sm:$0xf] %vm4672_vm13, %v4605_v31  ;;  %4155 = vrot.lane.b32.xlu1 %v7975_v24, %s5828_s14 }
 0x438   : > { %4834 = vrot.lane.b32.xlu0 %v8229_v44, %s5837_s15  ;;  %5768 = vtanh.f32 %v3387_v6 }
 0x439   : > { %v4700_v56 = vpop.permute.xlu1 %4699 }
 0x43a   : > { %v4698_v27 = vpop.permute.xlu0 %4697  ;;  %4771 = vst.msk [vmem:[#allocation3 + $0x4] sm:$0xf] %vm4769_vm14, %v4700_v56 }
 0x43b   : > { %4770 = vst.msk [vmem:[#allocation3] sm:$0xf] %vm4769_vm14, %v4698_v27  ;;  %4159 = vrot.lane.b32.xlu1 %v7991_v32, %s5828_s14 }
 0x43c   : > { %4157 = vrot.lane.b32.xlu0 %v7969_v7, %s5828_s14  ;;  %v3456_v7 = vadd.f32 1.0, %v5763_v42 }
 0x43d   : > { %v4704_v24 = vpop.permute.xlu1 %4703 }
 0x43e   : > { %v4702_v37 = vpop.permute.xlu0 %4701  ;;  %4773 = vst.msk [vmem:[#allocation3 + $0xc] sm:$0xf] %vm4769_vm14, %v4704_v24 }
 0x43f   : > { %4772 = vst.msk [vmem:[#allocation3 + $0x8] sm:$0xf] %vm4769_vm14, %v4702_v37  ;;  %4282 = vrot.lane.b32.xlu1 %v7857_v47, %s5830_s16  ;;  %v5765_v47 = vpop.eup %5764 }
 0x440   : > { %4161 = vrot.lane.b32.xlu0 %v7986_v61, %s5828_s14  ;;  %v3492_v61 = vmul.f32 %v3456_v7, %v3204_v60  ;;  %v5767_v54 = vpop.eup %5766  ;;  %v3457_v45 = vadd.f32 1.0, %v5765_v47 }
 0x441   : > { %v4815_v32 = vpop.permute.xlu1 %4814  ;;  %v3458_v56 = vadd.f32 1.0, %v5767_v54  ;;  %v4243_v54 = vrot.slane %v4241_v2, 4 }
 0x442   : > { %v4813_v19 = vpop.permute.xlu0 %4812  ;;  %4886 = vst.msk [vmem:[#allocation3 + $0x4] sm:$0xf] %vm4884_vm15, %v4815_v32  ;;  %v3744_v51 = vmul.f32 %v7780_v5, %v3492_v61  ;;  %v3493_v58 = vmul.f32 %v3457_v45, %v3205_v55  ;;  %v8312_v61 = vadd.f32 %v8054_v18, %v8181_v43  ;;  %v3207_v55 = vmul.f32 0.5, %v8210_v38 }
 0x443   : > { %4885 = vst.msk [vmem:[#allocation3] sm:$0xf] %vm4884_vm15, %v4813_v19  ;;  %4286 = vrot.lane.b32.xlu1 %v7873_v22, %s5830_s16  ;;  %v3494_v10 = vmul.f32 %v3458_v56, %v3206_v15 }
 0x444   : > { %4284 = vrot.lane.b32.xlu0 %v7861_v26, %s5830_s16  ;;  %v8274_v39 = vpack.c.bf16 %v3744_v51, %v3744_v51  ;;  %v3245_v15 = vmul.f32 0.044715, %v8312_v61 }
 0x445   : > { %v4819_v34 = vpop.permute.xlu1 %4818 }
 0x446   : > { %v4817_v20 = vpop.permute.xlu0 %4816  ;;  %4888 = vst.msk [vmem:[#allocation3 + $0xc] sm:$0xf] %vm4884_vm15, %v4819_v34  ;;  %v4244_v32 = vrot.slane %v8274_v39, 7 }
 0x447   : > { %4887 = vst.msk [vmem:[#allocation3 + $0x8] sm:$0xf] %vm4884_vm15, %v4817_v20  ;;  %4379 = vrot.lane.b32.xlu1 %v7617_v12, %s5832_s7  ;;  %v5573_v12 = vpop.f32.mrf.mxu0 }
 0x448   : > { %4288 = vrot.lane.b32.xlu0 %v7877_v13, %s5830_s16  ;;  %v4246_v34 = vrot.slane %v4244_v32, 4  ;;  %v8330_v51 = vsel %vm7658_vm4, %v4243_v54, %v4244_v32 }
 0x449   : > { %v4269_v26 = vpop.permute.xlu1 %4268  ;;  %v3151_v24 = vpop.f32.mrf.mxu0 }
 0x44a   : > { %v4267_v22 = vpop.permute.xlu0 %4266  ;;  %4336 = vst.msk [vmem:[#allocation3 + $0x14] sm:$0xf] %vm4330_vm10, %v4269_v26  ;;  %v5700_v31 = vld [vmem:[#allocation3] sm:$0xff]   ;;  %v8284_v37 = vadd.f32 %v8054_v18, %v3151_v24  ;;  %v3281_v24 = vmul.f32 %v3245_v15, %v8312_v61 }
 0x44b   : > { %4335 = vst.msk [vmem:[#allocation3 + $0x10] sm:$0xf] %vm4330_vm10, %v4267_v22  ;;  %4383 = vrot.lane.b32.xlu1 %v7633_v11, %s5832_s7  ;;  %5588 = vmatprep.mubr.msk.bf16.mxu1 %vm5037_vm0, %v5700_v31  ;;  %v8325_v31 = vadd.f32 %v8054_v18, %v5573_v12 }
 0x44c   : > { %4381 = vrot.lane.b32.xlu0 %v7625_v25, %s5832_s7  ;;  %v3745_v25 = vmul.f32 %v7805_v40, %v3493_v58  ;;  %v4240_v40 = vrot.slane %v3906_v16, 4  ;;  %v3244_v19 = vmul.f32 0.044715, %v8284_v37  ;;  %v5769_v16 = vpop.eup %5768 }
 0x44d   : > { %v4273_v13 = vpop.permute.xlu1 %4272  ;;  %v3459_v43 = vadd.f32 1.0, %v5769_v16 }
 0x44e   : > { %v4271_v27 = vpop.permute.xlu0 %4270  ;;  %4338 = vst.msk [vmem:[#allocation3 + $0x1c] sm:$0xf] %vm4330_vm10, %v4273_v13  ;;  %v5701_v5 = vld [vmem:[#allocation3 + $0x8] sm:$0xff]   ;;  %v8297_v60 = vpack.c.bf16 %v3745_v25, %v3745_v25  ;;  %v8303_v47 = vsel %vm7658_vm4, %v4240_v40, %v4241_v2  ;;  %v3280_v45 = vmul.f32 %v3244_v19, %v8284_v37  ;;  %v4456_v2 = vrot.slane %v8274_v39, 5 }
 0x44f   : > { %4337 = vst.msk [vmem:[#allocation3 + $0x18] sm:$0xf] %vm4330_vm10, %v4271_v27  ;;  %4497 = vrot.lane.b32.xlu1 %v8094_v17, %s5834_s12  ;;  %5589 = vmatmul.mubr.msk.bf16.vlgmr.msra.gmra.mxu1 %vm5037_vm0, %v5701_v5  ;;  %v3495_v27 = vmul.f32 %v3459_v43, %v3207_v55  ;;  %v3246_v5 = vmul.f32 0.044715, %v8325_v31  ;;  %v3317_v40 = vmul.f32 %v3281_v24, %v8312_v61  ;;  %v4455_v19 = vrot.slane %v4129_v62, 4 }
 0x450   : > { %4385 = vrot.lane.b32.xlu0 %v7641_v1, %s5832_s7  ;;  %v3746_v1 = vmul.f32 %v7814_v8, %v3494_v10  ;;  %v4247_v20 = vrot.slane %v8297_v60, 7  ;;  %v3316_v12 = vmul.f32 %v3280_v45, %v8284_v37  ;;  %v4458_v62 = vrot.slane %v4456_v2, 4 }
 0x451   : > { %v4366_v11 = vpop.permute.xlu1 %4365  ;;  %v3282_v32 = vmul.f32 %v3246_v5, %v8325_v31  ;;  %v3353_v45 = vadd.f32 %v3317_v40, %v8312_v61 }
 0x452   : > { %v4364_v42 = vpop.permute.xlu0 %4363  ;;  %4433 = vst.msk [vmem:[#allocation3 + $0x14] sm:$0xf] %vm4427_vm11, %v4366_v11  ;;  %v8308_v8 = vpack.c.bf16 %v3746_v1, %v3746_v1  ;;  %v8322_v22 = vsel %vm7658_vm4, %v4246_v34, %v4247_v20  ;;  %v4249_v58 = vrot.slane %v4247_v20, 4  ;;  %v3352_v11 = vadd.f32 %v3316_v12, %v8284_v37 }
 0x453   : > { %4432 = vst.msk [vmem:[#allocation3 + $0x10] sm:$0xf] %vm4427_vm11, %v4364_v42  ;;  %4501 = vrot.lane.b32.xlu1 %v8191_v29, %s5834_s12  ;;  %v3747_v1 = vmul.f32 %v7835_v23, %v3495_v27  ;;  %v8372_v23 = vsel %vm5914_vm2, %v4455_v19, %v4456_v2  ;;  %v3318_v54 = vmul.f32 %v3282_v32, %v8325_v31  ;;  %v3389_v24 = vmul.f32 0.7978846, %v3353_v45 }
 0x454   : > { %4499 = vrot.lane.b32.xlu0 %v8088_v36, %s5834_s12  ;;  %v4250_v38 = vrot.slane %v8308_v8, 7  ;;  %v3388_v16 = vmul.f32 0.7978846, %v3352_v11 }
 0x455   : > { %v4370_v7 = vpop.permute.xlu1 %4369  ;;  %v8379_v55 = vpack.c.bf16 %v3747_v1, %v3747_v1  ;;  %v3354_v12 = vadd.f32 %v3318_v54, %v8325_v31 }
 0x456   : > { %v4368_v35 = vpop.permute.xlu0 %4367  ;;  %4435 = vst.msk [vmem:[#allocation3 + $0x1c] sm:$0xf] %vm4427_vm11, %v4370_v7  ;;  %v8346_v10 = vsel %vm7658_vm4, %v4249_v58, %v4250_v38  ;;  %v8362_v7 = vpop.f32.mrf.mxu0  ;;  %5770 = vtanh.f32 %v3388_v16 }
 0x457   : > { %4434 = vst.msk [vmem:[#allocation3 + $0x18] sm:$0xf] %vm4427_vm11, %v4368_v35  ;;  %4624 = vrot.lane.b32.xlu1 %v8303_v47, %s5835_s19  ;;  %v4459_v35 = vrot.slane %v8297_v60, 5  ;;  %v4465_v5 = vrot.slane %v8379_v55, 5  ;;  %v3390_v2 = vmul.f32 0.7978846, %v3354_v12  ;;  %5772 = vtanh.f32 %v3389_v24 }
 0x458   : > { %4503 = vrot.lane.b32.xlu0 %v8215_v28, %s5834_s12 }
 0x459   : > { %v4484_v6 = vpop.permute.xlu1 %4483  ;;  %v4461_v43 = vrot.slane %v4459_v35, 4  ;;  %v8396_v27 = vsel %vm5914_vm2, %v4458_v62, %v4459_v35  ;;  %5774 = vtanh.f32 %v3390_v2 }
 0x45a   : > { %v4482_v26 = vpop.permute.xlu0 %4481  ;;  %4551 = vst.msk [vmem:[#allocation3 + $0x14] sm:$0xf] %vm4545_vm12, %v4484_v6  ;;  %v4462_v6 = vrot.slane %v8308_v8, 5 }
 0x45b   : > { %4550 = vst.msk [vmem:[#allocation3 + $0x10] sm:$0xf] %vm4545_vm12, %v4482_v26  ;;  %4628 = vrot.lane.b32.xlu1 %v8322_v22, %s5835_s19  ;;  %v3164_v26 = vpop.f32.mrf.mxu0 }
 0x45c   : > { %4626 = vrot.lane.b32.xlu0 %v8330_v51, %s5835_s19  ;;  %v8387_v58 = vsel %vm5914_vm2, %v4461_v43, %v4462_v6  ;;  %v4464_v11 = vrot.slane %v4462_v6, 4 }
 0x45d   : > { %v4488_v56 = vpop.permute.xlu1 %4487 }
 0x45e   : > { %v4486_v13 = vpop.permute.xlu0 %4485  ;;  %4553 = vst.msk [vmem:[#allocation3 + $0x1c] sm:$0xf] %vm4545_vm12, %v4488_v56  ;;  %v8410_v1 = vsel %vm5914_vm2, %v4464_v11, %v4465_v5  ;;  %v3210_v11 = vmul.f32 0.5, %v8325_v31 }
 0x45f   : > { %4552 = vst.msk [vmem:[#allocation3 + $0x18] sm:$0xf] %vm4545_vm12, %v4486_v13  ;;  %4721 = vrot.lane.b32.xlu1 %v8198_v9, %s5836_s8  ;;  %v8391_v13 = vadd.f32 %v8054_v18, %v3164_v26 }
 0x460   : > { %4630 = vrot.lane.b32.xlu0 %v8346_v10, %s5835_s19 }
 0x461   : > { %v4611_v25 = vpop.permute.xlu1 %4610  ;;  %v3247_v32 = vmul.f32 0.044715, %v8391_v13 }
 0x462   : > { %v4609_v42 = vpop.permute.xlu0 %4608  ;;  %4678 = vst.msk [vmem:[#allocation3 + $0x14] sm:$0xf] %vm4672_vm13, %v4611_v25 }
 0x463   : > { %4677 = vst.msk [vmem:[#allocation3 + $0x10] sm:$0xf] %vm4672_vm13, %v4609_v42  ;;  %4725 = vrot.lane.b32.xlu1 %v8297_v60, %s5836_s8  ;;  %v3283_v35 = vmul.f32 %v3247_v32, %v8391_v13  ;;  %v5771_v16 = vpop.eup %5770 }
 0x464   : > { %4723 = vrot.lane.b32.xlu0 %v8274_v39, %s5836_s8  ;;  %v3460_v54 = vadd.f32 1.0, %v5771_v16 }
 0x465   : > { %v4615_v34 = vpop.permute.xlu1 %4614 }
 0x466   : > { %v4613_v20 = vpop.permute.xlu0 %4612  ;;  %4680 = vst.msk [vmem:[#allocation3 + $0x1c] sm:$0xf] %vm4672_vm13, %v4615_v34 }
 0x467   : > { %4679 = vst.msk [vmem:[#allocation3 + $0x18] sm:$0xf] %vm4672_vm13, %v4613_v20  ;;  %4836 = vrot.lane.b32.xlu1 %v8372_v23, %s5837_s15  ;;  %v3319_v20 = vmul.f32 %v3283_v35, %v8391_v13  ;;  %v4253_v35 = vrot.slane %v8379_v55, 7 }
 0x468   : > { %4727 = vrot.lane.b32.xlu0 %v8308_v8, %s5836_s8 }
 0x469   : > { %v4708_v15 = vpop.permute.xlu1 %4707  ;;  %v3355_v45 = vadd.f32 %v3319_v20, %v8391_v13 }
 0x46a   : > { %v4706_v56 = vpop.permute.xlu0 %4705  ;;  %4775 = vst.msk [vmem:[#allocation3 + $0x14] sm:$0xf] %vm4769_vm14, %v4708_v15 }
 0x46b   : > { %4774 = vst.msk [vmem:[#allocation3 + $0x10] sm:$0xf] %vm4769_vm14, %v4706_v56  ;;  %4840 = vrot.lane.b32.xlu1 %v8387_v58, %s5837_s15  ;;  %v3391_v15 = vmul.f32 0.7978846, %v3355_v45  ;;  %v4255_v45 = vrot.slane %v4253_v35, 4 }
 0x46c   : > { %4838 = vrot.lane.b32.xlu0 %v8396_v27, %s5837_s15 }
 0x46d   : > { %v4712_v25 = vpop.permute.xlu1 %4711  ;;  %5776 = vtanh.f32 %v3391_v15 }
 0x46e   : > { %v4710_v42 = vpop.permute.xlu0 %4709  ;;  %4777 = vst.msk [vmem:[#allocation3 + $0x1c] sm:$0xf] %vm4769_vm14, %v4712_v25 }
 0x46f   : > { %4776 = vst.msk [vmem:[#allocation3 + $0x18] sm:$0xf] %vm4769_vm14, %v4710_v42  ;;  %4163 = vrot.lane.b32.xlu1 %v8077_v63, %s5828_s14  ;;  %v5577_v42 = vpop.f32.mrf.mxu0 }
 0x470   : > { %4842 = vrot.lane.b32.xlu0 %v8410_v1, %s5837_s15 }
 0x471   : > { %v4823_v40 = vpop.permute.xlu1 %4822 }
 0x472   : > { %v4821_v19 = vpop.permute.xlu0 %4820  ;;  %4890 = vst.msk [vmem:[#allocation3 + $0x14] sm:$0xf] %vm4884_vm15, %v4823_v40 }
 0x473   : > { %4889 = vst.msk [vmem:[#allocation3 + $0x10] sm:$0xf] %vm4884_vm15, %v4821_v19  ;;  %4167 = vrot.lane.b32.xlu1 %v8094_v17, %s5828_s14  ;;  %v3208_v17 = vmul.f32 0.5, %v8284_v37 }
 0x474   : > { %4165 = vrot.lane.b32.xlu0 %v8070_v46, %s5828_s14 }
 0x475   : > { %v4827_v63 = vpop.permute.xlu1 %4826  ;;  %v3496_v37 = vmul.f32 %v3460_v54, %v3208_v17  ;;  %v8493_v54 = vadd.f32 %v8054_v18, %v8362_v7  ;;  %v8504_v7 = vadd.f32 %v8054_v18, %v5577_v42 }
 0x476   : > { %v4825_v34 = vpop.permute.xlu0 %4824  ;;  %4892 = vst.msk [vmem:[#allocation3 + $0x1c] sm:$0xf] %vm4884_vm15, %v4827_v63 }
 0x477   : > { %4891 = vst.msk [vmem:[#allocation3 + $0x18] sm:$0xf] %vm4884_vm15, %v4825_v34  ;;  %4290 = vrot.lane.b32.xlu1 %v7890_v14, %s5830_s16  ;;  %v5773_v14 = vpop.eup %5772  ;;  %v3748_v25 = vmul.f32 %v7863_v33, %v3496_v37  ;;  %v3167_v33 = vpop.f32.mrf.mxu0  ;;  %v3249_v15 = vmul.f32 0.044715, %v8493_v54 }
 0x478   : > { %4169 = vrot.lane.b32.xlu0 %v8088_v36, %s5828_s14  ;;  %v5775_v56 = vpop.eup %5774  ;;  %v8465_v40 = vadd.f32 %v8054_v18, %v3167_v33 }
 0x479   : > { %v4275_v6 = vpop.permute.xlu1 %4274  ;;  %v8456_v32 = vpack.c.bf16 %v3748_v25, %v3748_v25 }
 0x47a   : > { %v4154_v46 = vpop.permute.xlu0 %4153  ;;  %4339 = vst.msk [vmem:[#allocation3 + $0x20] sm:$0xf] %vm4330_vm10, %v4275_v6  ;;  %v5702_v62 = vld [vmem:[#allocation3 + $0x10] sm:$0xff]   ;;  %v3248_v20 = vmul.f32 0.044715, %v8465_v40 }
 0x47b   : > { %4215 = vst.msk [vmem:[#allocation3 + $0x2c] sm:$0xf] %vm4203_vm9, %v4154_v46  ;;  %4294 = vrot.lane.b32.xlu1 %v8303_v47, %s5830_s16  ;;  %5592 = vmatprep.mubr.msk.bf16.mxu1 %vm5037_vm0, %v5702_v62  ;;  %v3209_v47 = vmul.f32 0.5, %v8312_v61  ;;  %v4256_v63 = vrot.slane %v8456_v32, 7 }
 0x47c   : > { %4292 = vrot.lane.b32.xlu0 %v7900_v4, %s5830_s16  ;;  %v3461_v4 = vadd.f32 1.0, %v5773_v14  ;;  %v3211_v14 = vmul.f32 0.5, %v8391_v13 }
 0x47d   : > { %v4279_v36 = vpop.permute.xlu1 %4278 }
 0x47e   : > { %v4277_v26 = vpop.permute.xlu0 %4276  ;;  %4341 = vst.msk [vmem:[#allocation3 + $0x28] sm:$0xf] %vm4330_vm10, %v4279_v36  ;;  %v5703_v43 = vld [vmem:[#allocation3 + $0x18] sm:$0xff]   ;;  %v3497_v61 = vmul.f32 %v3461_v4, %v3209_v47  ;;  %v3284_v36 = vmul.f32 %v3248_v20, %v8465_v40 }
 0x47f   : > { %4340 = vst.msk [vmem:[#allocation3 + $0x24] sm:$0xf] %vm4330_vm10, %v4277_v26  ;;  %4387 = vrot.lane.b32.xlu1 %v7638_v50, %s5832_s7  ;;  %5593 = vmatmul.mubr.msk.bf16.gmra.mxu1 %vm5037_vm0, %v5703_v43  ;;  %v3462_v50 = vadd.f32 1.0, %v5775_v56 }
 0x480   : > { %4296 = vrot.lane.b32.xlu0 %v8330_v51, %s5830_s16  ;;  %v3320_v18 = vmul.f32 %v3284_v36, %v8465_v40 }
 0x481   : > { %v4372_v12 = vpop.permute.xlu1 %4371  ;;  %v3498_v31 = vmul.f32 %v3462_v50, %v3210_v11  ;;  %v3285_v11 = vmul.f32 %v3249_v15, %v8493_v54 }
 0x482   : > { %v4281_v24 = vpop.permute.xlu0 %4280  ;;  %4436 = vst.msk [vmem:[#allocation3 + $0x20] sm:$0xf] %vm4427_vm11, %v4372_v12  ;;  %v3250_v12 = vmul.f32 0.044715, %v8504_v7  ;;  %v3356_v50 = vadd.f32 %v3320_v18, %v8465_v40 }
 0x483   : > { %4342 = vst.msk [vmem:[#allocation3 + $0x2c] sm:$0xf] %vm4330_vm10, %v4281_v24  ;;  %4391 = vrot.lane.b32.xlu1 %v8198_v9, %s5832_s7  ;;  %v3749_v9 = vmul.f32 %v7892_v48, %v3497_v61  ;;  %v4252_v48 = vrot.slane %v4250_v38, 4  ;;  %v5777_v38 = vpop.eup %5776 }
 0x484   : > { %4389 = vrot.lane.b32.xlu0 %v7662_v41, %s5832_s7  ;;  %v3463_v43 = vadd.f32 1.0, %v5777_v38 }
 0x485   : > { %v4376_v51 = vpop.permute.xlu1 %4375  ;;  %v8478_v34 = vpack.c.bf16 %v3749_v9, %v3749_v9  ;;  %v8484_v17 = vsel %vm7658_vm4, %v4252_v48, %v4253_v35  ;;  %v4467_v9 = vrot.slane %v4465_v5, 4  ;;  %v3392_v35 = vmul.f32 0.7978846, %v3356_v50 }
 0x486   : > { %v4374_v2 = vpop.permute.xlu0 %4373  ;;  %4438 = vst.msk [vmem:[#allocation3 + $0x28] sm:$0xf] %vm4427_vm11, %v4376_v51  ;;  %v3499_v25 = vmul.f32 %v3463_v43, %v3211_v14  ;;  %v4468_v51 = vrot.slane %v8456_v32, 5 }
 0x487   : > { %4437 = vst.msk [vmem:[#allocation3 + $0x24] sm:$0xf] %vm4427_vm11, %v4374_v2  ;;  %4505 = vrot.lane.b32.xlu1 %v8206_v21, %s5834_s12  ;;  %v4583_v46 = vrot.slane %v8478_v34, 7  ;;  %v3286_v2 = vmul.f32 %v3250_v12, %v8504_v7  ;;  %5778 = vtanh.f32 %v3392_v35 }
 0x488   : > { %4393 = vrot.lane.b32.xlu0 %v8274_v39, %s5832_s7  ;;  %v3750_v39 = vmul.f32 %v7906_v53, %v3498_v31  ;;  %v3751_v33 = vmul.f32 %v7910_v49, %v3499_v25  ;;  %v3321_v31 = vmul.f32 %v3285_v11, %v8493_v54  ;;  %v4470_v5 = vrot.slane %v4468_v51, 4 }
 0x489   : > { %v4490_v41 = vpop.permute.xlu1 %4489  ;;  %v4585_v47 = vrot.slane %v4583_v46, 4  ;;  %v3322_v48 = vmul.f32 %v3286_v2, %v8504_v7 }
 0x48a   : > { %v4378_v19 = vpop.permute.xlu0 %4377  ;;  %4554 = vst.msk [vmem:[#allocation3 + $0x20] sm:$0xf] %vm4545_vm12, %v4490_v41  ;;  %v8489_v53 = vpack.c.bf16 %v3750_v39, %v3750_v39  ;;  %v4471_v41 = vrot.slane %v8478_v34, 5  ;;  %v8545_v39 = vsel %vm5914_vm2, %v4467_v9, %v4468_v51 }
 0x48b   : > { %4439 = vst.msk [vmem:[#allocation3 + $0x2c] sm:$0xf] %vm4427_vm11, %v4378_v19  ;;  %4509 = vrot.lane.b32.xlu1 %v8372_v23, %s5834_s12  ;;  %v4582_v23 = vrot.slane %v4256_v63, 4 }
 0x48c   : > { %4507 = vrot.lane.b32.xlu0 %v8229_v44, %s5834_s12  ;;  %v4586_v13 = vrot.slane %v8489_v53, 7  ;;  %v4797_v49 = vrot.slane %v8489_v53, 5  ;;  %v4796_v20 = vrot.slane %v4471_v41, 4 }
 0x48d   : > { %v4494_v16 = vpop.permute.xlu1 %4493  ;;  %v4584_v26 = vsel %vm7658_vm4, %v4582_v23, %v4583_v46  ;;  %v3358_v46 = vadd.f32 %v3322_v48, %v8504_v7 }
 0x48e   : > { %v4492_v6 = vpop.permute.xlu0 %4491  ;;  %4556 = vst.msk [vmem:[#allocation3 + $0x28] sm:$0xf] %vm4545_vm12, %v4494_v16  ;;  %v4587_v24 = vsel %vm7658_vm4, %v4585_v47, %v4586_v13  ;;  %v3357_v16 = vadd.f32 %v3321_v31, %v8493_v54  ;;  %v4798_v38 = vsel %vm5914_vm2, %v4796_v20, %v4797_v49 }
 0x48f   : > { %4555 = vst.msk [vmem:[#allocation3 + $0x24] sm:$0xf] %vm4545_vm12, %v4492_v6  ;;  %4632 = vrot.lane.b32.xlu1 %v8484_v17, %s5835_s19  ;;  %v3394_v43 = vmul.f32 0.7978846, %v3358_v46 }
 0x490   : > { %4511 = vrot.lane.b32.xlu0 %v8396_v27, %s5834_s12  ;;  %v8509_v27 = vsel %vm7658_vm4, %v4255_v45, %v4256_v63  ;;  %v3393_v14 = vmul.f32 0.7978846, %v3357_v16 }
 0x491   : > { %v4617_v62 = vpop.permute.xlu1 %4616 }
 0x492   : > { %v4496_v37 = vpop.permute.xlu0 %4495  ;;  %4681 = vst.msk [vmem:[#allocation3 + $0x20] sm:$0xf] %vm4672_vm13, %v4617_v62  ;;  %v8564_v62 = vsel %vm5914_vm2, %v4470_v5, %v4471_v41  ;;  %5780 = vtanh.f32 %v3393_v14 }
 0x493   : > { %4557 = vst.msk [vmem:[#allocation3 + $0x2c] sm:$0xf] %vm4545_vm12, %v4496_v37  ;;  %4636 = vrot.lane.b32.xlu1 %v4584_v26, %s5835_s19  ;;  %v4799_v37 = vrot.slane %v4797_v49, 4  ;;  %5782 = vtanh.f32 %v3394_v43 }
 0x494   : > { %4634 = vrot.lane.b32.xlu0 %v8509_v27, %s5835_s19  ;;  %v5779_v12 = vpop.eup %5778 }
 0x495   : > { %v4621_v56 = vpop.permute.xlu1 %4620  ;;  %v3464_v11 = vadd.f32 1.0, %v5779_v12 }
 0x496   : > { %v4619_v4 = vpop.permute.xlu0 %4618  ;;  %4683 = vst.msk [vmem:[#allocation3 + $0x28] sm:$0xf] %vm4672_vm13, %v4621_v56 }
 0x497   : > { %4682 = vst.msk [vmem:[#allocation3 + $0x24] sm:$0xf] %vm4672_vm13, %v4619_v4  ;;  %4729 = vrot.lane.b32.xlu1 %v8379_v55, %s5836_s8 }
 0x498   : > { %4638 = vrot.lane.b32.xlu0 %v4587_v24, %s5835_s19  ;;  %v3212_v24 = vmul.f32 0.5, %v8465_v40 }
 0x499   : > { %v4714_v42 = vpop.permute.xlu1 %4713 }
 0x49a   : > { %v4623_v61 = vpop.permute.xlu0 %4622  ;;  %4778 = vst.msk [vmem:[#allocation3 + $0x20] sm:$0xf] %vm4769_vm14, %v4714_v42  ;;  %v3500_v40 = vmul.f32 %v3464_v11, %v3212_v24 }
 0x49b   : > { %4684 = vst.msk [vmem:[#allocation3 + $0x2c] sm:$0xf] %vm4672_vm13, %v4623_v61  ;;  %4733 = vrot.lane.b32.xlu1 %v8478_v34, %s5836_s8  ;;  %v8552_v34 = vpack.c.bf16 %v3751_v33, %v3751_v33  ;;  %v3213_v61 = vmul.f32 0.5, %v8493_v54  ;;  %v3214_v33 = vmul.f32 0.5, %v8504_v7 }
 0x49c   : > { %4731 = vrot.lane.b32.xlu0 %v8456_v32, %s5836_s8  ;;  %v3752_v2 = vmul.f32 %v7916_v52, %v3500_v40 }
 0x49d   : > { %v4718_v19 = vpop.permute.xlu1 %4717  ;;  %v4800_v45 = vrot.slane %v8552_v34, 5 }
 0x49e   : > { %v4716_v63 = vpop.permute.xlu0 %4715  ;;  %4780 = vst.msk [vmem:[#allocation3 + $0x28] sm:$0xf] %vm4769_vm14, %v4718_v19  ;;  %v5495_v9 = vpack.c.bf16 %v3752_v2, %v3752_v2 }
 0x49f   : > { %4779 = vst.msk [vmem:[#allocation3 + $0x24] sm:$0xf] %vm4769_vm14, %v4716_v63  ;;  %4844 = vrot.lane.b32.xlu1 %v8545_v39, %s5837_s15  ;;  %v4801_v15 = vsel %vm5914_vm2, %v4799_v37, %v4800_v45  ;;  %v4802_v3 = vrot.slane %v4800_v45, 4 }
 0x4a0   : > { %4735 = vrot.lane.b32.xlu0 %v8489_v53, %s5836_s8  ;;  %v4592_v19 = vrot.slane %v5495_v9, 7 }
 0x4a1   : > { %v4829_v6 = vpop.permute.xlu1 %4828 }
 0x4a2   : > { %v4720_v23 = vpop.permute.xlu0 %4719  ;;  %4893 = vst.msk [vmem:[#allocation3 + $0x20] sm:$0xf] %vm4884_vm15, %v4829_v6  ;;  %v4594_v48 = vrot.slane %v4592_v19, 4 }
 0x4a3   : > { %4781 = vst.msk [vmem:[#allocation3 + $0x2c] sm:$0xf] %vm4769_vm14, %v4720_v23  ;;  %4848 = vrot.lane.b32.xlu1 %v4798_v38, %s5837_s15 }
 0x4a4   : > { %4846 = vrot.lane.b32.xlu0 %v8564_v62, %s5837_s15 }
 0x4a5   : > { %v4833_v36 = vpop.permute.xlu1 %4832 }
 0x4a6   : > { %v4831_v26 = vpop.permute.xlu0 %4830  ;;  %4895 = vst.msk [vmem:[#allocation3 + $0x28] sm:$0xf] %vm4884_vm15, %v4833_v36  ;;  %v4803_v36 = vrot.slane %v5495_v9, 5 }
 0x4a7   : > { %4894 = vst.msk [vmem:[#allocation3 + $0x24] sm:$0xf] %vm4884_vm15, %v4831_v26  ;;  %4171 = vrot.lane.b32.xlu1 %v8191_v29, %s5828_s14 }
 0x4a8   : > { %4850 = vrot.lane.b32.xlu0 %v4801_v15, %s5837_s15  ;;  %v4804_v15 = vsel %vm5914_vm2, %v4802_v3, %v4803_v36 }
 0x4a9   : > { %v4156_v56 = vpop.permute.xlu1 %4155 }
 0x4aa   : > { %v4835_v47 = vpop.permute.xlu0 %4834  ;;  %4216 = vst.msk [vmem:[#allocation3 + $0x30] sm:$0xf] %vm4203_vm9, %v4156_v56 }
 0x4ab   : > { %4896 = vst.msk [vmem:[#allocation3 + $0x2c] sm:$0xf] %vm4884_vm15, %v4835_v47  ;;  %4175 = vrot.lane.b32.xlu1 %v8206_v21, %s5828_s14  ;;  %v4805_v47 = vrot.slane %v4803_v36, 4 }
 0x4ac   : > { %4173 = vrot.lane.b32.xlu0 %v8215_v28, %s5828_s14 }
 0x4ad   : > { %v4160_v18 = vpop.permute.xlu1 %4159 }
 0x4ae   : > { %v4158_v4 = vpop.permute.xlu0 %4157  ;;  %4218 = vst.msk [vmem:[#allocation3 + $0x38] sm:$0xf] %vm4203_vm9, %v4160_v18  ;;  %v5704_v29 = vld [vmem:[#allocation3 + $0x20] sm:$0xff]  }
 0x4af   : > { %4217 = vst.msk [vmem:[#allocation3 + $0x34] sm:$0xf] %vm4203_vm9, %v4158_v4  ;;  %4298 = vrot.lane.b32.xlu1 %v8322_v22, %s5830_s16  ;;  %5596 = vmatprep.mubr.msk.bf16.mxu1 %vm5037_vm0, %v5704_v29 }
 0x4b0   : > { %4177 = vrot.lane.b32.xlu0 %v8229_v44, %s5828_s14  ;;  %v5781_v44 = vpop.eup %5780  ;;  %s5617_s14 = smul.u32 24, %s8865_s21 }
 0x4b1   : > { %v4283_v21 = vpop.permute.xlu1 %4282  ;;  %v5783_v50 = vpop.eup %5782 }
 0x4b2   : > { %v4162_v28 = vpop.permute.xlu0 %4161  ;;  %4343 = vst.msk [vmem:[#allocation3 + $0x30] sm:$0xf] %vm4330_vm10, %v4283_v21  ;;  %v5705_v25 = vld [vmem:[#allocation3 + $0x28] sm:$0xff]  }
 0x4b3   : > { %4219 = vst.msk [vmem:[#allocation3 + $0x3c] sm:$0xf] %vm4203_vm9, %v4162_v28  ;;  %4302 = vrot.lane.b32.xlu1 %v8484_v17, %s5830_s16  ;;  %5597 = vmatmul.mubr.msk.bf16.gmra.mxu1 %vm5037_vm0, %v5705_v25 }
 0x4b4   : > { %4300 = vrot.lane.b32.xlu0 %v8346_v10, %s5830_s16  ;;  %v3465_v10 = vadd.f32 1.0, %v5781_v44 }
 0x4b5   : > { %v4287_v22 = vpop.permute.xlu1 %4286 }
 0x4b6   : > { %v4285_v42 = vpop.permute.xlu0 %4284  ;;  %4345 = vst.msk [vmem:[#allocation3 + $0x38] sm:$0xf] %vm4330_vm10, %v4287_v22  ;;  %v3501_v54 = vmul.f32 %v3465_v10, %v3213_v61 }
 0x4b7   : > { %4344 = vst.msk [vmem:[#allocation3 + $0x34] sm:$0xf] %vm4330_vm10, %v4285_v42  ;;  %4395 = vrot.lane.b32.xlu1 %v8297_v60, %s5832_s7  ;;  %v3466_v60 = vadd.f32 1.0, %v5783_v50 }
 0x4b8   : > { %4304 = vrot.lane.b32.xlu0 %v8509_v27, %s5830_s16  ;;  %s5618_s16 = smul.u32 48, %s8863_s22 }
 0x4b9   : > { %v4380_v17 = vpop.permute.xlu1 %4379  ;;  %v3502_v52 = vmul.f32 %v3466_v60, %v3214_v33 }
 0x4ba   : > { %v4289_v51 = vpop.permute.xlu0 %4288  ;;  %4440 = vst.msk [vmem:[#allocation3 + $0x30] sm:$0xf] %vm4427_vm11, %v4380_v17 }
 0x4bb   : > { %4346 = vst.msk [vmem:[#allocation3 + $0x3c] sm:$0xf] %vm4330_vm10, %v4289_v51  ;;  %4399 = vrot.lane.b32.xlu1 %v8379_v55, %s5832_s7  ;;  %v3753_v55 = vmul.f32 %v7925_v59, %v3501_v54  ;;  %v4588_v59 = vrot.slane %v4586_v13, 4 }
 0x4bc   : > { %4397 = vrot.lane.b32.xlu0 %v8308_v8, %s5832_s7  ;;  %v4589_v8 = vrot.slane %v8552_v34, 7 }
 0x4bd   : > { %v4384_v27 = vpop.permute.xlu1 %4383 }
 0x4be   : > { %v4382_v31 = vpop.permute.xlu0 %4381  ;;  %4442 = vst.msk [vmem:[#allocation3 + $0x38] sm:$0xf] %vm4427_vm11, %v4384_v27  ;;  %v4590_v49 = vsel %vm7658_vm4, %v4588_v59, %v4589_v8  ;;  %v4591_v13 = vrot.slane %v4589_v8, 4 }
 0x4bf   : > { %4441 = vst.msk [vmem:[#allocation3 + $0x34] sm:$0xf] %vm4427_vm11, %v4382_v31  ;;  %4513 = vrot.lane.b32.xlu1 %v8387_v58, %s5834_s12  ;;  %v3754_v58 = vmul.f32 %v7929_v57, %v3502_v52 }
 0x4c0   : > { %4401 = vrot.lane.b32.xlu0 %v8456_v32, %s5832_s7  ;;  %v5496_v32 = vpack.c.bf16 %v3753_v55, %v3753_v55  ;;  %v4593_v16 = vsel %vm7658_vm4, %v4591_v13, %v4592_v19  ;;  %s305_s7 = sadd.s32 %s5618_s16, %s5617_s14 }
 0x4c1   : > { %v4498_v7 = vpop.permute.xlu1 %4497  ;;  %v5497_v57 = vpack.c.bf16 %v3754_v58, %v3754_v58  ;;  %v8707_v58 = vld [vmem:[%s8843_s4] ss:$0 sm:$0xff] }
 0x4c2   : > { %v4386_v41 = vpop.permute.xlu0 %4385  ;;  %4558 = vst.msk [vmem:[#allocation3 + $0x30] sm:$0xf] %vm4545_vm12, %v4498_v7  ;;  %v4806_v37 = vrot.slane %v5496_v32, 5 }
 0x4c3   : > { %4443 = vst.msk [vmem:[#allocation3 + $0x3c] sm:$0xf] %vm4427_vm11, %v4386_v41  ;;  %4517 = vrot.lane.b32.xlu1 %v8545_v39, %s5834_s12  ;;  %v4598_v20 = vrot.slane %v5497_v57, 7  ;;  %v4809_v56 = vrot.slane %v5497_v57, 5 }
 0x4c4   : > { %4515 = vrot.lane.b32.xlu0 %v8410_v1, %s5834_s12  ;;  %v4595_v1 = vrot.slane %v5496_v32, 7  ;;  %v4808_v18 = vrot.slane %v4806_v37, 4  ;;  %v4807_v29 = vsel %vm5914_vm2, %v4805_v47, %v4806_v37 }
 0x4c5   : > { %v4502_v35 = vpop.permute.xlu1 %4501  ;;  %v4811_v24 = vrot.slane %v4809_v56, 4 }
 0x4c6   : > { %v4500_v63 = vpop.permute.xlu0 %4499  ;;  %4560 = vst.msk [vmem:[#allocation3 + $0x38] sm:$0xf] %vm4545_vm12, %v4502_v35  ;;  %v4596_v5 = vsel %vm7658_vm4, %v4594_v48, %v4595_v1  ;;  %v4597_v23 = vrot.slane %v4595_v1, 4  ;;  %v4810_v45 = vsel %vm5914_vm2, %v4808_v18, %v4809_v56  ;;  %vm5207_vm2 = vcmask 31744  }
 0x4c7   : > { %4559 = vst.msk [vmem:[#allocation3 + $0x34] sm:$0xf] %vm4545_vm12, %v4500_v63  ;;  %4640 = vrot.lane.b32.xlu1 %v4590_v49, %s5835_s19 }
 0x4c8   : > { %4519 = vrot.lane.b32.xlu0 %v8564_v62, %s5834_s12  ;;  %v4599_v46 = vsel %vm7658_vm4, %v4597_v23, %v4598_v20  ;;  %s5346_s12 = sshll.u32 %s305_s7, 3 }
 0x4c9   : > { %v4625_v53 = vpop.permute.xlu1 %4624  ;;  %s8713_s28 = scalar_lea.vmem %s8845_s6, %s5346_s12 }
 0x4ca   : > { %v4504_v39 = vpop.permute.xlu0 %4503  ;;  %4685 = vst.msk [vmem:[#allocation3 + $0x30] sm:$0xf] %vm4672_vm13, %v4625_v53 }
 0x4cb   : > { %4561 = vst.msk [vmem:[#allocation3 + $0x3c] sm:$0xf] %vm4545_vm12, %v4504_v39  ;;  %4644 = vrot.lane.b32.xlu1 %v4596_v5, %s5835_s19 }
 0x4cc   : > { %4642 = vrot.lane.b32.xlu0 %v4593_v16, %s5835_s19 }
 0x4cd   : > { %v4629_v6 = vpop.permute.xlu1 %4628 }
 0x4ce   : > { %v4627_v38 = vpop.permute.xlu0 %4626  ;;  %4687 = vst.msk [vmem:[#allocation3 + $0x38] sm:$0xf] %vm4672_vm13, %v4629_v6 }
 0x4cf   : > { %4686 = vst.msk [vmem:[#allocation3 + $0x34] sm:$0xf] %vm4672_vm13, %v4627_v38  ;;  %4737 = vrot.lane.b32.xlu1 %v8552_v34, %s5836_s8 }
 0x4d0   : > { %4646 = vrot.lane.b32.xlu0 %v4599_v46, %s5835_s19 }
 0x4d1   : > { %v4722_v62 = vpop.permute.xlu1 %4721 }
 0x4d2   : > { %v4631_v14 = vpop.permute.xlu0 %4630  ;;  %4782 = vst.msk [vmem:[#allocation3 + $0x30] sm:$0xf] %vm4769_vm14, %v4722_v62 }
 0x4d3   : > { %4688 = vst.msk [vmem:[#allocation3 + $0x3c] sm:$0xf] %vm4672_vm13, %v4631_v14  ;;  %4741 = vrot.lane.b32.xlu1 %v5496_v32, %s5836_s8 }
 0x4d4   : > { %4739 = vrot.lane.b32.xlu0 %v5495_v9, %s5836_s8 }
 0x4d5   : > { %v4726_v26 = vpop.permute.xlu1 %4725 }
 0x4d6   : > { %v4724_v43 = vpop.permute.xlu0 %4723  ;;  %4784 = vst.msk [vmem:[#allocation3 + $0x38] sm:$0xf] %vm4769_vm14, %v4726_v26 }
 0x4d7   : > { %4783 = vst.msk [vmem:[#allocation3 + $0x34] sm:$0xf] %vm4769_vm14, %v4724_v43  ;;  %4852 = vrot.lane.b32.xlu1 %v4804_v15, %s5837_s15 }
 0x4d8   : > { %4743 = vrot.lane.b32.xlu0 %v5497_v57, %s5836_s8 }
 0x4d9   : > { %v4837_v4 = vpop.permute.xlu1 %4836 }
 0x4da   : > { %v4728_v34 = vpop.permute.xlu0 %4727  ;;  %4897 = vst.msk [vmem:[#allocation3 + $0x30] sm:$0xf] %vm4884_vm15, %v4837_v4 }
 0x4db   : > { %4785 = vst.msk [vmem:[#allocation3 + $0x3c] sm:$0xf] %vm4769_vm14, %v4728_v34  ;;  %4856 = vrot.lane.b32.xlu1 %v4810_v45, %s5837_s15 }
 0x4dc   : > { %4854 = vrot.lane.b32.xlu0 %v4807_v29, %s5837_s15 }
 0x4dd   : > { %v4841_v12 = vpop.permute.xlu1 %4840 }
 0x4de   : > { %v4839_v21 = vpop.permute.xlu0 %4838  ;;  %4899 = vst.msk [vmem:[#allocation3 + $0x38] sm:$0xf] %vm4884_vm15, %v4841_v12 }
 0x4df   : > { %4898 = vst.msk [vmem:[#allocation3 + $0x34] sm:$0xf] %vm4884_vm15, %v4839_v21 }
 0x4e0   : > { %4858 = vrot.lane.b32.xlu0 %v4811_v24, %s5837_s15 }
 0x4e1   : > { %v4164_v28 = vpop.permute.xlu1 %4163 }
 0x4e2   : > { %v4843_v25 = vpop.permute.xlu0 %4842  ;;  %4220 = vst.msk [vmem:[#allocation3 + $0x40] sm:$0xf] %vm4203_vm9, %v4164_v28 }
 0x4e3   : > { %4900 = vst.msk [vmem:[#allocation3 + $0x3c] sm:$0xf] %vm4884_vm15, %v4843_v25 }
 0x4e5   : > { %v4168_v0 = vpop.permute.xlu1 %4167 }
 0x4e6   : > { %v4166_v11 = vpop.permute.xlu0 %4165  ;;  %4222 = vst.msk [vmem:[#allocation3 + $0x48] sm:$0xf] %vm4203_vm9, %v4168_v0  ;;  %v5706_v44 = vld [vmem:[#allocation3 + $0x30] sm:$0xff]  }
 0x4e7   : > { %4221 = vst.msk [vmem:[#allocation3 + $0x44] sm:$0xf] %vm4203_vm9, %v4166_v11  ;;  %5600 = vmatprep.mubr.msk.bf16.mxu1 %vm5037_vm0, %v5706_v44 }
 0x4e9   : > { %v4291_v22 = vpop.permute.xlu1 %4290 }
 0x4ea   : > { %v4170_v42 = vpop.permute.xlu0 %4169  ;;  %4347 = vst.msk [vmem:[#allocation3 + $0x40] sm:$0xf] %vm4330_vm10, %v4291_v22  ;;  %v5707_v40 = vld [vmem:[#allocation3 + $0x38] sm:$0xff]  }
 0x4eb   : > { %4223 = vst.msk [vmem:[#allocation3 + $0x4c] sm:$0xf] %vm4203_vm9, %v4170_v42  ;;  %5601 = vmatmul.mubr.msk.bf16.gmra.mxu1 %vm5037_vm0, %v5707_v40 }
 0x4ed   : > { %v4295_v50 = vpop.permute.xlu1 %4294 }
 0x4ee   : > { %v4293_v61 = vpop.permute.xlu0 %4292  ;;  %4349 = vst.msk [vmem:[#allocation3 + $0x48] sm:$0xf] %vm4330_vm10, %v4295_v50 }
 0x4ef   : > { %4348 = vst.msk [vmem:[#allocation3 + $0x44] sm:$0xf] %vm4330_vm10, %v4293_v61 }
 0x4f1   : > { %v4388_v10 = vpop.permute.xlu1 %4387 }
 0x4f2   : > { %v4297_v17 = vpop.permute.xlu0 %4296  ;;  %4444 = vst.msk [vmem:[#allocation3 + $0x40] sm:$0xf] %vm4427_vm11, %v4388_v10 }
 0x4f3   : > { %4350 = vst.msk [vmem:[#allocation3 + $0x4c] sm:$0xf] %vm4330_vm10, %v4297_v17 }
 0x4f5   : > { %v4392_v51 = vpop.permute.xlu1 %4391 }
 0x4f6   : > { %v4390_v2 = vpop.permute.xlu0 %4389  ;;  %4446 = vst.msk [vmem:[#allocation3 + $0x48] sm:$0xf] %vm4427_vm11, %v4392_v51 }
 0x4f7   : > { %4445 = vst.msk [vmem:[#allocation3 + $0x44] sm:$0xf] %vm4427_vm11, %v4390_v2 }
 0x4f9   : > { %v4506_v33 = vpop.permute.xlu1 %4505 }
 0x4fa   : > { %v4394_v60 = vpop.permute.xlu0 %4393  ;;  %4562 = vst.msk [vmem:[#allocation3 + $0x40] sm:$0xf] %vm4545_vm12, %v4506_v33 }
 0x4fb   : > { %4447 = vst.msk [vmem:[#allocation3 + $0x4c] sm:$0xf] %vm4427_vm11, %v4394_v60 }
 0x4fd   : > { %v4510_v54 = vpop.permute.xlu1 %4509 }
 0x4fe   : > { %v4508_v27 = vpop.permute.xlu0 %4507  ;;  %4564 = vst.msk [vmem:[#allocation3 + $0x48] sm:$0xf] %vm4545_vm12, %v4510_v54 }
 0x4ff   : > { %4563 = vst.msk [vmem:[#allocation3 + $0x44] sm:$0xf] %vm4545_vm12, %v4508_v27 }
 0x501   : > { %v4633_v31 = vpop.permute.xlu1 %4632 }
 0x502   : > { %v4512_v9 = vpop.permute.xlu0 %4511  ;;  %4689 = vst.msk [vmem:[#allocation3 + $0x40] sm:$0xf] %vm4672_vm13, %v4633_v31 }
 0x503   : > { %4565 = vst.msk [vmem:[#allocation3 + $0x4c] sm:$0xf] %vm4545_vm12, %v4512_v9 }
 0x505   : > { %v4637_v52 = vpop.permute.xlu1 %4636 }
 0x506   : > { %v4635_v55 = vpop.permute.xlu0 %4634  ;;  %4691 = vst.msk [vmem:[#allocation3 + $0x48] sm:$0xf] %vm4672_vm13, %v4637_v52 }
 0x507   : > { %4690 = vst.msk [vmem:[#allocation3 + $0x44] sm:$0xf] %vm4672_vm13, %v4635_v55 }
 0x509   : > { %v4730_v7 = vpop.permute.xlu1 %4729 }
 0x50a   : > { %v4639_v41 = vpop.permute.xlu0 %4638  ;;  %4786 = vst.msk [vmem:[#allocation3 + $0x40] sm:$0xf] %vm4769_vm14, %v4730_v7 }
 0x50b   : > { %4692 = vst.msk [vmem:[#allocation3 + $0x4c] sm:$0xf] %vm4672_vm13, %v4639_v41 }
 0x50d   : > { %v4734_v8 = vpop.permute.xlu1 %4733 }
 0x50e   : > { %v4732_v19 = vpop.permute.xlu0 %4731  ;;  %4788 = vst.msk [vmem:[#allocation3 + $0x48] sm:$0xf] %vm4769_vm14, %v4734_v8 }
 0x50f   : > { %4787 = vst.msk [vmem:[#allocation3 + $0x44] sm:$0xf] %vm4769_vm14, %v4732_v19  ;;  %v5590_v59 = vpop.f32.mrf.mxu1 }
 0x510   : > { %v5121_v32 = vadd.f32 %v5590_v59, %v8707_v58 }
 0x511   : > { %v4845_v35 = vpop.permute.xlu1 %4844  ;;  %v5112_v49 = vpop.f32.mrf.mxu1 }
 0x512   : > { %v4736_v63 = vpop.permute.xlu0 %4735  ;;  %4901 = vst.msk [vmem:[#allocation3 + $0x40] sm:$0xf] %vm4884_vm15, %v4845_v35  ;;  %v5113_v48 = vadd.f32 %v8707_v58, %v5112_v49 }
 0x513   : > { %5210 = vst.msk [vmem:[%s8713_s28 + $0x10] sm:$0xff] %vm5207_vm2, %v5121_v32  ;;  %v5591_v57 = vpop.f32.mrf.mxu1 }
 0x514   : > { %4789 = vst.msk [vmem:[#allocation3 + $0x4c] sm:$0xf] %vm4769_vm14, %v4736_v63  ;;  %v5124_v1 = vadd.f32 %v5591_v57, %v8707_v58 }
 0x515   : > { %5208 = vst.msk [vmem:[%s8713_s28] sm:$0xff] %vm5207_vm2, %v5113_v48  ;;  %v4849_v53 = vpop.permute.xlu1 %4848  ;;  %v5115_v39 = vpop.f32.mrf.mxu1 }
 0x516   : > { %v4847_v13 = vpop.permute.xlu0 %4846  ;;  %4903 = vst.msk [vmem:[#allocation3 + $0x48] sm:$0xf] %vm4884_vm15, %v4849_v53  ;;  %v5116_v5 = vadd.f32 %v8707_v58, %v5115_v39 }
 0x517   : > { %5211 = vst.msk [vmem:[%s8713_s28 + $0x18] sm:$0xff] %vm5207_vm2, %v5124_v1 }
 0x518   : > { %4902 = vst.msk [vmem:[#allocation3 + $0x44] sm:$0xf] %vm4884_vm15, %v4847_v13 }
 0x519   : > { %5209 = vst.msk [vmem:[%s8713_s28 + $0x8] sm:$0xff] %vm5207_vm2, %v5116_v5  ;;  %v4172_v16 = vpop.permute.xlu1 %4171 }
 0x51a   : > { %v4851_v20 = vpop.permute.xlu0 %4850  ;;  %4224 = vst.msk [vmem:[#allocation3 + $0x50] sm:$0xf] %vm4203_vm9, %v4172_v16 }
 0x51b   : > { %4904 = vst.msk [vmem:[#allocation3 + $0x4c] sm:$0xf] %vm4884_vm15, %v4851_v20 }
 0x51d   : > { %v4176_v6 = vpop.permute.xlu1 %4175 }
 0x51e   : > { %v4174_v23 = vpop.permute.xlu0 %4173  ;;  %4226 = vst.msk [vmem:[#allocation3 + $0x58] sm:$0xf] %vm4203_vm9, %v4176_v6 }
 0x51f   : > { %v5708_v38 = vld [vmem:[#allocation3 + $0x40] sm:$0xff]   ;;  %4225 = vst.msk [vmem:[#allocation3 + $0x54] sm:$0xf] %vm4203_vm9, %v4174_v23 }
 0x520   : > { %5604 = vmatprep.mubr.msk.bf16.mxu1 %vm5037_vm0, %v5708_v38 }
 0x521   : > { %v4299_v46 = vpop.permute.xlu1 %4298 }
 0x522   : > { %v4178_v62 = vpop.permute.xlu0 %4177  ;;  %4351 = vst.msk [vmem:[#allocation3 + $0x50] sm:$0xf] %vm4330_vm10, %v4299_v46  ;;  %v5709_v14 = vld [vmem:[#allocation3 + $0x48] sm:$0xff]  }
 0x523   : > { %4227 = vst.msk [vmem:[#allocation3 + $0x5c] sm:$0xf] %vm4203_vm9, %v4178_v62  ;;  %5605 = vmatmul.mubr.msk.bf16.gmra.mxu1 %vm5037_vm0, %v5709_v14 }
 0x525   : > { %v4303_v36 = vpop.permute.xlu1 %4302 }
 0x526   : > { %v4301_v3 = vpop.permute.xlu0 %4300  ;;  %4353 = vst.msk [vmem:[#allocation3 + $0x58] sm:$0xf] %vm4330_vm10, %v4303_v36 }
 0x527   : > { %4352 = vst.msk [vmem:[#allocation3 + $0x54] sm:$0xf] %vm4330_vm10, %v4301_v3 }
 0x529   : > { %v4396_v37 = vpop.permute.xlu1 %4395 }
 0x52a   : > { %v4305_v26 = vpop.permute.xlu0 %4304  ;;  %4448 = vst.msk [vmem:[#allocation3 + $0x50] sm:$0xf] %vm4427_vm11, %v4396_v37 }
 0x52b   : > { %4354 = vst.msk [vmem:[#allocation3 + $0x5c] sm:$0xf] %vm4330_vm10, %v4305_v26 }
 0x52d   : > { %v4400_v43 = vpop.permute.xlu1 %4399 }
 0x52e   : > { %v4398_v15 = vpop.permute.xlu0 %4397  ;;  %4450 = vst.msk [vmem:[#allocation3 + $0x58] sm:$0xf] %vm4427_vm11, %v4400_v43 }
 0x52f   : > { %4449 = vst.msk [vmem:[#allocation3 + $0x54] sm:$0xf] %vm4427_vm11, %v4398_v15 }
 0x531   : > { %v4514_v56 = vpop.permute.xlu1 %4513 }
 0x532   : > { %v4402_v47 = vpop.permute.xlu0 %4401  ;;  %4566 = vst.msk [vmem:[#allocation3 + $0x50] sm:$0xf] %vm4545_vm12, %v4514_v56 }
 0x533   : > { %4451 = vst.msk [vmem:[#allocation3 + $0x5c] sm:$0xf] %vm4427_vm11, %v4402_v47 }
 0x535   : > { %v4518_v18 = vpop.permute.xlu1 %4517 }
 0x536   : > { %v4516_v4 = vpop.permute.xlu0 %4515  ;;  %4568 = vst.msk [vmem:[#allocation3 + $0x58] sm:$0xf] %vm4545_vm12, %v4518_v18 }
 0x537   : > { %4567 = vst.msk [vmem:[#allocation3 + $0x54] sm:$0xf] %vm4545_vm12, %v4516_v4 }
 0x539   : > { %v4641_v34 = vpop.permute.xlu1 %4640 }
 0x53a   : > { %v4520_v45 = vpop.permute.xlu0 %4519  ;;  %4693 = vst.msk [vmem:[#allocation3 + $0x50] sm:$0xf] %vm4672_vm13, %v4641_v34 }
 0x53b   : > { %4569 = vst.msk [vmem:[#allocation3 + $0x5c] sm:$0xf] %vm4545_vm12, %v4520_v45 }
 0x53d   : > { %v4645_v29 = vpop.permute.xlu1 %4644 }
 0x53e   : > { %v4643_v12 = vpop.permute.xlu0 %4642  ;;  %4695 = vst.msk [vmem:[#allocation3 + $0x58] sm:$0xf] %vm4672_vm13, %v4645_v29 }
 0x53f   : > { %4694 = vst.msk [vmem:[#allocation3 + $0x54] sm:$0xf] %vm4672_vm13, %v4643_v12  ;;  %v5594_v21 = vpop.f32.mrf.mxu1 }
 0x540   : > { %v5137_v24 = vadd.f32 %v5594_v21, %v8707_v58 }
 0x541   : > { %v4738_v28 = vpop.permute.xlu1 %4737  ;;  %v5128_v0 = vpop.f32.mrf.mxu1 }
 0x542   : > { %v4647_v25 = vpop.permute.xlu0 %4646  ;;  %4790 = vst.msk [vmem:[#allocation3 + $0x50] sm:$0xf] %vm4769_vm14, %v4738_v28  ;;  %v5129_v11 = vadd.f32 %v8707_v58, %v5128_v0 }
 0x543   : > { %5214 = vst.msk [vmem:[%s8713_s28 + $0x30] sm:$0xff] %vm5207_vm2, %v5137_v24  ;;  %v5595_v44 = vpop.f32.mrf.mxu1 }
 0x544   : > { %4696 = vst.msk [vmem:[#allocation3 + $0x5c] sm:$0xf] %vm4672_vm13, %v4647_v25  ;;  %v5140_v22 = vadd.f32 %v5595_v44, %v8707_v58 }
 0x545   : > { %5212 = vst.msk [vmem:[%s8713_s28 + $0x20] sm:$0xff] %vm5207_vm2, %v5129_v11  ;;  %v4742_v42 = vpop.permute.xlu1 %4741  ;;  %v5131_v50 = vpop.f32.mrf.mxu1 }
 0x546   : > { %v4740_v40 = vpop.permute.xlu0 %4739  ;;  %4792 = vst.msk [vmem:[#allocation3 + $0x58] sm:$0xf] %vm4769_vm14, %v4742_v42  ;;  %v5132_v61 = vadd.f32 %v8707_v58, %v5131_v50 }
 0x547   : > { %5215 = vst.msk [vmem:[%s8713_s28 + $0x38] sm:$0xff] %vm5207_vm2, %v5140_v22 }
 0x548   : > { %4791 = vst.msk [vmem:[#allocation3 + $0x54] sm:$0xf] %vm4769_vm14, %v4740_v40 }
 0x549   : > { %5213 = vst.msk [vmem:[%s8713_s28 + $0x28] sm:$0xff] %vm5207_vm2, %v5132_v61  ;;  %v4853_v10 = vpop.permute.xlu1 %4852 }
 0x54a   : > { %v4744_v17 = vpop.permute.xlu0 %4743  ;;  %4905 = vst.msk [vmem:[#allocation3 + $0x50] sm:$0xf] %vm4884_vm15, %v4853_v10 }
 0x54b   : > { %4793 = vst.msk [vmem:[#allocation3 + $0x5c] sm:$0xf] %vm4769_vm14, %v4744_v17 }
 0x54c   : > { %4795 = vst.msk [vmem:[#allocation3 + $0x5c] sm:$0x8] %vm4794_vm1, %v5833_v30 }
 0x54d   : > { %v4857_v51 = vpop.permute.xlu1 %4856 }
 0x54e   : > { %v4855_v2 = vpop.permute.xlu0 %4854  ;;  %4907 = vst.msk [vmem:[#allocation3 + $0x58] sm:$0xf] %vm4884_vm15, %v4857_v51 }
 0x54f   : > { %4906 = vst.msk [vmem:[#allocation3 + $0x54] sm:$0xf] %vm4884_vm15, %v4855_v2 }
 0x552   : > { %v4859_v33 = vpop.permute.xlu0 %4858 }
 0x553   : > { %4909 = vst.msk [vmem:[#allocation3 + $0x5c] sm:$0x7] %vm4908_vm3, %v4859_v33 }
 0x556   : > { %v5710_v60 = vld [vmem:[#allocation3 + $0x50] sm:$0xff]  }
 0x557   : > { %5608 = vmatprep.mubr.msk.bf16.mxu1 %vm5037_vm0, %v5710_v60 }
 0x55a   : > { %v5711_v54 = vld [vmem:[#allocation3 + $0x58] sm:$0xff]  }
 0x55b   : > { %5609 = vmatmul.mubr.msk.bf16.gmra.mxu1 %vm5037_vm0, %v5711_v54 }
 0x573   : > { %v5598_v30 = vpop.f32.mrf.mxu1 }
 0x574   : > { %v5153_v27 = vadd.f32 %v5598_v30, %v8707_v58 }
 0x575   : > { %v5144_v31 = vpop.f32.mrf.mxu1 }
 0x576   : > { %5218 = vst.msk [vmem:[%s8713_s28 + $0x50] sm:$0xff] %vm5207_vm2, %v5153_v27  ;;  %v5145_v9 = vadd.f32 %v8707_v58, %v5144_v31 }
 0x577   : > { %v5599_v52 = vpop.f32.mrf.mxu1 }
 0x578   : > { %5216 = vst.msk [vmem:[%s8713_s28 + $0x40] sm:$0xff] %vm5207_vm2, %v5145_v9  ;;  %v5156_v55 = vadd.f32 %v5599_v52, %v8707_v58 }
 0x579   : > { %v5147_v7 = vpop.f32.mrf.mxu1 }
 0x57a   : > { %5219 = vst.msk [vmem:[%s8713_s28 + $0x58] sm:$0xff] %vm5207_vm2, %v5156_v55  ;;  %v5148_v41 = vadd.f32 %v8707_v58, %v5147_v7 }
 0x57c   : > { %5217 = vst.msk [vmem:[%s8713_s28 + $0x48] sm:$0xff] %vm5207_vm2, %v5148_v41 }
 0x5ab   : > { %v5602_v8 = vpop.f32.mrf.mxu1 }
 0x5ac   : > { %v5169_v19 = vadd.f32 %v5602_v8, %v8707_v58 }
 0x5ad   : > { %v5160_v59 = vpop.f32.mrf.mxu1 }
 0x5ae   : > { %5222 = vst.msk [vmem:[%s8713_s28 + $0x70] sm:$0xff] %vm5207_vm2, %v5169_v19  ;;  %v5161_v32 = vadd.f32 %v8707_v58, %v5160_v59 }
 0x5af   : > { %v5603_v35 = vpop.f32.mrf.mxu1 }
 0x5b0   : > { %5220 = vst.msk [vmem:[%s8713_s28 + $0x60] sm:$0xff] %vm5207_vm2, %v5161_v32  ;;  %v5172_v63 = vadd.f32 %v5603_v35, %v8707_v58 }
 0x5b1   : > { %v5163_v49 = vpop.f32.mrf.mxu1 }
 0x5b2   : > { %5223 = vst.msk [vmem:[%s8713_s28 + $0x78] sm:$0xff] %vm5207_vm2, %v5172_v63  ;;  %v5164_v48 = vadd.f32 %v8707_v58, %v5163_v49 }
 0x5b4   : > { %5221 = vst.msk [vmem:[%s8713_s28 + $0x68] sm:$0xff] %vm5207_vm2, %v5164_v48 }
 0x5e3   : > { %v5606_v57 = vpop.f32.mrf.mxu1 }
 0x5e4   : > { %v5185_v1 = vadd.f32 %v5606_v57, %v8707_v58 }
 0x5e5   : > { %v5176_v53 = vpop.f32.mrf.mxu1 }
 0x5e6   : > { %5226 = vst.msk [vmem:[%s8713_s28 + $0x90] sm:$0xff] %vm5207_vm2, %v5185_v1  ;;  %v5177_v13 = vadd.f32 %v8707_v58, %v5176_v53 }
 0x5e7   : > { %v5607_v39 = vpop.f32.mrf.mxu1 }
 0x5e8   : > { %5224 = vst.msk [vmem:[%s8713_s28 + $0x80] sm:$0xff] %vm5207_vm2, %v5177_v13  ;;  %v5188_v5 = vadd.f32 %v5607_v39, %v8707_v58 }
 0x5e9   : > { %v5179_v16 = vpop.f32.mrf.mxu1 }
 0x5ea   : > { %5227 = vst.msk [vmem:[%s8713_s28 + $0x98] sm:$0xff] %vm5207_vm2, %v5188_v5  ;;  %v5180_v20 = vadd.f32 %v8707_v58, %v5179_v16 }
 0x5ec   : > { %5225 = vst.msk [vmem:[%s8713_s28 + $0x88] sm:$0xff] %vm5207_vm2, %v5180_v20 }
 0x61b   : > { %v5610_v6 = vpop.f32.mrf.mxu1 }
 0x61c   : > { %v5201_v23 = vadd.f32 %v5610_v6, %v8707_v58 }
 0x61d   : > { %v5192_v38 = vpop.f32.mrf.mxu1 }
 0x61e   : > { %5230 = vst.msk [vmem:[%s8713_s28 + $0xb0] sm:$0xff] %vm5207_vm2, %v5201_v23  ;;  %v5193_v46 = vadd.f32 %v8707_v58, %v5192_v38 }
 0x61f   : > { %v5611_v62 = vpop.f32.mrf.mxu1 }
 0x620   : > { %5228 = vst.msk [vmem:[%s8713_s28 + $0xa0] sm:$0xff] %vm5207_vm2, %v5193_v46  ;;  %v5204_v14 = vadd.f32 %v5611_v62, %v8707_v58 }
 0x621   : > { %v5195_v36 = vpop.f32.mrf.mxu1 }
 0x622   : > { %5231 = vst.msk [vmem:[%s8713_s28 + $0xb8] sm:$0xff] %vm5207_vm2, %v5204_v14  ;;  %v5196_v3 = vadd.f32 %v8707_v58, %v5195_v36 }
 0x624   : > { %5229 = vst.msk [vmem:[%s8713_s28 + $0xa8] sm:$0xff] %vm5207_vm2, %v5196_v3 }
 0x625 PF: > { %s16_s25 = sadd.s32 1, %s5823_s25   ;;  %s8852_s21 = smov %s5815_s23 }
 0x626   : > { %p13_p7 = scmp.ge.s32.totalorder %s16_s25, 6   ;;  %s8853_s22 = smov %s5819_s24 }
 0x627   : > { %s8854_s23 = smov %s8857_s26  ;;  %s8855_s24 = smov %s8861_s27 }
 0x628   :  { %15 = sbr.rel (!%p13_p7) target bundleno = 3 (0x3), region = 77 }

</bundles_post_ra>
